<compile_context>
chip_gen: v7x
topology: tpu7x:2x2x1
jax: 0.10.0
libtpu: 0.0.40
codegen_flags: <defaults>
</compile_context>

<pallas_src>
import functools
import math

import jax
import jax.numpy as jnp
from jax.experimental import pallas as pl
from jax.experimental.pallas import tpu as pltpu


# ----------------------------------------------------------------------------
# small helpers
# ----------------------------------------------------------------------------
def _round_up(x, m):
    return (x + m - 1) // m * m


def _pick_tile(dim, cap, granule):
    """Tile <= cap, multiple of `granule`, minimizing padding.

    Returns (tile, padded_dim) with padded_dim % tile == 0.
    """
    dpad = _round_up(dim, granule)
    if dpad <= cap:
        return dpad, dpad
    top = cap - cap % granule
    for t in range(top, granule - 1, -granule):
        if dpad % t == 0:
            return t, dpad
    return top, _round_up(dpad, top)


def _pick_m_tile(m, cap):
    """Row tile: multiple of 8, <= cap, preferring an exact divisor of the
    padded M (no waste) that still yields >= 2 blocks so a 'parallel' M axis
    can be sharded across both TensorCores on v7x."""
    mp = _round_up(m, 8)
    if mp <= 8:
        return 8, 8
    top = min(cap, mp)
    top -= top % 8
    for t in range(top, 7, -8):
        if mp % t == 0 and mp // t >= 2:
            return t, mp
    t = min(cap, _round_up((mp + 1) // 2, 8))
    return t, _round_up(mp, t)


def _pad2d(x, rows, cols):
    r, c = x.shape
    if r == rows and c == cols:
        return x
    return jnp.pad(x, ((0, rows - r), (0, cols - c)))


# ----------------------------------------------------------------------------
# Kernel 1: projection  y = (x [+ add]) @ W_t + b   (+ optional ReLU)
#   - single-K-step fast path (no accumulator scratch)
#   - multi-K-step path with f32 VMEM accumulator (K last, "arbitrary")
# ----------------------------------------------------------------------------
def _linear_kernel(*refs, activation, has_add, nk):
    if nk == 1:
        if has_add:
            x_ref, a_ref, w_ref, b_ref, o_ref = refs
        else:
            x_ref, w_ref, b_ref, o_ref = refs
        x = x_ref[...]
        if has_add:
            x = x + a_ref[...]
        y = jnp.dot(x, w_ref[...], preferred_element_type=jnp.float32)
        y = y + b_ref[...].astype(jnp.float32)
        if activation == "relu":
            y = jnp.maximum(y, 0.0)
        o_ref[...] = y.astype(o_ref.dtype)
    else:
        if has_add:
            x_ref, a_ref, w_ref, b_ref, o_ref, acc_ref = refs
        else:
            x_ref, w_ref, b_ref, o_ref, acc_ref = refs
        kk = pl.program_id(2)

        @pl.when(kk == 0)
        def _init():
            acc_ref[...] = jnp.zeros_like(acc_ref)

        x = x_ref[...]
        if has_add:
            x = x + a_ref[...]
        acc_ref[...] += jnp.dot(x, w_ref[...], preferred_element_type=jnp.float32)

        @pl.when(kk == nk - 1)
        def _finalize():
            y = acc_ref[...] + b_ref[...].astype(jnp.float32)
            if activation == "relu":
                y = jnp.maximum(y, 0.0)
            o_ref[...] = y.astype(o_ref.dtype)


def pallas_linear(x, w_t, b, add=None, activation=None, bm=256, bn=512, bk=512):
    """y = (x + add) @ w_t + b, optional ReLU.  w_t is pre-transposed [K, N]."""
    m, kdim = x.shape
    k2, n = w_t.shape
    assert kdim == k2 and b.shape == (n,)

    tm, mp = _pick_m_tile(m, bm)
    tn, np_ = _pick_tile(n, bn, 128)        # lane-dense output tiles
    tk, kp = _pick_tile(kdim, bk, 128)
    nk = kp // tk

    xp = _pad2d(x, mp, kp)
    wp = _pad2d(w_t, kp, np_)
    bp = _pad2d(b.reshape(1, n), 1, np_)
    has_add = add is not None

    inputs = [xp]
    if has_add:
        inputs.append(_pad2d(add, mp, kp))
    inputs += [wp, bp]

    kernel = functools.partial(_linear_kernel, activation=activation,
                               has_add=has_add, nk=nk)

    if nk == 1:
        in_specs = [pl.BlockSpec((tm, tk), lambda i, j: (i, 0))]
        if has_add:
            in_specs.append(pl.BlockSpec((tm, tk), lambda i, j: (i, 0)))
        in_specs += [pl.BlockSpec((tk, tn), lambda i, j: (0, j)),
                     pl.BlockSpec((1, tn), lambda i, j: (0, j))]
        grid = (mp // tm, np_ // tn)
        out_spec = pl.BlockSpec((tm, tn), lambda i, j: (i, j))
        scratch = []
        semantics = ("parallel", "parallel")
    else:
        in_specs = [pl.BlockSpec((tm, tk), lambda i, j, kk: (i, kk))]
        if has_add:
            in_specs.append(pl.BlockSpec((tm, tk), lambda i, j, kk: (i, kk)))
        in_specs += [pl.BlockSpec((tk, tn), lambda i, j, kk: (kk, j)),
                     pl.BlockSpec((1, tn), lambda i, j, kk: (0, j))]
        grid = (mp // tm, np_ // tn, nk)
        out_spec = pl.BlockSpec((tm, tn), lambda i, j, kk: (i, j))
        scratch = [pltpu.VMEM((tm, tn), jnp.float32)]
        semantics = ("parallel", "parallel", "arbitrary")

    out = pl.pallas_call(
        kernel,
        out_shape=jax.ShapeDtypeStruct((mp, np_), x.dtype),
        grid=grid,
        in_specs=in_specs,
        out_specs=out_spec,
        scratch_shapes=scratch,
        compiler_params=pltpu.CompilerParams(dimension_semantics=semantics),
    )(*inputs)

    if (mp, np_) != (m, n):
        out = out[:m, :n]
    return out


# ----------------------------------------------------------------------------
# Kernel 2: output-projection + residual + LayerNorm fused
#   y = LN(residual + x @ W + b) * gamma + beta
# ----------------------------------------------------------------------------
def _proj_ln_kernel(x_ref, w_ref, b_ref, r_ref, g_ref, bb_ref, o_ref, *, eps):
    y = jnp.dot(x_ref[...], w_ref[...], preferred_element_type=jnp.float32)
    y = y + b_ref[...].astype(jnp.float32) + r_ref[...].astype(jnp.float32)
    mu = jnp.mean(y, axis=-1, keepdims=True)
    var = jnp.mean(jnp.square(y - mu), axis=-1, keepdims=True)
    yn = (y - mu) * jax.lax.rsqrt(var + eps)
    o_ref[...] = (yn * g_ref[...] + bb_ref[...]).astype(o_ref.dtype)


def pallas_proj_ln(x, w_t, bias, residual, gamma, beta, eps=1e-5, bm=256):
    m, kdim = x.shape
    k2, n = w_t.shape
    assert kdim == k2 and residual.shape == (m, n)
    tm, mp = _pick_m_tile(m, bm)
    xp = _pad2d(x, mp, kdim)
    rp = _pad2d(residual, mp, n)
    kernel = functools.partial(_proj_ln_kernel, eps=eps)
    out = pl.pallas_call(
        kernel,
        out_shape=jax.ShapeDtypeStruct((mp, n), x.dtype),
        grid=(mp // tm,),
        in_specs=[pl.BlockSpec((tm, kdim), lambda i: (i, 0)),
                  pl.BlockSpec((kdim, n), lambda i: (0, 0)),
                  pl.BlockSpec((1, n), lambda i: (0, 0)),
                  pl.BlockSpec((tm, n), lambda i: (i, 0)),
                  pl.BlockSpec((1, n), lambda i: (0, 0)),
                  pl.BlockSpec((1, n), lambda i: (0, 0))],
        out_specs=pl.BlockSpec((tm, n), lambda i: (i, 0)),
        compiler_params=pltpu.CompilerParams(dimension_semantics=("parallel",)),
    )(xp, w_t, bias.reshape(1, n), rp, gamma.reshape(1, n), beta.reshape(1, n))
    return out[:m] if mp != m else out


# ----------------------------------------------------------------------------
# Kernel 3: fused FFN  y = LN(x + relu(x @ W1 + b1) @ W2 + b2) * gamma + beta
# (hidden activation stays in VMEM/vregs, never hits HBM)
# ----------------------------------------------------------------------------
def _ffn_ln_kernel(x_ref, w1_ref, b1_ref, w2_ref, b2_ref, g_ref, bb_ref, o_ref,
                   *, eps):
    x = x_ref[...]
    h = jnp.dot(x, w1_ref[...], preferred_element_type=jnp.float32)
    h = jnp.maximum(h + b1_ref[...].astype(jnp.float32), 0.0)
    y = jnp.dot(h.astype(w2_ref.dtype), w2_ref[...],
                preferred_element_type=jnp.float32)
    y = y + b2_ref[...].astype(jnp.float32) + x.astype(jnp.float32)
    mu = jnp.mean(y, axis=-1, keepdims=True)
    var = jnp.mean(jnp.square(y - mu), axis=-1, keepdims=True)
    yn = (y - mu) * jax.lax.rsqrt(var + eps)
    o_ref[...] = (yn * g_ref[...] + bb_ref[...]).astype(o_ref.dtype)


def pallas_ffn_ln(x, w1, b1, w2, b2, gamma, beta, eps=1e-5, bm=256):
    m, d = x.shape
    dff = w1.shape[1]
    assert w1.shape == (d, dff) and w2.shape == (dff, d)
    tm, mp = _pick_m_tile(m, bm)
    xp = _pad2d(x, mp, d)
    kernel = functools.partial(_ffn_ln_kernel, eps=eps)
    out = pl.pallas_call(
        kernel,
        out_shape=jax.ShapeDtypeStruct((mp, d), x.dtype),
        grid=(mp // tm,),
        in_specs=[pl.BlockSpec((tm, d), lambda i: (i, 0)),
                  pl.BlockSpec((d, dff), lambda i: (0, 0)),
                  pl.BlockSpec((1, dff), lambda i: (0, 0)),
                  pl.BlockSpec((dff, d), lambda i: (0, 0)),
                  pl.BlockSpec((1, d), lambda i: (0, 0)),
                  pl.BlockSpec((1, d), lambda i: (0, 0)),
                  pl.BlockSpec((1, d), lambda i: (0, 0))],
        out_specs=pl.BlockSpec((tm, d), lambda i: (i, 0)),
        compiler_params=pltpu.CompilerParams(dimension_semantics=("parallel",)),
    )(xp, w1, b1.reshape(1, dff), w2, b2.reshape(1, d),
      gamma.reshape(1, d), beta.reshape(1, d))
    return out[:m] if mp != m else out


# ----------------------------------------------------------------------------
# Kernel 4: per-batch attention, all heads in one grid step, lane-dense output
# ----------------------------------------------------------------------------
def _attention_kernel(q_ref, k_ref, v_ref, o_ref, *, nhead, scale):
    d = q_ref.shape[2]
    dh = d // nhead
    outs = []
    for h in range(nhead):                         # static unroll over heads
        lo, hi = h * dh, (h + 1) * dh
        q = q_ref[0, :, lo:hi].astype(jnp.float32) * scale    # (T, Dh)
        k = k_ref[0, :, lo:hi].astype(jnp.float32)            # (S, Dh)
        v = v_ref[0, :, lo:hi].astype(jnp.float32)            # (S, Dh)
        s = jax.lax.dot_general(q, k, (((1,), (1,)), ((), ())),
                                preferred_element_type=jnp.float32)  # (T, S)
        s = s - jnp.max(s, axis=-1, keepdims=True)
        p = jnp.exp(s)
        p = p * pl.reciprocal(jnp.sum(p, axis=-1, keepdims=True), approx=True)
        outs.append(jnp.dot(p, v, preferred_element_type=jnp.float32))
    o_ref[0] = jnp.concatenate(outs, axis=-1).astype(o_ref.dtype)  # (T, D)


def pallas_attention(q3, k3, v3, *, nhead, scale, q_col=0, k_col=0):
    """q3: (B, T, Cq*D); k3: (B, S, Ck*D); v3: (B, S, D) -> (B, T, D).

    q_col / k_col select a column block of width D inside a fused projection
    output (e.g. the concatenated QK projection) directly via the BlockSpec
    index_map, so no wrapper-side slicing / transposes are needed.
    """
    b, t, _ = q3.shape
    s = k3.shape[1]
    d = v3.shape[2]
    if q_col or k_col:
        assert d % 128 == 0, "fused-QK column selection needs d_model % 128 == 0"
    kernel = functools.partial(_attention_kernel, nhead=nhead, scale=scale)
    return pl.pallas_call(
        kernel,
        out_shape=jax.ShapeDtypeStruct((b, t, d), q3.dtype),
        grid=(b,),
        in_specs=[pl.BlockSpec((1, t, d), lambda i: (i, 0, q_col)),
                  pl.BlockSpec((1, s, d), lambda i: (i, 0, k_col)),
                  pl.BlockSpec((1, s, d), lambda i: (i, 0, 0))],
        out_specs=pl.BlockSpec((1, t, d), lambda i: (i, 0, 0)),
        compiler_params=pltpu.CompilerParams(dimension_semantics=("parallel",)),
    )(q3, k3, v3)


# ----------------------------------------------------------------------------
# Kernel 5: standalone LayerNorm (only used for the final decoder norm)
# ----------------------------------------------------------------------------
def _layernorm_kernel(x_ref, g_ref, b_ref, o_ref, *, eps):
    y = x_ref[...].astype(jnp.float32)
    mu = jnp.mean(y, axis=-1, keepdims=True)
    var = jnp.mean(jnp.square(y - mu), axis=-1, keepdims=True)
    yn = (y - mu) * jax.lax.rsqrt(var + eps)
    o_ref[...] = (yn * g_ref[...] + b_ref[...]).astype(o_ref.dtype)


def pallas_layernorm(x, gamma, beta, eps=1e-5, bm=256):
    m, d = x.shape
    tm, mp = _pick_m_tile(m, bm)
    xp = _pad2d(x, mp, d)
    kernel = functools.partial(_layernorm_kernel, eps=eps)
    out = pl.pallas_call(
        kernel,
        out_shape=jax.ShapeDtypeStruct((mp, d), x.dtype),
        grid=(mp // tm,),
        in_specs=[pl.BlockSpec((tm, d), lambda i: (i, 0)),
                  pl.BlockSpec((1, d), lambda i: (0, 0)),
                  pl.BlockSpec((1, d), lambda i: (0, 0))],
        out_specs=pl.BlockSpec((tm, d), lambda i: (i, 0)),
        compiler_params=pltpu.CompilerParams(dimension_semantics=("parallel",)),
    )(xp, gamma.reshape(1, d), beta.reshape(1, d))
    return out[:m] if mp != m else out


# ----------------------------------------------------------------------------
# Decoder built from the kernels (DETR-style post-norm decoder layer)
# Activations are kept in (B*T, D) / (B*S, D) row order so the attention
# BlockSpecs can pick per-batch tiles with zero HBM transposes.
# ----------------------------------------------------------------------------
def decoder_layer_forward(tgt2d, mem2d, qp2d, pos2d, p, *, nhead, t, s, b, d):
    dh = d // nhead
    scale = 1.0 / math.sqrt(dh)

    # --- self-attention: q = k = tgt + query_pos (fused QK proj), v = tgt
    qk = pallas_linear(tgt2d, p["sa_wqk"], p["sa_bqk"], add=qp2d)   # (B*T, 2D)
    v = pallas_linear(tgt2d, p["sa_wv"], p["sa_bv"])                # (B*T, D)
    qk3 = qk.reshape(b, t, 2 * d)
    attn = pallas_attention(qk3, qk3, v.reshape(b, t, d),
                            nhead=nhead, scale=scale, q_col=0, k_col=1)
    tgt2d = pallas_proj_ln(attn.reshape(b * t, d), p["sa_wo"], p["sa_bo"],
                           residual=tgt2d, gamma=p["ln1_g"], beta=p["ln1_b"])

    # --- cross-attention: q = tgt + query_pos, k = memory + pos, v = memory
    q = pallas_linear(tgt2d, p["ca_wq"], p["ca_bq"], add=qp2d)
    k = pallas_linear(mem2d, p["ca_wk"], p["ca_bk"], add=pos2d)
    v = pallas_linear(mem2d, p["ca_wv"], p["ca_bv"])
    attn = pallas_attention(q.reshape(b, t, d), k.reshape(b, s, d),
                            v.reshape(b, s, d), nhead=nhead, scale=scale)
    tgt2d = pallas_proj_ln(attn.reshape(b * t, d), p["ca_wo"], p["ca_bo"],
                           residual=tgt2d, gamma=p["ln2_g"], beta=p["ln2_b"])

    # --- fused FFN + residual + LayerNorm (dropout = identity in eval)
    tgt2d = pallas_ffn_ln(tgt2d, p["ff_w1"], p["ff_b1"], p["ff_w2"], p["ff_b2"],
                          p["ln3_g"], p["ln3_b"])
    return tgt2d


def transformer_decoder_forward(tgt, memory, params, *, nhead,
                                pos=None, query_pos=None):
    """tgt: (T, B, D); memory: (S, B, D); pos/query_pos same shapes or None."""
    t, b, d = tgt.shape
    s = memory.shape[0]
    if query_pos is None:
        query_pos = jnp.zeros_like(tgt)
    if pos is None:
        pos = jnp.zeros_like(memory)

    # one-time layout change (T,B,D) -> (B,T,D): replaces the per-layer
    # split/merge-head HBM transposes of the previous version.
    tgt2d = tgt.transpose(1, 0, 2).reshape(b * t, d)
    mem2d = memory.transpose(1, 0, 2).reshape(b * s, d)
    qp2d = query_pos.transpose(1, 0, 2).reshape(b * t, d)
    pos2d = pos.transpose(1, 0, 2).reshape(b * s, d)

    out = tgt2d
    for p in params["layers"]:
        out = decoder_layer_forward(out, mem2d, qp2d, pos2d, p,
                                    nhead=nhead, t=t, s=s, b=b, d=d)
    out = pallas_layernorm(out, params["norm_g"], params["norm_b"])
    return out.reshape(b, t, d).transpose(1, 0, 2)


# ----------------------------------------------------------------------------
# Parameter init (weights stored PRE-TRANSPOSED: [in_features, out_features];
# self-attn Q/K weights pre-concatenated along N for the fused projection)
# ----------------------------------------------------------------------------
def init_params(key, num_layers, d_model, nhead, dim_ff):
    def linear_init(k, fan_in, fan_out):
        bound = 1.0 / math.sqrt(fan_in)
        kw, kb = jax.random.split(k)
        w = jax.random.uniform(kw, (fan_in, fan_out), jnp.float32, -bound, bound)
        bias = jax.random.uniform(kb, (fan_out,), jnp.float32, -bound, bound)
        return w, bias

    layers = []
    keys = jax.random.split(key, num_layers)
    for lk in keys:
        ks = jax.random.split(lk, 10)
        p = {}
        wq, bq = linear_init(ks[0], d_model, d_model)
        wk, bk = linear_init(ks[1], d_model, d_model)
        p["sa_wqk"] = jnp.concatenate([wq, wk], axis=1)      # (D, 2D)
        p["sa_bqk"] = jnp.concatenate([bq, bk])              # (2D,)
        p["sa_wv"], p["sa_bv"] = linear_init(ks[2], d_model, d_model)
        p["sa_wo"], p["sa_bo"] = linear_init(ks[3], d_model, d_model)
        p["ca_wq"], p["ca_bq"] = linear_init(ks[4], d_model, d_model)
        p["ca_wk"], p["ca_bk"] = linear_init(ks[5], d_model, d_model)
        p["ca_wv"], p["ca_bv"] = linear_init(ks[6], d_model, d_model)
        p["ca_wo"], p["ca_bo"] = linear_init(ks[7], d_model, d_model)
        p["ff_w1"], p["ff_b1"] = linear_init(ks[8], d_model, dim_ff)
        p["ff_w2"], p["ff_b2"] = linear_init(ks[9], dim_ff, d_model)
        for name in ("ln1", "ln2", "ln3"):
            p[f"{name}_g"] = jnp.ones((d_model,), jnp.float32)
            p[f"{name}_b"] = jnp.zeros((d_model,), jnp.float32)
        layers.append(p)
    return {"layers": layers,
            "norm_g": jnp.ones((d_model,), jnp.float32),
            "norm_b": jnp.zeros((d_model,), jnp.float32)}


# ----------------------------------------------------------------------------
# Pure-JAX reference (same math, same pre-transposed weights)
# ----------------------------------------------------------------------------
def _ref_layernorm(x, g, b, eps=1e-5):
    mu = x.mean(-1, keepdims=True)
    var = ((x - mu) ** 2).mean(-1, keepdims=True)
    return (x - mu) / jnp.sqrt(var + eps) * g + b


def _ref_mha(q_in, k_in, v_in, wq, bq, wk, bk, wv, bv, wo, bo, nhead, t, s, b):
    d = q_in.shape[-1]
    dh = d // nhead
    q = q_in @ wq + bq
    k = k_in @ wk + bk
    v = v_in @ wv + bv
    qh = q.reshape(t, b, nhead, dh).transpose(1, 2, 0, 3)
    kh = k.reshape(s, b, nhead, dh).transpose(1, 2, 0, 3)
    vh = v.reshape(s, b, nhead, dh).transpose(1, 2, 0, 3)
    scores = jnp.einsum("bhtd,bhsd->bhts", qh, kh) / math.sqrt(dh)
    p = jax.nn.softmax(scores, axis=-1)
    o = jnp.einsum("bhts,bhsd->bhtd", p, vh)
    o = o.transpose(2, 0, 1, 3).reshape(t * b, d)
    return o @ wo + bo


def ref_decoder(tgt, memory, params, *, nhead, pos, query_pos):
    t, b, d = tgt.shape
    s = memory.shape[0]
    x = tgt.reshape(t * b, d)
    mem = memory.reshape(s * b, d)
    qp = query_pos.reshape(t * b, d)
    pe = pos.reshape(s * b, d)
    for p in params["layers"]:
        wq, wk = p["sa_wqk"][:, :d], p["sa_wqk"][:, d:]
        bq, bk = p["sa_bqk"][:d], p["sa_bqk"][d:]
        sa = _ref_mha(x + qp, x + qp, x,
                      wq, bq, wk, bk, p["sa_wv"], p["sa_bv"],
                      p["sa_wo"], p["sa_bo"], nhead, t, t, b)
        x = _ref_layernorm(sa + x, p["ln1_g"], p["ln1_b"])
        ca = _ref_mha(x + qp, mem + pe, mem,
                      p["ca_wq"], p["ca_bq"], p["ca_wk"], p["ca_bk"],
                      p["ca_wv"], p["ca_bv"], p["ca_wo"], p["ca_bo"],
                      nhead, t, s, b)
        x = _ref_layernorm(ca + x, p["ln2_g"], p["ln2_b"])
        ff = jnp.maximum(x @ p["ff_w1"] + p["ff_b1"], 0.0) @ p["ff_w2"] + p["ff_b2"]
        x = _ref_layernorm(ff + x, p["ln3_g"], p["ln3_b"])
    x = _ref_layernorm(x, params["norm_g"], params["norm_b"])
    return x.reshape(t, b, d)


# ----------------------------------------------------------------------------
# Demo / correctness check
# ----------------------------------------------------------------------------
if __name__ == "__main__":
    key = jax.random.PRNGKey(0)
    k_p, k_tgt, k_mem, k_qp, k_pos = jax.random.split(key, 5)

    num_layers, d_model, nhead, dim_ff = 2, 128, 4, 256
    t_len, s_len, batch = 8, 16, 2

    params = init_params(k_p, num_layers, d_model, nhead, dim_ff)
    tgt = jax.random.normal(k_tgt, (t_len, batch, d_model), jnp.float32)
    memory = jax.random.normal(k_mem, (s_len, batch, d_model), jnp.float32)
    query_pos = 0.1 * jax.random.normal(k_qp, (t_len, batch, d_model), jnp.float32)
    pos = 0.1 * jax.random.normal(k_pos, (s_len, batch, d_model), jnp.float32)

    fwd = jax.jit(functools.partial(transformer_decoder_forward, nhead=nhead))
    out = fwd(tgt, memory, params, pos=pos, query_pos=query_pos)
    out = jax.block_until_ready(out)
    assert out.shape == (t_len, batch, d_model)

    ref = jax.block_until_ready(
        ref_decoder(tgt, memory, params, nhead=nhead, pos=pos,
                    query_pos=query_pos))
    # Tolerance covers MXU default f32 matmul precision and the EUP
    # approximate-reciprocal softmax vs the XLA reference.
    max_err = float(jnp.max(jnp.abs(out - ref)))
    assert jnp.allclose(out, ref, atol=2e-2, rtol=2e-2), f"max_err={max_err}"

    print("KERNEL_OK")
</pallas_src>

<mosaic_0001>
module attributes {stable_mosaic.version = 11 : i64} {
  func.func @_linear_kernel(%arg0: i32, %arg1: i32, %arg2: memref<8x128xf32, #tpu.memory_space<vmem>>, %arg3: memref<8x128xf32, #tpu.memory_space<vmem>>, %arg4: memref<128x256xf32, #tpu.memory_space<vmem>>, %arg5: memref<1x256xf32, #tpu.memory_space<vmem>>, %arg6: memref<8x256xf32, #tpu.memory_space<vmem>>) attributes {dimension_semantics = [#tpu.dimension_semantics<parallel>, #tpu.dimension_semantics<parallel>], iteration_bounds = array<i64: 2, 1>, scalar_prefetch = 0 : i64, scratch_operands = 0 : i64, tpu.core_type = #tpu.core_type<tc>, window_params = [{transform_indices = @transform_0, window_bounds = array<i64: 8, 128>}, {transform_indices = @transform_1, window_bounds = array<i64: 8, 128>}, {transform_indices = @transform_2, window_bounds = array<i64: 128, 256>}, {transform_indices = @transform_3, window_bounds = array<i64: 1, 256>}, {transform_indices = @transform_4, window_bounds = array<i64: 8, 256>}]} {
    %c0 = arith.constant 0 : index
    %c0_0 = arith.constant 0 : index
    %0 = vector.load %arg2[%c0, %c0_0] : memref<8x128xf32, #tpu.memory_space<vmem>>, vector<8x128xf32>
    %c0_1 = arith.constant 0 : index
    %c0_2 = arith.constant 0 : index
    %1 = vector.load %arg3[%c0_1, %c0_2] : memref<8x128xf32, #tpu.memory_space<vmem>>, vector<8x128xf32>
    %2 = arith.addf %0, %1 : vector<8x128xf32>
    %c0_3 = arith.constant 0 : index
    %c0_4 = arith.constant 0 : index
    %3 = vector.load %arg4[%c0_3, %c0_4] : memref<128x256xf32, #tpu.memory_space<vmem>>, vector<128x256xf32>
    %cst = arith.constant dense<0.000000e+00> : vector<8x256xf32>
    %4 = tpu.matmul %2, %3, %cst {dimension_numbers = #tpu.dot_dimension_numbers<[1], [0], [0], [1], [0, 0, 1, 1], [], []>} : vector<8x128xf32>, vector<128x256xf32>, vector<8x256xf32> -> vector<8x256xf32>
    %c0_5 = arith.constant 0 : index
    %c0_6 = arith.constant 0 : index
    %5 = vector.load %arg5[%c0_5, %c0_6] : memref<1x256xf32, #tpu.memory_space<vmem>>, vector<1x256xf32>
    %6 = vector.broadcast %5 : vector<1x256xf32> to vector<8x256xf32>
    %7 = arith.addf %4, %6 : vector<8x256xf32>
    %c0_7 = arith.constant 0 : index
    %c0_8 = arith.constant 0 : index
    %8 = vector.load %arg6[%c0_7, %c0_8] : memref<8x256xf32, #tpu.memory_space<vmem>>, vector<8x256xf32>
    tpu.vector_store %arg6[%c0_7, %c0_8], %7 {strides = array<i32>} : memref<8x256xf32, #tpu.memory_space<vmem>>, vector<8x256xf32>,
    return
  }
  func.func @transform_0(%arg0: i32, %arg1: i32) -> (i32, i32) {
    %c0_i32 = arith.constant 0 : i32
    %c0_i32_0 = arith.constant 0 : i32
    return %arg0, %c0_i32 : i32, i32
  }
  func.func @transform_1(%arg0: i32, %arg1: i32) -> (i32, i32) {
    %c0_i32 = arith.constant 0 : i32
    %c0_i32_0 = arith.constant 0 : i32
    return %arg0, %c0_i32 : i32, i32
  }
  func.func @transform_2(%arg0: i32, %arg1: i32) -> (i32, i32) {
    %c0_i32 = arith.constant 0 : i32
    %c0_i32_0 = arith.constant 0 : i32
    return %c0_i32, %arg1 : i32, i32
  }
  func.func @transform_3(%arg0: i32, %arg1: i32) -> (i32, i32) {
    %c0_i32 = arith.constant 0 : i32
    %c0_i32_0 = arith.constant 0 : i32
    return %c0_i32, %arg1 : i32, i32
  }
  func.func @transform_4(%arg0: i32, %arg1: i32) -> (i32, i32) {
    %c0_i32 = arith.constant 0 : i32
    return %arg0, %arg1 : i32, i32
  }
}

module attributes {stable_mosaic.version = 11 : i64} {
  func.func @_linear_kernel(%arg0: i32, %arg1: i32, %arg2: memref<8x128xf32, #tpu.memory_space<vmem>>, %arg3: memref<128x128xf32, #tpu.memory_space<vmem>>, %arg4: memref<1x128xf32, #tpu.memory_space<vmem>>, %arg5: memref<8x128xf32, #tpu.memory_space<vmem>>) attributes {dimension_semantics = [#tpu.dimension_semantics<parallel>, #tpu.dimension_semantics<parallel>], iteration_bounds = array<i64: 2, 1>, scalar_prefetch = 0 : i64, scratch_operands = 0 : i64, tpu.core_type = #tpu.core_type<tc>, window_params = [{transform_indices = @transform_0, window_bounds = array<i64: 8, 128>}, {transform_indices = @transform_1, window_bounds = array<i64: 128, 128>}, {transform_indices = @transform_2, window_bounds = array<i64: 1, 128>}, {transform_indices = @transform_3, window_bounds = array<i64: 8, 128>}]} {
    %c0 = arith.constant 0 : index
    %c0_0 = arith.constant 0 : index
    %0 = vector.load %arg2[%c0, %c0_0] : memref<8x128xf32, #tpu.memory_space<vmem>>, vector<8x128xf32>
    %c0_1 = arith.constant 0 : index
    %c0_2 = arith.constant 0 : index
    %1 = vector.load %arg3[%c0_1, %c0_2] : memref<128x128xf32, #tpu.memory_space<vmem>>, vector<128x128xf32>
    %cst = arith.constant dense<0.000000e+00> : vector<8x128xf32>
    %2 = tpu.matmul %0, %1, %cst {dimension_numbers = #tpu.dot_dimension_numbers<[1], [0], [0], [1], [0, 0, 1, 1], [], []>} : vector<8x128xf32>, vector<128x128xf32>, vector<8x128xf32> -> vector<8x128xf32>
    %c0_3 = arith.constant 0 : index
    %c0_4 = arith.constant 0 : index
    %3 = vector.load %arg4[%c0_3, %c0_4] : memref<1x128xf32, #tpu.memory_space<vmem>>, vector<1x128xf32>
    %4 = vector.broadcast %3 : vector<1x128xf32> to vector<8x128xf32>
    %5 = arith.addf %2, %4 : vector<8x128xf32>
    %c0_5 = arith.constant 0 : index
    %c0_6 = arith.constant 0 : index
    %6 = vector.load %arg5[%c0_5, %c0_6] : memref<8x128xf32, #tpu.memory_space<vmem>>, vector<8x128xf32>
    tpu.vector_store %arg5[%c0_5, %c0_6], %5 {strides = array<i32>} : memref<8x128xf32, #tpu.memory_space<vmem>>, vector<8x128xf32>,
    return
  }
  func.func @transform_0(%arg0: i32, %arg1: i32) -> (i32, i32) {
    %c0_i32 = arith.constant 0 : i32
    %c0_i32_0 = arith.constant 0 : i32
    return %arg0, %c0_i32 : i32, i32
  }
  func.func @transform_1(%arg0: i32, %arg1: i32) -> (i32, i32) {
    %c0_i32 = arith.constant 0 : i32
    %c0_i32_0 = arith.constant 0 : i32
    return %c0_i32, %arg1 : i32, i32
  }
  func.func @transform_2(%arg0: i32, %arg1: i32) -> (i32, i32) {
    %c0_i32 = arith.constant 0 : i32
    %c0_i32_0 = arith.constant 0 : i32
    return %c0_i32, %arg1 : i32, i32
  }
  func.func @transform_3(%arg0: i32, %arg1: i32) -> (i32, i32) {
    %c0_i32 = arith.constant 0 : i32
    return %arg0, %arg1 : i32, i32
  }
}

module attributes {stable_mosaic.version = 11 : i64} {
  func.func @_attention_kernel(%arg0: i32, %arg1: memref<1x8x128xf32, #tpu.memory_space<vmem>>, %arg2: memref<1x8x128xf32, #tpu.memory_space<vmem>>, %arg3: memref<1x8x128xf32, #tpu.memory_space<vmem>>, %arg4: memref<1x8x128xf32, #tpu.memory_space<vmem>>) attributes {dimension_semantics = [#tpu.dimension_semantics<parallel>], iteration_bounds = array<i64: 2>, scalar_prefetch = 0 : i64, scratch_operands = 0 : i64, tpu.core_type = #tpu.core_type<tc>, window_params = [{transform_indices = @transform_0, window_bounds = array<i64: 1, 8, 128>}, {transform_indices = @transform_1, window_bounds = array<i64: 1, 8, 128>}, {transform_indices = @transform_2, window_bounds = array<i64: 1, 8, 128>}, {transform_indices = @transform_3, window_bounds = array<i64: 1, 8, 128>}]} {
    %c0 = arith.constant 0 : index
    %c0_0 = arith.constant 0 : index
    %c0_1 = arith.constant 0 : index
    %0 = vector.load %arg1[%c0, %c0_0, %c0_1] : memref<1x8x128xf32, #tpu.memory_space<vmem>>, vector<1x8x32xf32>
    %1 = vector.shape_cast %0 : vector<1x8x32xf32> to vector<8x32xf32>
    %cst = arith.constant 0.176776692 : f32
    %2 = vector.broadcast %cst : f32 to vector<8x32xf32>
    %3 = arith.mulf %1, %2 : vector<8x32xf32>
    %c0_2 = arith.constant 0 : index
    %c0_3 = arith.constant 0 : index
    %c0_4 = arith.constant 0 : index
    %4 = vector.load %arg2[%c0_2, %c0_3, %c0_4] : memref<1x8x128xf32, #tpu.memory_space<vmem>>, vector<1x8x32xf32>
    %5 = vector.shape_cast %4 : vector<1x8x32xf32> to vector<8x32xf32>
    %c0_5 = arith.constant 0 : index
    %c0_6 = arith.constant 0 : index
    %c0_7 = arith.constant 0 : index
    %6 = vector.load %arg3[%c0_5, %c0_6, %c0_7] : memref<1x8x128xf32, #tpu.memory_space<vmem>>, vector<1x8x32xf32>
    %7 = vector.shape_cast %6 : vector<1x8x32xf32> to vector<8x32xf32>
    %cst_8 = arith.constant dense<0.000000e+00> : vector<8x8xf32>
    %8 = tpu.matmul %3, %5, %cst_8 {dimension_numbers = #tpu.dot_dimension_numbers<[1], [1], [0], [0], [0, 0, 1, 0], [], []>} : vector<8x32xf32>, vector<8x32xf32>, vector<8x8xf32> -> vector<8x8xf32>
    %cst_9 = arith.constant dense<0xFF800000> : vector<8xf32>
    %9 = vector.multi_reduction <maximumf>, %8, %cst_9 [1] : vector<8x8xf32> to vector<8xf32>
    %10 = vector.shape_cast %9 : vector<8xf32> to vector<8x1xf32>
    %11 = vector.broadcast %10 : vector<8x1xf32> to vector<8x8xf32>
    %12 = arith.subf %8, %11 : vector<8x8xf32>
    %13 = math.exp %12 : vector<8x8xf32>
    %cst_10 = arith.constant dense<0.000000e+00> : vector<8xf32>
    %14 = vector.multi_reduction <add>, %13, %cst_10 [1] : vector<8x8xf32> to vector<8xf32>
    %15 = vector.shape_cast %14 : vector<8xf32> to vector<8x1xf32>
    %16 = tpu.reciprocal %15 {approx = true} : vector<8x1xf32> -> vector<8x1xf32>
    %17 = vector.broadcast %16 : vector<8x1xf32> to vector<8x8xf32>
    %18 = arith.mulf %13, %17 : vector<8x8xf32>
    %cst_11 = arith.constant dense<0.000000e+00> : vector<8x32xf32>
    %19 = tpu.matmul %18, %7, %cst_11 {dimension_numbers = #tpu.dot_dimension_numbers<[1], [0], [0], [1], [0, 0, 1, 1], [], []>} : vector<8x8xf32>, vector<8x32xf32>, vector<8x32xf32> -> vector<8x32xf32>
    %c0_12 = arith.constant 0 : index
    %c0_13 = arith.constant 0 : index
    %c32 = arith.constant 32 : index
    %20 = vector.load %arg1[%c0_12, %c0_13, %c32] : memref<1x8x128xf32, #tpu.memory_space<vmem>>, vector<1x8x32xf32>
    %21 = vector.shape_cast %20 : vector<1x8x32xf32> to vector<8x32xf32>
    %cst_14 = arith.constant 0.176776692 : f32
    %22 = vector.broadcast %cst_14 : f32 to vector<8x32xf32>
    %23 = arith.mulf %21, %22 : vector<8x32xf32>
    %c0_15 = arith.constant 0 : index
    %c0_16 = arith.constant 0 : index
    %c32_17 = arith.constant 32 : index
    %24 = vector.load %arg2[%c0_15, %c0_16, %c32_17] : memref<1x8x128xf32, #tpu.memory_space<vmem>>, vector<1x8x32xf32>
    %25 = vector.shape_cast %24 : vector<1x8x32xf32> to vector<8x32xf32>
    %c0_18 = arith.constant 0 : index
    %c0_19 = arith.constant 0 : index
    %c32_20 = arith.constant 32 : index
    %26 = vector.load %arg3[%c0_18, %c0_19, %c32_20] : memref<1x8x128xf32, #tpu.memory_space<vmem>>, vector<1x8x32xf32>
    %27 = vector.shape_cast %26 : vector<1x8x32xf32> to vector<8x32xf32>
    %cst_21 = arith.constant dense<0.000000e+00> : vector<8x8xf32>
    %28 = tpu.matmul %23, %25, %cst_21 {dimension_numbers = #tpu.dot_dimension_numbers<[1], [1], [0], [0], [0, 0, 1, 0], [], []>} : vector<8x32xf32>, vector<8x32xf32>, vector<8x8xf32> -> vector<8x8xf32>
    %cst_22 = arith.constant dense<0xFF800000> : vector<8xf32>
    %29 = vector.multi_reduction <maximumf>, %28, %cst_22 [1] : vector<8x8xf32> to vector<8xf32>
    %30 = vector.shape_cast %29 : vector<8xf32> to vector<8x1xf32>
    %31 = vector.broadcast %30 : vector<8x1xf32> to vector<8x8xf32>
    %32 = arith.subf %28, %31 : vector<8x8xf32>
    %33 = math.exp %32 : vector<8x8xf32>
    %cst_23 = arith.constant dense<0.000000e+00> : vector<8xf32>
    %34 = vector.multi_reduction <add>, %33, %cst_23 [1] : vector<8x8xf32> to vector<8xf32>
    %35 = vector.shape_cast %34 : vector<8xf32> to vector<8x1xf32>
    %36 = tpu.reciprocal %35 {approx = true} : vector<8x1xf32> -> vector<8x1xf32>
    %37 = vector.broadcast %36 : vector<8x1xf32> to vector<8x8xf32>
    %38 = arith.mulf %33, %37 : vector<8x8xf32>
    %cst_24 = arith.constant dense<0.000000e+00> : vector<8x32xf32>
    %39 = tpu.matmul %38, %27, %cst_24 {dimension_numbers = #tpu.dot_dimension_numbers<[1], [0], [0], [1], [0, 0, 1, 1], [], []>} : vector<8x8xf32>, vector<8x32xf32>, vector<8x32xf32> -> vector<8x32xf32>
    %c0_25 = arith.constant 0 : index
    %c0_26 = arith.constant 0 : index
    %c64 = arith.constant 64 : index
    %40 = vector.load %arg1[%c0_25, %c0_26, %c64] : memref<1x8x128xf32, #tpu.memory_space<vmem>>, vector<1x8x32xf32>
    %41 = vector.shape_cast %40 : vector<1x8x32xf32> to vector<8x32xf32>
    %cst_27 = arith.constant 0.176776692 : f32
    %42 = vector.broadcast %cst_27 : f32 to vector<8x32xf32>
    %43 = arith.mulf %41, %42 : vector<8x32xf32>
    %c0_28 = arith.constant 0 : index
    %c0_29 = arith.constant 0 : index
    %c64_30 = arith.constant 64 : index
    %44 = vector.load %arg2[%c0_28, %c0_29, %c64_30] : memref<1x8x128xf32, #tpu.memory_space<vmem>>, vector<1x8x32xf32>
    %45 = vector.shape_cast %44 : vector<1x8x32xf32> to vector<8x32xf32>
    %c0_31 = arith.constant 0 : index
    %c0_32 = arith.constant 0 : index
    %c64_33 = arith.constant 64 : index
    %46 = vector.load %arg3[%c0_31, %c0_32, %c64_33] : memref<1x8x128xf32, #tpu.memory_space<vmem>>, vector<1x8x32xf32>
    %47 = vector.shape_cast %46 : vector<1x8x32xf32> to vector<8x32xf32>
    %cst_34 = arith.constant dense<0.000000e+00> : vector<8x8xf32>
    %48 = tpu.matmul %43, %45, %cst_34 {dimension_numbers = #tpu.dot_dimension_numbers<[1], [1], [0], [0], [0, 0, 1, 0], [], []>} : vector<8x32xf32>, vector<8x32xf32>, vector<8x8xf32> -> vector<8x8xf32>
    %cst_35 = arith.constant dense<0xFF800000> : vector<8xf32>
    %49 = vector.multi_reduction <maximumf>, %48, %cst_35 [1] : vector<8x8xf32> to vector<8xf32>
    %50 = vector.shape_cast %49 : vector<8xf32> to vector<8x1xf32>
    %51 = vector.broadcast %50 : vector<8x1xf32> to vector<8x8xf32>
    %52 = arith.subf %48, %51 : vector<8x8xf32>
    %53 = math.exp %52 : vector<8x8xf32>
    %cst_36 = arith.constant dense<0.000000e+00> : vector<8xf32>
    %54 = vector.multi_reduction <add>, %53, %cst_36 [1] : vector<8x8xf32> to vector<8xf32>
    %55 = vector.shape_cast %54 : vector<8xf32> to vector<8x1xf32>
    %56 = tpu.reciprocal %55 {approx = true} : vector<8x1xf32> -> vector<8x1xf32>
    %57 = vector.broadcast %56 : vector<8x1xf32> to vector<8x8xf32>
    %58 = arith.mulf %53, %57 : vector<8x8xf32>
    %cst_37 = arith.constant dense<0.000000e+00> : vector<8x32xf32>
    %59 = tpu.matmul %58, %47, %cst_37 {dimension_numbers = #tpu.dot_dimension_numbers<[1], [0], [0], [1], [0, 0, 1, 1], [], []>} : vector<8x8xf32>, vector<8x32xf32>, vector<8x32xf32> -> vector<8x32xf32>
    %c0_38 = arith.constant 0 : index
    %c0_39 = arith.constant 0 : index
    %c96 = arith.constant 96 : index
    %60 = vector.load %arg1[%c0_38, %c0_39, %c96] : memref<1x8x128xf32, #tpu.memory_space<vmem>>, vector<1x8x32xf32>
    %61 = vector.shape_cast %60 : vector<1x8x32xf32> to vector<8x32xf32>
    %cst_40 = arith.constant 0.176776692 : f32
    %62 = vector.broadcast %cst_40 : f32 to vector<8x32xf32>
    %63 = arith.mulf %61, %62 : vector<8x32xf32>
    %c0_41 = arith.constant 0 : index
    %c0_42 = arith.constant 0 : index
    %c96_43 = arith.constant 96 : index
    %64 = vector.load %arg2[%c0_41, %c0_42, %c96_43] : memref<1x8x128xf32, #tpu.memory_space<vmem>>, vector<1x8x32xf32>
    %65 = vector.shape_cast %64 : vector<1x8x32xf32> to vector<8x32xf32>
    %c0_44 = arith.constant 0 : index
    %c0_45 = arith.constant 0 : index
    %c96_46 = arith.constant 96 : index
    %66 = vector.load %arg3[%c0_44, %c0_45, %c96_46] : memref<1x8x128xf32, #tpu.memory_space<vmem>>, vector<1x8x32xf32>
    %67 = vector.shape_cast %66 : vector<1x8x32xf32> to vector<8x32xf32>
    %cst_47 = arith.constant dense<0.000000e+00> : vector<8x8xf32>
    %68 = tpu.matmul %63, %65, %cst_47 {dimension_numbers = #tpu.dot_dimension_numbers<[1], [1], [0], [0], [0, 0, 1, 0], [], []>} : vector<8x32xf32>, vector<8x32xf32>, vector<8x8xf32> -> vector<8x8xf32>
    %cst_48 = arith.constant dense<0xFF800000> : vector<8xf32>
    %69 = vector.multi_reduction <maximumf>, %68, %cst_48 [1] : vector<8x8xf32> to vector<8xf32>
    %70 = vector.shape_cast %69 : vector<8xf32> to vector<8x1xf32>
    %71 = vector.broadcast %70 : vector<8x1xf32> to vector<8x8xf32>
    %72 = arith.subf %68, %71 : vector<8x8xf32>
    %73 = math.exp %72 : vector<8x8xf32>
    %cst_49 = arith.constant dense<0.000000e+00> : vector<8xf32>
    %74 = vector.multi_reduction <add>, %73, %cst_49 [1] : vector<8x8xf32> to vector<8xf32>
    %75 = vector.shape_cast %74 : vector<8xf32> to vector<8x1xf32>
    %76 = tpu.reciprocal %75 {approx = true} : vector<8x1xf32> -> vector<8x1xf32>
    %77 = vector.broadcast %76 : vector<8x1xf32> to vector<8x8xf32>
    %78 = arith.mulf %73, %77 : vector<8x8xf32>
    %cst_50 = arith.constant dense<0.000000e+00> : vector<8x32xf32>
    %79 = tpu.matmul %78, %67, %cst_50 {dimension_numbers = #tpu.dot_dimension_numbers<[1], [0], [0], [1], [0, 0, 1, 1], [], []>} : vector<8x8xf32>, vector<8x32xf32>, vector<8x32xf32> -> vector<8x32xf32>
    %80 = tpu.concatenate %19, %39, %59, %79 in 1 : vector<8x32xf32>, vector<8x32xf32>, vector<8x32xf32>, vector<8x32xf32> -> vector<8x128xf32>
    %c0_51 = arith.constant 0 : index
    %c0_52 = arith.constant 0 : index
    %c0_53 = arith.constant 0 : index
    %81 = vector.load %arg4[%c0_51, %c0_52, %c0_53] : memref<1x8x128xf32, #tpu.memory_space<vmem>>, vector<1x8x128xf32>
    %82 = vector.shape_cast %81 : vector<1x8x128xf32> to vector<8x128xf32>
    %83 = vector.shape_cast %80 : vector<8x128xf32> to vector<1x8x128xf32>
    tpu.vector_store %arg4[%c0_51, %c0_52, %c0_53], %83 {strides = array<i32>} : memref<1x8x128xf32, #tpu.memory_space<vmem>>, vector<1x8x128xf32>,
    return
  }
  func.func @transform_0(%arg0: i32) -> (i32, i32, i32) {
    %c0_i32 = arith.constant 0 : i32
    %c0_i32_0 = arith.constant 0 : i32
    %c0_i32_1 = arith.constant 0 : i32
    return %arg0, %c0_i32, %c0_i32_0 : i32, i32, i32
  }
  func.func @transform_1(%arg0: i32) -> (i32, i32, i32) {
    %c0_i32 = arith.constant 0 : i32
    %c1_i32 = arith.constant 1 : i32
    %c0_i32_0 = arith.constant 0 : i32
    return %arg0, %c0_i32, %c1_i32 : i32, i32, i32
  }
  func.func @transform_2(%arg0: i32) -> (i32, i32, i32) {
    %c0_i32 = arith.constant 0 : i32
    %c0_i32_0 = arith.constant 0 : i32
    %c0_i32_1 = arith.constant 0 : i32
    return %arg0, %c0_i32, %c0_i32_0 : i32, i32, i32
  }
  func.func @transform_3(%arg0: i32) -> (i32, i32, i32) {
    %c0_i32 = arith.constant 0 : i32
    %c0_i32_0 = arith.constant 0 : i32
    %c0_i32_1 = arith.constant 0 : i32
    return %arg0, %c0_i32, %c0_i32_0 : i32, i32, i32
  }
}

module attributes {stable_mosaic.version = 11 : i64} {
  func.func @_proj_ln_kernel(%arg0: i32, %arg1: memref<8x128xf32, #tpu.memory_space<vmem>>, %arg2: memref<128x128xf32, #tpu.memory_space<vmem>>, %arg3: memref<1x128xf32, #tpu.memory_space<vmem>>, %arg4: memref<8x128xf32, #tpu.memory_space<vmem>>, %arg5: memref<1x128xf32, #tpu.memory_space<vmem>>, %arg6: memref<1x128xf32, #tpu.memory_space<vmem>>, %arg7: memref<8x128xf32, #tpu.memory_space<vmem>>) attributes {dimension_semantics = [#tpu.dimension_semantics<parallel>], iteration_bounds = array<i64: 2>, scalar_prefetch = 0 : i64, scratch_operands = 0 : i64, tpu.core_type = #tpu.core_type<tc>, window_params = [{transform_indices = @transform_0, window_bounds = array<i64: 8, 128>}, {pipeline_mode = #tpu.pipeline_mode<synchronous>, transform_indices = @transform_1, window_bounds = array<i64: 128, 128>}, {pipeline_mode = #tpu.pipeline_mode<synchronous>, transform_indices = @transform_2, window_bounds = array<i64: 1, 128>}, {transform_indices = @transform_3, window_bounds = array<i64: 8, 128>}, {pipeline_mode = #tpu.pipeline_mode<synchronous>, transform_indices = @transform_4, window_bounds = array<i64: 1, 128>}, {pipeline_mode = #tpu.pipeline_mode<synchronous>, transform_indices = @transform_5, window_bounds = array<i64: 1, 128>}, {transform_indices = @transform_6, window_bounds = array<i64: 8, 128>}]} {
    %c0 = arith.constant 0 : index
    %c0_0 = arith.constant 0 : index
    %0 = vector.load %arg1[%c0, %c0_0] : memref<8x128xf32, #tpu.memory_space<vmem>>, vector<8x128xf32>
    %c0_1 = arith.constant 0 : index
    %c0_2 = arith.constant 0 : index
    %1 = vector.load %arg2[%c0_1, %c0_2] : memref<128x128xf32, #tpu.memory_space<vmem>>, vector<128x128xf32>
    %cst = arith.constant dense<0.000000e+00> : vector<8x128xf32>
    %2 = tpu.matmul %0, %1, %cst {dimension_numbers = #tpu.dot_dimension_numbers<[1], [0], [0], [1], [0, 0, 1, 1], [], []>} : vector<8x128xf32>, vector<128x128xf32>, vector<8x128xf32> -> vector<8x128xf32>
    %c0_3 = arith.constant 0 : index
    %c0_4 = arith.constant 0 : index
    %3 = vector.load %arg3[%c0_3, %c0_4] : memref<1x128xf32, #tpu.memory_space<vmem>>, vector<1x128xf32>
    %4 = vector.broadcast %3 : vector<1x128xf32> to vector<8x128xf32>
    %5 = arith.addf %2, %4 : vector<8x128xf32>
    %c0_5 = arith.constant 0 : index
    %c0_6 = arith.constant 0 : index
    %6 = vector.load %arg4[%c0_5, %c0_6] : memref<8x128xf32, #tpu.memory_space<vmem>>, vector<8x128xf32>
    %7 = arith.addf %5, %6 : vector<8x128xf32>
    %cst_7 = arith.constant dense<0.000000e+00> : vector<8xf32>
    %8 = vector.multi_reduction <add>, %7, %cst_7 [1] : vector<8x128xf32> to vector<8xf32>
    %9 = vector.shape_cast %8 : vector<8xf32> to vector<8x1xf32>
    %cst_8 = arith.constant 1.280000e+02 : f32
    %10 = vector.broadcast %cst_8 : f32 to vector<8x1xf32>
    %11 = arith.divf %9, %10 : vector<8x1xf32>
    %12 = vector.broadcast %11 : vector<8x1xf32> to vector<8x128xf32>
    %13 = arith.subf %7, %12 : vector<8x128xf32>
    %14 = arith.mulf %13, %13 : vector<8x128xf32>
    %cst_9 = arith.constant dense<0.000000e+00> : vector<8xf32>
    %15 = vector.multi_reduction <add>, %14, %cst_9 [1] : vector<8x128xf32> to vector<8xf32>
    %16 = vector.shape_cast %15 : vector<8xf32> to vector<8x1xf32>
    %cst_10 = arith.constant 1.280000e+02 : f32
    %17 = vector.broadcast %cst_10 : f32 to vector<8x1xf32>
    %18 = arith.divf %16, %17 : vector<8x1xf32>
    %19 = vector.broadcast %11 : vector<8x1xf32> to vector<8x128xf32>
    %20 = arith.subf %7, %19 : vector<8x128xf32>
    %cst_11 = arith.constant 9.99999974E-6 : f32
    %21 = vector.broadcast %cst_11 : f32 to vector<8x1xf32>
    %22 = arith.addf %18, %21 : vector<8x1xf32>
    %23 = math.rsqrt %22 : vector<8x1xf32>
    %24 = vector.broadcast %23 : vector<8x1xf32> to vector<8x128xf32>
    %25 = arith.mulf %20, %24 : vector<8x128xf32>
    %c0_12 = arith.constant 0 : index
    %c0_13 = arith.constant 0 : index
    %26 = vector.load %arg5[%c0_12, %c0_13] : memref<1x128xf32, #tpu.memory_space<vmem>>, vector<1x128xf32>
    %27 = vector.broadcast %26 : vector<1x128xf32> to vector<8x128xf32>
    %28 = arith.mulf %25, %27 : vector<8x128xf32>
    %c0_14 = arith.constant 0 : index
    %c0_15 = arith.constant 0 : index
    %29 = vector.load %arg6[%c0_14, %c0_15] : memref<1x128xf32, #tpu.memory_space<vmem>>, vector<1x128xf32>
    %30 = vector.broadcast %29 : vector<1x128xf32> to vector<8x128xf32>
    %31 = arith.addf %28, %30 : vector<8x128xf32>
    %c0_16 = arith.constant 0 : index
    %c0_17 = arith.constant 0 : index
    %32 = vector.load %arg7[%c0_16, %c0_17] : memref<8x128xf32, #tpu.memory_space<vmem>>, vector<8x128xf32>
    tpu.vector_store %arg7[%c0_16, %c0_17], %31 {strides = array<i32>} : memref<8x128xf32, #tpu.memory_space<vmem>>, vector<8x128xf32>,
    return
  }
  func.func @transform_0(%arg0: i32) -> (i32, i32) {
    %c0_i32 = arith.constant 0 : i32
    %c0_i32_0 = arith.constant 0 : i32
    return %arg0, %c0_i32 : i32, i32
  }
  func.func @transform_1(%arg0: i32) -> (i32, i32) {
    %c0_i32 = arith.constant 0 : i32
    %c0_i32_0 = arith.constant 0 : i32
    %c0_i32_1 = arith.constant 0 : i32
    return %c0_i32, %c0_i32_0 : i32, i32
  }
  func.func @transform_2(%arg0: i32) -> (i32, i32) {
    %c0_i32 = arith.constant 0 : i32
    %c0_i32_0 = arith.constant 0 : i32
    %c0_i32_1 = arith.constant 0 : i32
    return %c0_i32, %c0_i32_0 : i32, i32
  }
  func.func @transform_3(%arg0: i32) -> (i32, i32) {
    %c0_i32 = arith.constant 0 : i32
    %c0_i32_0 = arith.constant 0 : i32
    return %arg0, %c0_i32 : i32, i32
  }
  func.func @transform_4(%arg0: i32) -> (i32, i32) {
    %c0_i32 = arith.constant 0 : i32
    %c0_i32_0 = arith.constant 0 : i32
    %c0_i32_1 = arith.constant 0 : i32
    return %c0_i32, %c0_i32_0 : i32, i32
  }
  func.func @transform_5(%arg0: i32) -> (i32, i32) {
    %c0_i32 = arith.constant 0 : i32
    %c0_i32_0 = arith.constant 0 : i32
    %c0_i32_1 = arith.constant 0 : i32
    return %c0_i32, %c0_i32_0 : i32, i32
  }
  func.func @transform_6(%arg0: i32) -> (i32, i32) {
    %c0_i32 = arith.constant 0 : i32
    %c0_i32_0 = arith.constant 0 : i32
    return %arg0, %c0_i32 : i32, i32
  }
}

module attributes {stable_mosaic.version = 11 : i64} {
  func.func @_linear_kernel(%arg0: i32, %arg1: i32, %arg2: memref<8x128xf32, #tpu.memory_space<vmem>>, %arg3: memref<8x128xf32, #tpu.memory_space<vmem>>, %arg4: memref<128x128xf32, #tpu.memory_space<vmem>>, %arg5: memref<1x128xf32, #tpu.memory_space<vmem>>, %arg6: memref<8x128xf32, #tpu.memory_space<vmem>>) attributes {dimension_semantics = [#tpu.dimension_semantics<parallel>, #tpu.dimension_semantics<parallel>], iteration_bounds = array<i64: 2, 1>, scalar_prefetch = 0 : i64, scratch_operands = 0 : i64, tpu.core_type = #tpu.core_type<tc>, window_params = [{transform_indices = @transform_0, window_bounds = array<i64: 8, 128>}, {transform_indices = @transform_1, window_bounds = array<i64: 8, 128>}, {transform_indices = @transform_2, window_bounds = array<i64: 128, 128>}, {transform_indices = @transform_3, window_bounds = array<i64: 1, 128>}, {transform_indices = @transform_4, window_bounds = array<i64: 8, 128>}]} {
    %c0 = arith.constant 0 : index
    %c0_0 = arith.constant 0 : index
    %0 = vector.load %arg2[%c0, %c0_0] : memref<8x128xf32, #tpu.memory_space<vmem>>, vector<8x128xf32>
    %c0_1 = arith.constant 0 : index
    %c0_2 = arith.constant 0 : index
    %1 = vector.load %arg3[%c0_1, %c0_2] : memref<8x128xf32, #tpu.memory_space<vmem>>, vector<8x128xf32>
    %2 = arith.addf %0, %1 : vector<8x128xf32>
    %c0_3 = arith.constant 0 : index
    %c0_4 = arith.constant 0 : index
    %3 = vector.load %arg4[%c0_3, %c0_4] : memref<128x128xf32, #tpu.memory_space<vmem>>, vector<128x128xf32>
    %cst = arith.constant dense<0.000000e+00> : vector<8x128xf32>
    %4 = tpu.matmul %2, %3, %cst {dimension_numbers = #tpu.dot_dimension_numbers<[1], [0], [0], [1], [0, 0, 1, 1], [], []>} : vector<8x128xf32>, vector<128x128xf32>, vector<8x128xf32> -> vector<8x128xf32>
    %c0_5 = arith.constant 0 : index
    %c0_6 = arith.constant 0 : index
    %5 = vector.load %arg5[%c0_5, %c0_6] : memref<1x128xf32, #tpu.memory_space<vmem>>, vector<1x128xf32>
    %6 = vector.broadcast %5 : vector<1x128xf32> to vector<8x128xf32>
    %7 = arith.addf %4, %6 : vector<8x128xf32>
    %c0_7 = arith.constant 0 : index
    %c0_8 = arith.constant 0 : index
    %8 = vector.load %arg6[%c0_7, %c0_8] : memref<8x128xf32, #tpu.memory_space<vmem>>, vector<8x128xf32>
    tpu.vector_store %arg6[%c0_7, %c0_8], %7 {strides = array<i32>} : memref<8x128xf32, #tpu.memory_space<vmem>>, vector<8x128xf32>,
    return
  }
  func.func @transform_0(%arg0: i32, %arg1: i32) -> (i32, i32) {
    %c0_i32 = arith.constant 0 : i32
    %c0_i32_0 = arith.constant 0 : i32
    return %arg0, %c0_i32 : i32, i32
  }
  func.func @transform_1(%arg0: i32, %arg1: i32) -> (i32, i32) {
    %c0_i32 = arith.constant 0 : i32
    %c0_i32_0 = arith.constant 0 : i32
    return %arg0, %c0_i32 : i32, i32
  }
  func.func @transform_2(%arg0: i32, %arg1: i32) -> (i32, i32) {
    %c0_i32 = arith.constant 0 : i32
    %c0_i32_0 = arith.constant 0 : i32
    return %c0_i32, %arg1 : i32, i32
  }
  func.func @transform_3(%arg0: i32, %arg1: i32) -> (i32, i32) {
    %c0_i32 = arith.constant 0 : i32
    %c0_i32_0 = arith.constant 0 : i32
    return %c0_i32, %arg1 : i32, i32
  }
  func.func @transform_4(%arg0: i32, %arg1: i32) -> (i32, i32) {
    %c0_i32 = arith.constant 0 : i32
    return %arg0, %arg1 : i32, i32
  }
}

module attributes {stable_mosaic.version = 11 : i64} {
  func.func @_linear_kernel(%arg0: i32, %arg1: i32, %arg2: memref<16x128xf32, #tpu.memory_space<vmem>>, %arg3: memref<128x128xf32, #tpu.memory_space<vmem>>, %arg4: memref<1x128xf32, #tpu.memory_space<vmem>>, %arg5: memref<16x128xf32, #tpu.memory_space<vmem>>) attributes {dimension_semantics = [#tpu.dimension_semantics<parallel>, #tpu.dimension_semantics<parallel>], iteration_bounds = array<i64: 2, 1>, scalar_prefetch = 0 : i64, scratch_operands = 0 : i64, tpu.core_type = #tpu.core_type<tc>, window_params = [{transform_indices = @transform_0, window_bounds = array<i64: 16, 128>}, {transform_indices = @transform_1, window_bounds = array<i64: 128, 128>}, {transform_indices = @transform_2, window_bounds = array<i64: 1, 128>}, {transform_indices = @transform_3, window_bounds = array<i64: 16, 128>}]} {
    %c0 = arith.constant 0 : index
    %c0_0 = arith.constant 0 : index
    %0 = vector.load %arg2[%c0, %c0_0] : memref<16x128xf32, #tpu.memory_space<vmem>>, vector<16x128xf32>
    %c0_1 = arith.constant 0 : index
    %c0_2 = arith.constant 0 : index
    %1 = vector.load %arg3[%c0_1, %c0_2] : memref<128x128xf32, #tpu.memory_space<vmem>>, vector<128x128xf32>
    %cst = arith.constant dense<0.000000e+00> : vector<16x128xf32>
    %2 = tpu.matmul %0, %1, %cst {dimension_numbers = #tpu.dot_dimension_numbers<[1], [0], [0], [1], [0, 0, 1, 1], [], []>} : vector<16x128xf32>, vector<128x128xf32>, vector<16x128xf32> -> vector<16x128xf32>
    %c0_3 = arith.constant 0 : index
    %c0_4 = arith.constant 0 : index
    %3 = vector.load %arg4[%c0_3, %c0_4] : memref<1x128xf32, #tpu.memory_space<vmem>>, vector<1x128xf32>
    %4 = vector.broadcast %3 : vector<1x128xf32> to vector<16x128xf32>
    %5 = arith.addf %2, %4 : vector<16x128xf32>
    %c0_5 = arith.constant 0 : index
    %c0_6 = arith.constant 0 : index
    %6 = vector.load %arg5[%c0_5, %c0_6] : memref<16x128xf32, #tpu.memory_space<vmem>>, vector<16x128xf32>
    tpu.vector_store %arg5[%c0_5, %c0_6], %5 {strides = array<i32>} : memref<16x128xf32, #tpu.memory_space<vmem>>, vector<16x128xf32>,
    return
  }
  func.func @transform_0(%arg0: i32, %arg1: i32) -> (i32, i32) {
    %c0_i32 = arith.constant 0 : i32
    %c0_i32_0 = arith.constant 0 : i32
    return %arg0, %c0_i32 : i32, i32
  }
  func.func @transform_1(%arg0: i32, %arg1: i32) -> (i32, i32) {
    %c0_i32 = arith.constant 0 : i32
    %c0_i32_0 = arith.constant 0 : i32
    return %c0_i32, %arg1 : i32, i32
  }
  func.func @transform_2(%arg0: i32, %arg1: i32) -> (i32, i32) {
    %c0_i32 = arith.constant 0 : i32
    %c0_i32_0 = arith.constant 0 : i32
    return %c0_i32, %arg1 : i32, i32
  }
  func.func @transform_3(%arg0: i32, %arg1: i32) -> (i32, i32) {
    %c0_i32 = arith.constant 0 : i32
    return %arg0, %arg1 : i32, i32
  }
}

module attributes {stable_mosaic.version = 11 : i64} {
  func.func @_linear_kernel(%arg0: i32, %arg1: i32, %arg2: memref<16x128xf32, #tpu.memory_space<vmem>>, %arg3: memref<16x128xf32, #tpu.memory_space<vmem>>, %arg4: memref<128x128xf32, #tpu.memory_space<vmem>>, %arg5: memref<1x128xf32, #tpu.memory_space<vmem>>, %arg6: memref<16x128xf32, #tpu.memory_space<vmem>>) attributes {dimension_semantics = [#tpu.dimension_semantics<parallel>, #tpu.dimension_semantics<parallel>], iteration_bounds = array<i64: 2, 1>, scalar_prefetch = 0 : i64, scratch_operands = 0 : i64, tpu.core_type = #tpu.core_type<tc>, window_params = [{transform_indices = @transform_0, window_bounds = array<i64: 16, 128>}, {transform_indices = @transform_1, window_bounds = array<i64: 16, 128>}, {transform_indices = @transform_2, window_bounds = array<i64: 128, 128>}, {transform_indices = @transform_3, window_bounds = array<i64: 1, 128>}, {transform_indices = @transform_4, window_bounds = array<i64: 16, 128>}]} {
    %c0 = arith.constant 0 : index
    %c0_0 = arith.constant 0 : index
    %0 = vector.load %arg2[%c0, %c0_0] : memref<16x128xf32, #tpu.memory_space<vmem>>, vector<16x128xf32>
    %c0_1 = arith.constant 0 : index
    %c0_2 = arith.constant 0 : index
    %1 = vector.load %arg3[%c0_1, %c0_2] : memref<16x128xf32, #tpu.memory_space<vmem>>, vector<16x128xf32>
    %2 = arith.addf %0, %1 : vector<16x128xf32>
    %c0_3 = arith.constant 0 : index
    %c0_4 = arith.constant 0 : index
    %3 = vector.load %arg4[%c0_3, %c0_4] : memref<128x128xf32, #tpu.memory_space<vmem>>, vector<128x128xf32>
    %cst = arith.constant dense<0.000000e+00> : vector<16x128xf32>
    %4 = tpu.matmul %2, %3, %cst {dimension_numbers = #tpu.dot_dimension_numbers<[1], [0], [0], [1], [0, 0, 1, 1], [], []>} : vector<16x128xf32>, vector<128x128xf32>, vector<16x128xf32> -> vector<16x128xf32>
    %c0_5 = arith.constant 0 : index
    %c0_6 = arith.constant 0 : index
    %5 = vector.load %arg5[%c0_5, %c0_6] : memref<1x128xf32, #tpu.memory_space<vmem>>, vector<1x128xf32>
    %6 = vector.broadcast %5 : vector<1x128xf32> to vector<16x128xf32>
    %7 = arith.addf %4, %6 : vector<16x128xf32>
    %c0_7 = arith.constant 0 : index
    %c0_8 = arith.constant 0 : index
    %8 = vector.load %arg6[%c0_7, %c0_8] : memref<16x128xf32, #tpu.memory_space<vmem>>, vector<16x128xf32>
    tpu.vector_store %arg6[%c0_7, %c0_8], %7 {strides = array<i32>} : memref<16x128xf32, #tpu.memory_space<vmem>>, vector<16x128xf32>,
    return
  }
  func.func @transform_0(%arg0: i32, %arg1: i32) -> (i32, i32) {
    %c0_i32 = arith.constant 0 : i32
    %c0_i32_0 = arith.constant 0 : i32
    return %arg0, %c0_i32 : i32, i32
  }
  func.func @transform_1(%arg0: i32, %arg1: i32) -> (i32, i32) {
    %c0_i32 = arith.constant 0 : i32
    %c0_i32_0 = arith.constant 0 : i32
    return %arg0, %c0_i32 : i32, i32
  }
  func.func @transform_2(%arg0: i32, %arg1: i32) -> (i32, i32) {
    %c0_i32 = arith.constant 0 : i32
    %c0_i32_0 = arith.constant 0 : i32
    return %c0_i32, %arg1 : i32, i32
  }
  func.func @transform_3(%arg0: i32, %arg1: i32) -> (i32, i32) {
    %c0_i32 = arith.constant 0 : i32
    %c0_i32_0 = arith.constant 0 : i32
    return %c0_i32, %arg1 : i32, i32
  }
  func.func @transform_4(%arg0: i32, %arg1: i32) -> (i32, i32) {
    %c0_i32 = arith.constant 0 : i32
    return %arg0, %arg1 : i32, i32
  }
}

module attributes {stable_mosaic.version = 11 : i64} {
  func.func @_attention_kernel(%arg0: i32, %arg1: memref<1x8x128xf32, #tpu.memory_space<vmem>>, %arg2: memref<1x16x128xf32, #tpu.memory_space<vmem>>, %arg3: memref<1x16x128xf32, #tpu.memory_space<vmem>>, %arg4: memref<1x8x128xf32, #tpu.memory_space<vmem>>) attributes {dimension_semantics = [#tpu.dimension_semantics<parallel>], iteration_bounds = array<i64: 2>, scalar_prefetch = 0 : i64, scratch_operands = 0 : i64, tpu.core_type = #tpu.core_type<tc>, window_params = [{transform_indices = @transform_0, window_bounds = array<i64: 1, 8, 128>}, {transform_indices = @transform_1, window_bounds = array<i64: 1, 16, 128>}, {transform_indices = @transform_2, window_bounds = array<i64: 1, 16, 128>}, {transform_indices = @transform_3, window_bounds = array<i64: 1, 8, 128>}]} {
    %c0 = arith.constant 0 : index
    %c0_0 = arith.constant 0 : index
    %c0_1 = arith.constant 0 : index
    %0 = vector.load %arg1[%c0, %c0_0, %c0_1] : memref<1x8x128xf32, #tpu.memory_space<vmem>>, vector<1x8x32xf32>
    %1 = vector.shape_cast %0 : vector<1x8x32xf32> to vector<8x32xf32>
    %cst = arith.constant 0.176776692 : f32
    %2 = vector.broadcast %cst : f32 to vector<8x32xf32>
    %3 = arith.mulf %1, %2 : vector<8x32xf32>
    %c0_2 = arith.constant 0 : index
    %c0_3 = arith.constant 0 : index
    %c0_4 = arith.constant 0 : index
    %4 = vector.load %arg2[%c0_2, %c0_3, %c0_4] : memref<1x16x128xf32, #tpu.memory_space<vmem>>, vector<1x16x32xf32>
    %5 = vector.shape_cast %4 : vector<1x16x32xf32> to vector<16x32xf32>
    %c0_5 = arith.constant 0 : index
    %c0_6 = arith.constant 0 : index
    %c0_7 = arith.constant 0 : index
    %6 = vector.load %arg3[%c0_5, %c0_6, %c0_7] : memref<1x16x128xf32, #tpu.memory_space<vmem>>, vector<1x16x32xf32>
    %7 = vector.shape_cast %6 : vector<1x16x32xf32> to vector<16x32xf32>
    %cst_8 = arith.constant dense<0.000000e+00> : vector<8x16xf32>
    %8 = tpu.matmul %3, %5, %cst_8 {dimension_numbers = #tpu.dot_dimension_numbers<[1], [1], [0], [0], [0, 0, 1, 0], [], []>} : vector<8x32xf32>, vector<16x32xf32>, vector<8x16xf32> -> vector<8x16xf32>
    %cst_9 = arith.constant dense<0xFF800000> : vector<8xf32>
    %9 = vector.multi_reduction <maximumf>, %8, %cst_9 [1] : vector<8x16xf32> to vector<8xf32>
    %10 = vector.shape_cast %9 : vector<8xf32> to vector<8x1xf32>
    %11 = vector.broadcast %10 : vector<8x1xf32> to vector<8x16xf32>
    %12 = arith.subf %8, %11 : vector<8x16xf32>
    %13 = math.exp %12 : vector<8x16xf32>
    %cst_10 = arith.constant dense<0.000000e+00> : vector<8xf32>
    %14 = vector.multi_reduction <add>, %13, %cst_10 [1] : vector<8x16xf32> to vector<8xf32>
    %15 = vector.shape_cast %14 : vector<8xf32> to vector<8x1xf32>
    %16 = tpu.reciprocal %15 {approx = true} : vector<8x1xf32> -> vector<8x1xf32>
    %17 = vector.broadcast %16 : vector<8x1xf32> to vector<8x16xf32>
    %18 = arith.mulf %13, %17 : vector<8x16xf32>
    %cst_11 = arith.constant dense<0.000000e+00> : vector<8x32xf32>
    %19 = tpu.matmul %18, %7, %cst_11 {dimension_numbers = #tpu.dot_dimension_numbers<[1], [0], [0], [1], [0, 0, 1, 1], [], []>} : vector<8x16xf32>, vector<16x32xf32>, vector<8x32xf32> -> vector<8x32xf32>
    %c0_12 = arith.constant 0 : index
    %c0_13 = arith.constant 0 : index
    %c32 = arith.constant 32 : index
    %20 = vector.load %arg1[%c0_12, %c0_13, %c32] : memref<1x8x128xf32, #tpu.memory_space<vmem>>, vector<1x8x32xf32>
    %21 = vector.shape_cast %20 : vector<1x8x32xf32> to vector<8x32xf32>
    %cst_14 = arith.constant 0.176776692 : f32
    %22 = vector.broadcast %cst_14 : f32 to vector<8x32xf32>
    %23 = arith.mulf %21, %22 : vector<8x32xf32>
    %c0_15 = arith.constant 0 : index
    %c0_16 = arith.constant 0 : index
    %c32_17 = arith.constant 32 : index
    %24 = vector.load %arg2[%c0_15, %c0_16, %c32_17] : memref<1x16x128xf32, #tpu.memory_space<vmem>>, vector<1x16x32xf32>
    %25 = vector.shape_cast %24 : vector<1x16x32xf32> to vector<16x32xf32>
    %c0_18 = arith.constant 0 : index
    %c0_19 = arith.constant 0 : index
    %c32_20 = arith.constant 32 : index
    %26 = vector.load %arg3[%c0_18, %c0_19, %c32_20] : memref<1x16x128xf32, #tpu.memory_space<vmem>>, vector<1x16x32xf32>
    %27 = vector.shape_cast %26 : vector<1x16x32xf32> to vector<16x32xf32>
    %cst_21 = arith.constant dense<0.000000e+00> : vector<8x16xf32>
    %28 = tpu.matmul %23, %25, %cst_21 {dimension_numbers = #tpu.dot_dimension_numbers<[1], [1], [0], [0], [0, 0, 1, 0], [], []>} : vector<8x32xf32>, vector<16x32xf32>, vector<8x16xf32> -> vector<8x16xf32>
    %cst_22 = arith.constant dense<0xFF800000> : vector<8xf32>
    %29 = vector.multi_reduction <maximumf>, %28, %cst_22 [1] : vector<8x16xf32> to vector<8xf32>
    %30 = vector.shape_cast %29 : vector<8xf32> to vector<8x1xf32>
    %31 = vector.broadcast %30 : vector<8x1xf32> to vector<8x16xf32>
    %32 = arith.subf %28, %31 : vector<8x16xf32>
    %33 = math.exp %32 : vector<8x16xf32>
    %cst_23 = arith.constant dense<0.000000e+00> : vector<8xf32>
    %34 = vector.multi_reduction <add>, %33, %cst_23 [1] : vector<8x16xf32> to vector<8xf32>
    %35 = vector.shape_cast %34 : vector<8xf32> to vector<8x1xf32>
    %36 = tpu.reciprocal %35 {approx = true} : vector<8x1xf32> -> vector<8x1xf32>
    %37 = vector.broadcast %36 : vector<8x1xf32> to vector<8x16xf32>
    %38 = arith.mulf %33, %37 : vector<8x16xf32>
    %cst_24 = arith.constant dense<0.000000e+00> : vector<8x32xf32>
    %39 = tpu.matmul %38, %27, %cst_24 {dimension_numbers = #tpu.dot_dimension_numbers<[1], [0], [0], [1], [0, 0, 1, 1], [], []>} : vector<8x16xf32>, vector<16x32xf32>, vector<8x32xf32> -> vector<8x32xf32>
    %c0_25 = arith.constant 0 : index
    %c0_26 = arith.constant 0 : index
    %c64 = arith.constant 64 : index
    %40 = vector.load %arg1[%c0_25, %c0_26, %c64] : memref<1x8x128xf32, #tpu.memory_space<vmem>>, vector<1x8x32xf32>
    %41 = vector.shape_cast %40 : vector<1x8x32xf32> to vector<8x32xf32>
    %cst_27 = arith.constant 0.176776692 : f32
    %42 = vector.broadcast %cst_27 : f32 to vector<8x32xf32>
    %43 = arith.mulf %41, %42 : vector<8x32xf32>
    %c0_28 = arith.constant 0 : index
    %c0_29 = arith.constant 0 : index
    %c64_30 = arith.constant 64 : index
    %44 = vector.load %arg2[%c0_28, %c0_29, %c64_30] : memref<1x16x128xf32, #tpu.memory_space<vmem>>, vector<1x16x32xf32>
    %45 = vector.shape_cast %44 : vector<1x16x32xf32> to vector<16x32xf32>
    %c0_31 = arith.constant 0 : index
    %c0_32 = arith.constant 0 : index
    %c64_33 = arith.constant 64 : index
    %46 = vector.load %arg3[%c0_31, %c0_32, %c64_33] : memref<1x16x128xf32, #tpu.memory_space<vmem>>, vector<1x16x32xf32>
    %47 = vector.shape_cast %46 : vector<1x16x32xf32> to vector<16x32xf32>
    %cst_34 = arith.constant dense<0.000000e+00> : vector<8x16xf32>
    %48 = tpu.matmul %43, %45, %cst_34 {dimension_numbers = #tpu.dot_dimension_numbers<[1], [1], [0], [0], [0, 0, 1, 0], [], []>} : vector<8x32xf32>, vector<16x32xf32>, vector<8x16xf32> -> vector<8x16xf32>
    %cst_35 = arith.constant dense<0xFF800000> : vector<8xf32>
    %49 = vector.multi_reduction <maximumf>, %48, %cst_35 [1] : vector<8x16xf32> to vector<8xf32>
    %50 = vector.shape_cast %49 : vector<8xf32> to vector<8x1xf32>
    %51 = vector.broadcast %50 : vector<8x1xf32> to vector<8x16xf32>
    %52 = arith.subf %48, %51 : vector<8x16xf32>
    %53 = math.exp %52 : vector<8x16xf32>
    %cst_36 = arith.constant dense<0.000000e+00> : vector<8xf32>
    %54 = vector.multi_reduction <add>, %53, %cst_36 [1] : vector<8x16xf32> to vector<8xf32>
    %55 = vector.shape_cast %54 : vector<8xf32> to vector<8x1xf32>
    %56 = tpu.reciprocal %55 {approx = true} : vector<8x1xf32> -> vector<8x1xf32>
    %57 = vector.broadcast %56 : vector<8x1xf32> to vector<8x16xf32>
    %58 = arith.mulf %53, %57 : vector<8x16xf32>
    %cst_37 = arith.constant dense<0.000000e+00> : vector<8x32xf32>
    %59 = tpu.matmul %58, %47, %cst_37 {dimension_numbers = #tpu.dot_dimension_numbers<[1], [0], [0], [1], [0, 0, 1, 1], [], []>} : vector<8x16xf32>, vector<16x32xf32>, vector<8x32xf32> -> vector<8x32xf32>
    %c0_38 = arith.constant 0 : index
    %c0_39 = arith.constant 0 : index
    %c96 = arith.constant 96 : index
    %60 = vector.load %arg1[%c0_38, %c0_39, %c96] : memref<1x8x128xf32, #tpu.memory_space<vmem>>, vector<1x8x32xf32>
    %61 = vector.shape_cast %60 : vector<1x8x32xf32> to vector<8x32xf32>
    %cst_40 = arith.constant 0.176776692 : f32
    %62 = vector.broadcast %cst_40 : f32 to vector<8x32xf32>
    %63 = arith.mulf %61, %62 : vector<8x32xf32>
    %c0_41 = arith.constant 0 : index
    %c0_42 = arith.constant 0 : index
    %c96_43 = arith.constant 96 : index
    %64 = vector.load %arg2[%c0_41, %c0_42, %c96_43] : memref<1x16x128xf32, #tpu.memory_space<vmem>>, vector<1x16x32xf32>
    %65 = vector.shape_cast %64 : vector<1x16x32xf32> to vector<16x32xf32>
    %c0_44 = arith.constant 0 : index
    %c0_45 = arith.constant 0 : index
    %c96_46 = arith.constant 96 : index
    %66 = vector.load %arg3[%c0_44, %c0_45, %c96_46] : memref<1x16x128xf32, #tpu.memory_space<vmem>>, vector<1x16x32xf32>
    %67 = vector.shape_cast %66 : vector<1x16x32xf32> to vector<16x32xf32>
    %cst_47 = arith.constant dense<0.000000e+00> : vector<8x16xf32>
    %68 = tpu.matmul %63, %65, %cst_47 {dimension_numbers = #tpu.dot_dimension_numbers<[1], [1], [0], [0], [0, 0, 1, 0], [], []>} : vector<8x32xf32>, vector<16x32xf32>, vector<8x16xf32> -> vector<8x16xf32>
    %cst_48 = arith.constant dense<0xFF800000> : vector<8xf32>
    %69 = vector.multi_reduction <maximumf>, %68, %cst_48 [1] : vector<8x16xf32> to vector<8xf32>
    %70 = vector.shape_cast %69 : vector<8xf32> to vector<8x1xf32>
    %71 = vector.broadcast %70 : vector<8x1xf32> to vector<8x16xf32>
    %72 = arith.subf %68, %71 : vector<8x16xf32>
    %73 = math.exp %72 : vector<8x16xf32>
    %cst_49 = arith.constant dense<0.000000e+00> : vector<8xf32>
    %74 = vector.multi_reduction <add>, %73, %cst_49 [1] : vector<8x16xf32> to vector<8xf32>
    %75 = vector.shape_cast %74 : vector<8xf32> to vector<8x1xf32>
    %76 = tpu.reciprocal %75 {approx = true} : vector<8x1xf32> -> vector<8x1xf32>
    %77 = vector.broadcast %76 : vector<8x1xf32> to vector<8x16xf32>
    %78 = arith.mulf %73, %77 : vector<8x16xf32>
    %cst_50 = arith.constant dense<0.000000e+00> : vector<8x32xf32>
    %79 = tpu.matmul %78, %67, %cst_50 {dimension_numbers = #tpu.dot_dimension_numbers<[1], [0], [0], [1], [0, 0, 1, 1], [], []>} : vector<8x16xf32>, vector<16x32xf32>, vector<8x32xf32> -> vector<8x32xf32>
    %80 = tpu.concatenate %19, %39, %59, %79 in 1 : vector<8x32xf32>, vector<8x32xf32>, vector<8x32xf32>, vector<8x32xf32> -> vector<8x128xf32>
    %c0_51 = arith.constant 0 : index
    %c0_52 = arith.constant 0 : index
    %c0_53 = arith.constant 0 : index
    %81 = vector.load %arg4[%c0_51, %c0_52, %c0_53] : memref<1x8x128xf32, #tpu.memory_space<vmem>>, vector<1x8x128xf32>
    %82 = vector.shape_cast %81 : vector<1x8x128xf32> to vector<8x128xf32>
    %83 = vector.shape_cast %80 : vector<8x128xf32> to vector<1x8x128xf32>
    tpu.vector_store %arg4[%c0_51, %c0_52, %c0_53], %83 {strides = array<i32>} : memref<1x8x128xf32, #tpu.memory_space<vmem>>, vector<1x8x128xf32>,
    return
  }
  func.func @transform_0(%arg0: i32) -> (i32, i32, i32) {
    %c0_i32 = arith.constant 0 : i32
    %c0_i32_0 = arith.constant 0 : i32
    %c0_i32_1 = arith.constant 0 : i32
    return %arg0, %c0_i32, %c0_i32_0 : i32, i32, i32
  }
  func.func @transform_1(%arg0: i32) -> (i32, i32, i32) {
    %c0_i32 = arith.constant 0 : i32
    %c0_i32_0 = arith.constant 0 : i32
    %c0_i32_1 = arith.constant 0 : i32
    return %arg0, %c0_i32, %c0_i32_0 : i32, i32, i32
  }
  func.func @transform_2(%arg0: i32) -> (i32, i32, i32) {
    %c0_i32 = arith.constant 0 : i32
    %c0_i32_0 = arith.constant 0 : i32
    %c0_i32_1 = arith.constant 0 : i32
    return %arg0, %c0_i32, %c0_i32_0 : i32, i32, i32
  }
  func.func @transform_3(%arg0: i32) -> (i32, i32, i32) {
    %c0_i32 = arith.constant 0 : i32
    %c0_i32_0 = arith.constant 0 : i32
    %c0_i32_1 = arith.constant 0 : i32
    return %arg0, %c0_i32, %c0_i32_0 : i32, i32, i32
  }
}

module attributes {stable_mosaic.version = 11 : i64} {
  func.func @_ffn_ln_kernel(%arg0: i32, %arg1: memref<8x128xf32, #tpu.memory_space<vmem>>, %arg2: memref<128x256xf32, #tpu.memory_space<vmem>>, %arg3: memref<1x256xf32, #tpu.memory_space<vmem>>, %arg4: memref<256x128xf32, #tpu.memory_space<vmem>>, %arg5: memref<1x128xf32, #tpu.memory_space<vmem>>, %arg6: memref<1x128xf32, #tpu.memory_space<vmem>>, %arg7: memref<1x128xf32, #tpu.memory_space<vmem>>, %arg8: memref<8x128xf32, #tpu.memory_space<vmem>>) attributes {dimension_semantics = [#tpu.dimension_semantics<parallel>], iteration_bounds = array<i64: 2>, scalar_prefetch = 0 : i64, scratch_operands = 0 : i64, tpu.core_type = #tpu.core_type<tc>, window_params = [{transform_indices = @transform_0, window_bounds = array<i64: 8, 128>}, {pipeline_mode = #tpu.pipeline_mode<synchronous>, transform_indices = @transform_1, window_bounds = array<i64: 128, 256>}, {pipeline_mode = #tpu.pipeline_mode<synchronous>, transform_indices = @transform_2, window_bounds = array<i64: 1, 256>}, {pipeline_mode = #tpu.pipeline_mode<synchronous>, transform_indices = @transform_3, window_bounds = array<i64: 256, 128>}, {pipeline_mode = #tpu.pipeline_mode<synchronous>, transform_indices = @transform_4, window_bounds = array<i64: 1, 128>}, {pipeline_mode = #tpu.pipeline_mode<synchronous>, transform_indices = @transform_5, window_bounds = array<i64: 1, 128>}, {pipeline_mode = #tpu.pipeline_mode<synchronous>, transform_indices = @transform_6, window_bounds = array<i64: 1, 128>}, {transform_indices = @transform_7, window_bounds = array<i64: 8, 128>}]} {
    %c0 = arith.constant 0 : index
    %c0_0 = arith.constant 0 : index
    %0 = vector.load %arg1[%c0, %c0_0] : memref<8x128xf32, #tpu.memory_space<vmem>>, vector<8x128xf32>
    %c0_1 = arith.constant 0 : index
    %c0_2 = arith.constant 0 : index
    %1 = vector.load %arg2[%c0_1, %c0_2] : memref<128x256xf32, #tpu.memory_space<vmem>>, vector<128x256xf32>
    %cst = arith.constant dense<0.000000e+00> : vector<8x256xf32>
    %2 = tpu.matmul %0, %1, %cst {dimension_numbers = #tpu.dot_dimension_numbers<[1], [0], [0], [1], [0, 0, 1, 1], [], []>} : vector<8x128xf32>, vector<128x256xf32>, vector<8x256xf32> -> vector<8x256xf32>
    %c0_3 = arith.constant 0 : index
    %c0_4 = arith.constant 0 : index
    %3 = vector.load %arg3[%c0_3, %c0_4] : memref<1x256xf32, #tpu.memory_space<vmem>>, vector<1x256xf32>
    %4 = vector.broadcast %3 : vector<1x256xf32> to vector<8x256xf32>
    %5 = arith.addf %2, %4 : vector<8x256xf32>
    %cst_5 = arith.constant 0.000000e+00 : f32
    %6 = vector.broadcast %cst_5 : f32 to vector<8x256xf32>
    %7 = arith.maximumf %5, %6 : vector<8x256xf32>
    %c0_6 = arith.constant 0 : index
    %c0_7 = arith.constant 0 : index
    %8 = vector.load %arg4[%c0_6, %c0_7] : memref<256x128xf32, #tpu.memory_space<vmem>>, vector<256x128xf32>
    %cst_8 = arith.constant dense<0.000000e+00> : vector<8x128xf32>
    %9 = tpu.matmul %7, %8, %cst_8 {dimension_numbers = #tpu.dot_dimension_numbers<[1], [0], [0], [1], [0, 0, 1, 1], [], []>} : vector<8x256xf32>, vector<256x128xf32>, vector<8x128xf32> -> vector<8x128xf32>
    %c0_9 = arith.constant 0 : index
    %c0_10 = arith.constant 0 : index
    %10 = vector.load %arg5[%c0_9, %c0_10] : memref<1x128xf32, #tpu.memory_space<vmem>>, vector<1x128xf32>
    %11 = vector.broadcast %10 : vector<1x128xf32> to vector<8x128xf32>
    %12 = arith.addf %9, %11 : vector<8x128xf32>
    %13 = arith.addf %12, %0 : vector<8x128xf32>
    %cst_11 = arith.constant dense<0.000000e+00> : vector<8xf32>
    %14 = vector.multi_reduction <add>, %13, %cst_11 [1] : vector<8x128xf32> to vector<8xf32>
    %15 = vector.shape_cast %14 : vector<8xf32> to vector<8x1xf32>
    %cst_12 = arith.constant 1.280000e+02 : f32
    %16 = vector.broadcast %cst_12 : f32 to vector<8x1xf32>
    %17 = arith.divf %15, %16 : vector<8x1xf32>
    %18 = vector.broadcast %17 : vector<8x1xf32> to vector<8x128xf32>
    %19 = arith.subf %13, %18 : vector<8x128xf32>
    %20 = arith.mulf %19, %19 : vector<8x128xf32>
    %cst_13 = arith.constant dense<0.000000e+00> : vector<8xf32>
    %21 = vector.multi_reduction <add>, %20, %cst_13 [1] : vector<8x128xf32> to vector<8xf32>
    %22 = vector.shape_cast %21 : vector<8xf32> to vector<8x1xf32>
    %cst_14 = arith.constant 1.280000e+02 : f32
    %23 = vector.broadcast %cst_14 : f32 to vector<8x1xf32>
    %24 = arith.divf %22, %23 : vector<8x1xf32>
    %25 = vector.broadcast %17 : vector<8x1xf32> to vector<8x128xf32>
    %26 = arith.subf %13, %25 : vector<8x128xf32>
    %cst_15 = arith.constant 9.99999974E-6 : f32
    %27 = vector.broadcast %cst_15 : f32 to vector<8x1xf32>
    %28 = arith.addf %24, %27 : vector<8x1xf32>
    %29 = math.rsqrt %28 : vector<8x1xf32>
    %30 = vector.broadcast %29 : vector<8x1xf32> to vector<8x128xf32>
    %31 = arith.mulf %26, %30 : vector<8x128xf32>
    %c0_16 = arith.constant 0 : index
    %c0_17 = arith.constant 0 : index
    %32 = vector.load %arg6[%c0_16, %c0_17] : memref<1x128xf32, #tpu.memory_space<vmem>>, vector<1x128xf32>
    %33 = vector.broadcast %32 : vector<1x128xf32> to vector<8x128xf32>
    %34 = arith.mulf %31, %33 : vector<8x128xf32>
    %c0_18 = arith.constant 0 : index
    %c0_19 = arith.constant 0 : index
    %35 = vector.load %arg7[%c0_18, %c0_19] : memref<1x128xf32, #tpu.memory_space<vmem>>, vector<1x128xf32>
    %36 = vector.broadcast %35 : vector<1x128xf32> to vector<8x128xf32>
    %37 = arith.addf %34, %36 : vector<8x128xf32>
    %c0_20 = arith.constant 0 : index
    %c0_21 = arith.constant 0 : index
    %38 = vector.load %arg8[%c0_20, %c0_21] : memref<8x128xf32, #tpu.memory_space<vmem>>, vector<8x128xf32>
    tpu.vector_store %arg8[%c0_20, %c0_21], %37 {strides = array<i32>} : memref<8x128xf32, #tpu.memory_space<vmem>>, vector<8x128xf32>,
    return
  }
  func.func @transform_0(%arg0: i32) -> (i32, i32) {
    %c0_i32 = arith.constant 0 : i32
    %c0_i32_0 = arith.constant 0 : i32
    return %arg0, %c0_i32 : i32, i32
  }
  func.func @transform_1(%arg0: i32) -> (i32, i32) {
    %c0_i32 = arith.constant 0 : i32
    %c0_i32_0 = arith.constant 0 : i32
    %c0_i32_1 = arith.constant 0 : i32
    return %c0_i32, %c0_i32_0 : i32, i32
  }
  func.func @transform_2(%arg0: i32) -> (i32, i32) {
    %c0_i32 = arith.constant 0 : i32
    %c0_i32_0 = arith.constant 0 : i32
    %c0_i32_1 = arith.constant 0 : i32
    return %c0_i32, %c0_i32_0 : i32, i32
  }
  func.func @transform_3(%arg0: i32) -> (i32, i32) {
    %c0_i32 = arith.constant 0 : i32
    %c0_i32_0 = arith.constant 0 : i32
    %c0_i32_1 = arith.constant 0 : i32
    return %c0_i32, %c0_i32_0 : i32, i32
  }
  func.func @transform_4(%arg0: i32) -> (i32, i32) {
    %c0_i32 = arith.constant 0 : i32
    %c0_i32_0 = arith.constant 0 : i32
    %c0_i32_1 = arith.constant 0 : i32
    return %c0_i32, %c0_i32_0 : i32, i32
  }
  func.func @transform_5(%arg0: i32) -> (i32, i32) {
    %c0_i32 = arith.constant 0 : i32
    %c0_i32_0 = arith.constant 0 : i32
    %c0_i32_1 = arith.constant 0 : i32
    return %c0_i32, %c0_i32_0 : i32, i32
  }
  func.func @transform_6(%arg0: i32) -> (i32, i32) {
    %c0_i32 = arith.constant 0 : i32
    %c0_i32_0 = arith.constant 0 : i32
    %c0_i32_1 = arith.constant 0 : i32
    return %c0_i32, %c0_i32_0 : i32, i32
  }
  func.func @transform_7(%arg0: i32) -> (i32, i32) {
    %c0_i32 = arith.constant 0 : i32
    %c0_i32_0 = arith.constant 0 : i32
    return %arg0, %c0_i32 : i32, i32
  }
}

module attributes {stable_mosaic.version = 11 : i64} {
  func.func @_layernorm_kernel(%arg0: i32, %arg1: memref<8x128xf32, #tpu.memory_space<vmem>>, %arg2: memref<1x128xf32, #tpu.memory_space<vmem>>, %arg3: memref<1x128xf32, #tpu.memory_space<vmem>>, %arg4: memref<8x128xf32, #tpu.memory_space<vmem>>) attributes {dimension_semantics = [#tpu.dimension_semantics<parallel>], iteration_bounds = array<i64: 2>, scalar_prefetch = 0 : i64, scratch_operands = 0 : i64, tpu.core_type = #tpu.core_type<tc>, window_params = [{transform_indices = @transform_0, window_bounds = array<i64: 8, 128>}, {pipeline_mode = #tpu.pipeline_mode<synchronous>, transform_indices = @transform_1, window_bounds = array<i64: 1, 128>}, {pipeline_mode = #tpu.pipeline_mode<synchronous>, transform_indices = @transform_2, window_bounds = array<i64: 1, 128>}, {transform_indices = @transform_3, window_bounds = array<i64: 8, 128>}]} {
    %c0 = arith.constant 0 : index
    %c0_0 = arith.constant 0 : index
    %0 = vector.load %arg1[%c0, %c0_0] : memref<8x128xf32, #tpu.memory_space<vmem>>, vector<8x128xf32>
    %cst = arith.constant dense<0.000000e+00> : vector<8xf32>
    %1 = vector.multi_reduction <add>, %0, %cst [1] : vector<8x128xf32> to vector<8xf32>
    %2 = vector.shape_cast %1 : vector<8xf32> to vector<8x1xf32>
    %cst_1 = arith.constant 1.280000e+02 : f32
    %3 = vector.broadcast %cst_1 : f32 to vector<8x1xf32>
    %4 = arith.divf %2, %3 : vector<8x1xf32>
    %5 = vector.broadcast %4 : vector<8x1xf32> to vector<8x128xf32>
    %6 = arith.subf %0, %5 : vector<8x128xf32>
    %7 = arith.mulf %6, %6 : vector<8x128xf32>
    %cst_2 = arith.constant dense<0.000000e+00> : vector<8xf32>
    %8 = vector.multi_reduction <add>, %7, %cst_2 [1] : vector<8x128xf32> to vector<8xf32>
    %9 = vector.shape_cast %8 : vector<8xf32> to vector<8x1xf32>
    %cst_3 = arith.constant 1.280000e+02 : f32
    %10 = vector.broadcast %cst_3 : f32 to vector<8x1xf32>
    %11 = arith.divf %9, %10 : vector<8x1xf32>
    %12 = vector.broadcast %4 : vector<8x1xf32> to vector<8x128xf32>
    %13 = arith.subf %0, %12 : vector<8x128xf32>
    %cst_4 = arith.constant 9.99999974E-6 : f32
    %14 = vector.broadcast %cst_4 : f32 to vector<8x1xf32>
    %15 = arith.addf %11, %14 : vector<8x1xf32>
    %16 = math.rsqrt %15 : vector<8x1xf32>
    %17 = vector.broadcast %16 : vector<8x1xf32> to vector<8x128xf32>
    %18 = arith.mulf %13, %17 : vector<8x128xf32>
    %c0_5 = arith.constant 0 : index
    %c0_6 = arith.constant 0 : index
    %19 = vector.load %arg2[%c0_5, %c0_6] : memref<1x128xf32, #tpu.memory_space<vmem>>, vector<1x128xf32>
    %20 = vector.broadcast %19 : vector<1x128xf32> to vector<8x128xf32>
    %21 = arith.mulf %18, %20 : vector<8x128xf32>
    %c0_7 = arith.constant 0 : index
    %c0_8 = arith.constant 0 : index
    %22 = vector.load %arg3[%c0_7, %c0_8] : memref<1x128xf32, #tpu.memory_space<vmem>>, vector<1x128xf32>
    %23 = vector.broadcast %22 : vector<1x128xf32> to vector<8x128xf32>
    %24 = arith.addf %21, %23 : vector<8x128xf32>
    %c0_9 = arith.constant 0 : index
    %c0_10 = arith.constant 0 : index
    %25 = vector.load %arg4[%c0_9, %c0_10] : memref<8x128xf32, #tpu.memory_space<vmem>>, vector<8x128xf32>
    tpu.vector_store %arg4[%c0_9, %c0_10], %24 {strides = array<i32>} : memref<8x128xf32, #tpu.memory_space<vmem>>, vector<8x128xf32>,
    return
  }
  func.func @transform_0(%arg0: i32) -> (i32, i32) {
    %c0_i32 = arith.constant 0 : i32
    %c0_i32_0 = arith.constant 0 : i32
    return %arg0, %c0_i32 : i32, i32
  }
  func.func @transform_1(%arg0: i32) -> (i32, i32) {
    %c0_i32 = arith.constant 0 : i32
    %c0_i32_0 = arith.constant 0 : i32
    %c0_i32_1 = arith.constant 0 : i32
    return %c0_i32, %c0_i32_0 : i32, i32
  }
  func.func @transform_2(%arg0: i32) -> (i32, i32) {
    %c0_i32 = arith.constant 0 : i32
    %c0_i32_0 = arith.constant 0 : i32
    %c0_i32_1 = arith.constant 0 : i32
    return %c0_i32, %c0_i32_0 : i32, i32
  }
  func.func @transform_3(%arg0: i32) -> (i32, i32) {
    %c0_i32 = arith.constant 0 : i32
    %c0_i32_0 = arith.constant 0 : i32
    return %arg0, %c0_i32 : i32, i32
  }
}

</mosaic_0001>

<bundles_post_ra>
// kernel: transformer_decoder_forward.21
= control target key start
LH: loop header
LB: loop body
LE: loop exit
PB: predicated region body
PF: predicated region fallthrough
CT: control target
= control target key end

     0   :  { %s637_s15 = smov 0   ;;  %s639_s16 = smov 0   ;;  %s780_s0 = inlined_call_operand.vmem [shape: f32[16,128], index: 0, kind: input, shape index: {}]   ;;  %s781_s1 = inlined_call_operand.vmem [shape: f32[16,128], index: 1, kind: input, shape index: {}]   ;;  %s782_s2 = inlined_call_operand.vmem [shape: f32[128,256], index: 2, kind: input, shape index: {}]   ;;  %s783_s3 = inlined_call_operand.vmem [shape: f32[1,256], index: 3, kind: input, shape index: {}]   ;;  %s784_s4 = inlined_call_operand.vmem [shape: f32[16,256], index: 4, kind: output, shape index: {}]  }
   0x1   :  { %s641_s17 = smov 0  }
   0x2 LB: > { %s26_s18 = sadd.s32 1, %s605_s16  ;;  %p522_p0 = scmp.ge.s32.totalorder %s609_s17, 1  ;;  %s609_s17 = sphi %s641_s17, %s14_s17   ;;  %s605_s16 = sphi %s639_s16, %s786_s16   ;;  %s601_s15 = sphi %s637_s15, %s785_s15  }
   0x3   : > { %p28_p1 = scmp.ge.s32.totalorder %s26_s18, 2  ;;  %p205_p2 = scmp.lt.s32.totalorder %s609_s17, 3 }
   0x5   : > { %s788_s18 = smov (%p28_p1, %s26_s18), 0  ;;  %p206_p3 = pnand %p522_p0, %p205_p2 }
   0x6   : > { %v280_v0 = vld [vmem:[%s782_s2 + $0x8] sm:$0xff] (!%p206_p3)  ;;  %v282_v1 = vld [vmem:[%s782_s2 + $0x18] sm:$0xff] (!%p206_p3)  ;;  %v279_v2 = vld [vmem:[%s782_s2] sm:$0xff] (!%p206_p3)  ;;  %v611_v7 = vmov (!%p206_p3), 0.0   ;;  %p247_p4 = scmp.lt.s32.totalorder (!%p206_p3), %s601_s15, 1  ;;  %v313_v52 = vlaneseq (!%p206_p3) }
   0x7   : > { %209 = sbr.rel (%p206_p3) target bundleno = 257 (0x101), region = 36  ;;  %v530_v3 = vpack.c.bf16 (!%p206_p3), %v282_v1, %v280_v0  ;;  %v281_v4 = vld [vmem:[%s782_s2 + $0x10] sm:$0xff] (!%p206_p3)  ;;  %v284_v5 = vld [vmem:[%s782_s2 + $0x28] sm:$0xff] (!%p206_p3)  ;;  %v286_v6 = vld [vmem:[%s782_s2 + $0x38] sm:$0xff] (!%p206_p3)  ;;  %387 = vmatprep.mubr.f32.mxu0 (!%p206_p3), %v611_v7 }
   0x8   : > { %v532_v8 = vpack.c.bf16 (!%p206_p3), %v281_v4, %v279_v2  ;;  %v534_v9 = vpack.c.bf16 (!%p206_p3), %v286_v6, %v284_v5  ;;  %v283_v10 = vld [vmem:[%s782_s2 + $0x20] sm:$0xff] (!%p206_p3)  ;;  %v285_v11 = vld [vmem:[%s782_s2 + $0x30] sm:$0xff] (!%p206_p3)  ;;  %v288_v12 = vld [vmem:[%s782_s2 + $0x48] sm:$0xff] (!%p206_p3)  ;;  %v314_v53 = vshrl.u32 (!%p206_p3), %v313_v52, 7 }
   0x9   : > { %531 = vmatprep.subr.bf16.mxu0 (!%p206_p3), %v530_v3  ;;  %v290_v13 = vld [vmem:[%s782_s2 + $0x58] sm:$0xff] (!%p206_p3)  ;;  %v536_v14 = vpack.c.bf16 (!%p206_p3), %v285_v11, %v283_v10  ;;  %v287_v16 = vld [vmem:[%s782_s2 + $0x40] sm:$0xff] (!%p206_p3)  ;;  %v289_v17 = vld [vmem:[%s782_s2 + $0x50] sm:$0xff] (!%p206_p3) }
   0xa   : > { %533 = vmatpush1.bf16.msra.mxu0 (!%p206_p3), %v532_v8  ;;  %v538_v15 = vpack.c.bf16 (!%p206_p3), %v290_v13, %v288_v12  ;;  %v292_v18 = vld [vmem:[%s782_s2 + $0x68] sm:$0xff] (!%p206_p3)  ;;  %v294_v19 = vld [vmem:[%s782_s2 + $0x78] sm:$0xff] (!%p206_p3)  ;;  %v540_v20 = vpack.c.bf16 (!%p206_p3), %v289_v17, %v287_v16  ;;  %v291_v22 = vld [vmem:[%s782_s2 + $0x60] sm:$0xff] (!%p206_p3)  ;;  %v315_v54 = vsub.s32 (!%p206_p3), 0, %v314_v53  ;;  %v319_v56 = vsub.s32 (!%p206_p3), 1, %v314_v53 }
   0xb   : > { %535 = vmatprep.subr.bf16.mxu0 (!%p206_p3), %v534_v9  ;;  %v542_v21 = vpack.c.bf16 (!%p206_p3), %v294_v19, %v292_v18  ;;  %v293_v23 = vld [vmem:[%s782_s2 + $0x70] sm:$0xff] (!%p206_p3)  ;;  %v296_v24 = vld [vmem:[%s782_s2 + $0x88] sm:$0xff] (!%p206_p3)  ;;  %v298_v25 = vld [vmem:[%s782_s2 + $0x98] sm:$0xff] (!%p206_p3) }
   0xc   : > { %v544_v26 = vpack.c.bf16 (!%p206_p3), %v293_v23, %v291_v22  ;;  %v546_v27 = vpack.c.bf16 (!%p206_p3), %v298_v25, %v296_v24  ;;  %v295_v28 = vld [vmem:[%s782_s2 + $0x80] sm:$0xff] (!%p206_p3)  ;;  %v297_v29 = vld [vmem:[%s782_s2 + $0x90] sm:$0xff] (!%p206_p3)  ;;  %v300_v30 = vld [vmem:[%s782_s2 + $0xa8] sm:$0xff] (!%p206_p3) }
   0xd   : > { %v302_v31 = vld [vmem:[%s782_s2 + $0xb8] sm:$0xff] (!%p206_p3)  ;;  %v548_v32 = vpack.c.bf16 (!%p206_p3), %v297_v29, %v295_v28  ;;  %v299_v34 = vld [vmem:[%s782_s2 + $0xa0] sm:$0xff] (!%p206_p3)  ;;  %v301_v35 = vld [vmem:[%s782_s2 + $0xb0] sm:$0xff] (!%p206_p3) }
   0xe   : > { %537 = vmatpush1.bf16.msra.mxu0 %v536_v14  ;;  %v550_v33 = vpack.c.bf16 %v302_v31, %v300_v30  ;;  %v304_v36 = vld [vmem:[%s782_s2 + $0xc8] sm:$0xff]  ;;  %v306_v37 = vld [vmem:[%s782_s2 + $0xd8] sm:$0xff]  ;;  %s790_s15 = smov (!%p247_p4, %s601_s15), 1  ;;  %v552_v38 = vpack.c.bf16 %v301_v35, %v299_v34  ;;  %v303_v40 = vld [vmem:[%s782_s2 + $0xc0] sm:$0xff] }
   0xf   : > { %539 = vmatprep.subr.bf16.mxu0 %v538_v15  ;;  %v554_v39 = vpack.c.bf16 %v306_v37, %v304_v36  ;;  %v305_v41 = vld [vmem:[%s782_s2 + $0xd0] sm:$0xff]  ;;  %v308_v42 = vld [vmem:[%s782_s2 + $0xe8] sm:$0xff]  ;;  %v310_v43 = vld [vmem:[%s782_s2 + $0xf8] sm:$0xff]  ;;  %s523_s9 = sshll.u32 %s790_s15, 3  ;;  %s529_s26 = sshll.u32 %s790_s15, 4 }
  0x10   : > { %v556_v44 = vpack.c.bf16 %v305_v41, %v303_v40  ;;  %v558_v45 = vpack.c.bf16 %v310_v43, %v308_v42  ;;  %v307_v46 = vld [vmem:[%s782_s2 + $0xe0] sm:$0xff]  ;;  %v309_v47 = vld [vmem:[%s782_s2 + $0xf0] sm:$0xff]  ;;  %s250_s20 = scalar_lea.vmem %s780_s0, %s523_s9  ;;  %s254_s23 = scalar_lea.vmem %s781_s1, %s523_s9 }
  0x11   : > { %v560_v48 = vpack.c.bf16 %v309_v47, %v307_v46  ;;  %v276_v49 = vld [vmem:[%s250_s20] sm:$0xff]  ;;  %s274_s29 = scalar_lea.vmem %s784_s4, %s529_s26 }
  0x12   : > { %541 = vmatpush1.bf16.msra.mxu0 %v540_v20  ;;  %v277_v50 = vld [vmem:[%s254_s23] sm:$0xff] }
  0x13   : > { %543 = vmatprep.subr.bf16.mxu0 %v542_v21  ;;  %v278_v51 = vadd.f32 %v277_v50, %v276_v49  ;;  %v311_v55 = vld [vmem:[%s783_s3] sm:$0x3] }
  0x14   : > { %v316_v57 = vrot.slane %v311_v55, %v315_v54  ;;  %v320_v58 = vrot.slane %v311_v55, %v319_v56 }
  0x16   : > { %545 = vmatpush1.bf16.msra.mxu0 %v544_v26 }
  0x17   : > { %547 = vmatprep.subr.bf16.mxu0 %v546_v27 }
  0x1a   : > { %549 = vmatpush1.bf16.msra.mxu0 %v548_v32 }
  0x1b   : > { %551 = vmatprep.subr.bf16.mxu0 %v550_v33 }
  0x1e   : > { %553 = vmatpush1.bf16.msra.mxu0 %v552_v38 }
  0x1f   : > { %555 = vmatprep.subr.bf16.mxu0 %v554_v39 }
  0x22   : > { %557 = vmatpush1.bf16.msra.mxu0 %v556_v44 }
  0x23   : > { %559 = vmatprep.subr.bf16.mxu0 %v558_v45 }
  0x26   : > { %561 = vmatpush1.bf16.msra.mxu0 %v560_v48 }
  0x29   : > { %388 = vmatmul.mubr.f32.vlgmr.msra.gmra.mrb[0].mxu0 %v278_v51 }
  0xfc   : > { %v389_v59 = vpop.f32.mrb[0].mxu0 }
  0xfd   : > { %v390_v60 = vadd.f32 %v389_v59, %v316_v57  ;;  %v391_v61 = vpop.f32.mrb[1].mxu0 }
  0xfe   : > { %v392_v62 = vadd.f32 %v391_v61, %v320_v58 }
  0xff   : > { %394 = vst [vmem:[%s274_s29] sm:$0xff] %v390_v60 }
 0x100   : > { %395 = vst [vmem:[%s274_s29 + $0x8] sm:$0xff] %v392_v62 }
 0x101 PF: > { %s14_s17 = sadd.s32 1, %s609_s17   ;;  %s785_s15 = smov %s605_s16 }
 0x102   : > { %p11_p5 = scmp.ge.s32.totalorder %s14_s17, 4   ;;  %s786_s16 = smov %s788_s18 }
 0x104   :  { %13 = sbr.rel (!%p11_p5) target bundleno = 2 (0x2), region = 75 }

// kernel: transformer_decoder_forward.22
= control target key start
LH: loop header
LB: loop body
LE: loop exit
PB: predicated region body
PF: predicated region fallthrough
CT: control target
= control target key end

     0   :  { %s573_s12 = smov 0   ;;  %s575_s13 = smov 0   ;;  %s661_s0 = inlined_call_operand.vmem [shape: f32[16,128], index: 0, kind: input, shape index: {}]   ;;  %s662_s1 = inlined_call_operand.vmem [shape: f32[128,128], index: 1, kind: input, shape index: {}]   ;;  %s663_s2 = inlined_call_operand.vmem [shape: f32[1,128], index: 2, kind: input, shape index: {}]   ;;  %s664_s3 = inlined_call_operand.vmem [shape: f32[16,128], index: 3, kind: output, shape index: {}]  }
   0x1   :  { %s577_s14 = smov 0  }
   0x2 LB: > { %s25_s15 = sadd.s32 1, %s544_s13  ;;  %p417_p0 = scmp.ge.s32.totalorder %s548_s14, 1  ;;  %s548_s14 = sphi %s577_s14, %s13_s14   ;;  %s544_s13 = sphi %s575_s13, %s666_s13   ;;  %s540_s12 = sphi %s573_s12, %s665_s12  }
   0x3   : > { %p27_p1 = scmp.ge.s32.totalorder %s25_s15, 2  ;;  %p167_p2 = scmp.lt.s32.totalorder %s548_s14, 3 }
   0x5   : > { %s668_s15 = smov (%p27_p1, %s25_s15), 0  ;;  %p168_p3 = pnand %p417_p0, %p167_p2 }
   0x6   : > { %v218_v0 = vld [vmem:[%s662_s1] sm:$0xff] (!%p168_p3)  ;;  %v219_v1 = vld [vmem:[%s662_s1 + $0x8] sm:$0xff] (!%p168_p3)  ;;  %v220_v2 = vld [vmem:[%s662_s1 + $0x10] sm:$0xff] (!%p168_p3)  ;;  %v550_v3 = vmov (!%p168_p3), 0.0|0.0   ;;  %vm551_vm0 = vmmov (!%p168_p3), 0   ;;  %v552_v6 = vmov (!%p168_p3), 0.0  }
   0x7   : > { %171 = sbr.rel (%p168_p3) target bundleno = 255 (0xff), region = 32  ;;  %475 = vmatprep.subr.bf16.mxu0 (!%p168_p3), %v550_v3  ;;  %v476_v4 = vpack.c.bf16 (!%p168_p3), %v219_v1, %v218_v0  ;;  %v221_v5 = vld [vmem:[%s662_s1 + $0x18] sm:$0xff] (!%p168_p3)  ;;  %472 = vmatprep.mubr.msk.f32.mxu0 (!%p168_p3), %vm551_vm0, %v552_v6  ;;  %v222_v8 = vld [vmem:[%s662_s1 + $0x20] sm:$0xff] (!%p168_p3)  ;;  %v223_v9 = vld [vmem:[%s662_s1 + $0x28] sm:$0xff] (!%p168_p3)  ;;  %p199_p4 = scmp.lt.s32.totalorder (!%p168_p3), %s540_s12, 1 }
   0x8   : > { %v479_v7 = vpack.c.bf16 (!%p168_p3), %v221_v5, %v220_v2  ;;  %v482_v10 = vpack.c.bf16 (!%p168_p3), %v223_v9, %v222_v8  ;;  %v224_v11 = vld [vmem:[%s662_s1 + $0x30] sm:$0xff] (!%p168_p3)  ;;  %v225_v12 = vld [vmem:[%s662_s1 + $0x38] sm:$0xff] (!%p168_p3)  ;;  %v226_v14 = vld [vmem:[%s662_s1 + $0x40] sm:$0xff] (!%p168_p3) }
   0x9   : > { %477 = vmatpush3.bf16.msra.mxu0 (!%p168_p3), %v476_v4  ;;  %v485_v13 = vpack.c.bf16 (!%p168_p3), %v225_v12, %v224_v11  ;;  %v227_v15 = vld [vmem:[%s662_s1 + $0x48] sm:$0xff] (!%p168_p3)  ;;  %v228_v17 = vld [vmem:[%s662_s1 + $0x50] sm:$0xff] (!%p168_p3)  ;;  %v229_v18 = vld [vmem:[%s662_s1 + $0x58] sm:$0xff] (!%p168_p3) }
   0xa   : > { %478 = vmatprep.subr.bf16.mxu0 (!%p168_p3), %v550_v3  ;;  %v488_v16 = vpack.c.bf16 (!%p168_p3), %v227_v15, %v226_v14  ;;  %v491_v19 = vpack.c.bf16 (!%p168_p3), %v229_v18, %v228_v17  ;;  %v230_v20 = vld [vmem:[%s662_s1 + $0x60] sm:$0xff] (!%p168_p3)  ;;  %v231_v21 = vld [vmem:[%s662_s1 + $0x68] sm:$0xff] (!%p168_p3)  ;;  %v232_v23 = vld [vmem:[%s662_s1 + $0x70] sm:$0xff] (!%p168_p3) }
   0xb   : > { %v494_v22 = vpack.c.bf16 (!%p168_p3), %v231_v21, %v230_v20  ;;  %v233_v24 = vld [vmem:[%s662_s1 + $0x78] sm:$0xff] (!%p168_p3)  ;;  %v420_v27 = vld [vmem:[%s663_s2] ss:$0 sm:$0xff] (!%p168_p3) }
   0xc   : > { %v497_v25 = vpack.c.bf16 (!%p168_p3), %v233_v24, %v232_v23 }
   0xd   : > { %480 = vmatpush3.bf16.msra.mxu0 (!%p168_p3), %v479_v7 }
   0xe   : > { %481 = vmatprep.subr.bf16.mxu0 %v550_v3  ;;  %s670_s12 = smov (!%p199_p4, %s540_s12), 1 }
   0xf   : > { %s418_s25 = sshll.u32 %s670_s12, 3 }
  0x10   : > { %s202_s28 = scalar_lea.vmem %s661_s0, %s418_s25  ;;  %s216_s6 = scalar_lea.vmem %s664_s3, %s418_s25 }
  0x11   : > { %483 = vmatpush3.bf16.msra.mxu0 %v482_v10  ;;  %v217_v26 = vld [vmem:[%s202_s28] sm:$0xff] }
  0x12   : > { %484 = vmatprep.subr.bf16.mxu0 %v550_v3 }
  0x15   : > { %486 = vmatpush3.bf16.msra.mxu0 %v485_v13 }
  0x16   : > { %487 = vmatprep.subr.bf16.mxu0 %v550_v3 }
  0x19   : > { %489 = vmatpush3.bf16.msra.mxu0 %v488_v16 }
  0x1a   : > { %490 = vmatprep.subr.bf16.mxu0 %v550_v3 }
  0x1d   : > { %492 = vmatpush3.bf16.msra.mxu0 %v491_v19 }
  0x1e   : > { %493 = vmatprep.subr.bf16.mxu0 %v550_v3 }
  0x21   : > { %495 = vmatpush3.bf16.msra.mxu0 %v494_v22 }
  0x22   : > { %496 = vmatprep.subr.bf16.mxu0 %v550_v3 }
  0x25   : > { %498 = vmatpush3.bf16.msra.mxu0 %v497_v25 }
  0x28   : > { %473 = vmatmul.mubr.f32.vlgmr.msra.gmra.mrb[0].mxu0 %v217_v26 }
  0xfb   : > { %v307_v28 = vpop.f32.mrb[0].mxu0 }
  0xfc   : > { %v308_v29 = vadd.f32 %v420_v27, %v307_v28  ;;  %v474_v30 = vpop.f32.mrb[1].mxu0 }
  0xfe   : > { %311 = vst [vmem:[%s216_s6] sm:$0xff] %v308_v29 }
  0xff PF: > { %s13_s14 = sadd.s32 1, %s548_s14   ;;  %s665_s12 = smov %s544_s13 }
 0x100   : > { %p10_p5 = scmp.ge.s32.totalorder %s13_s14, 4   ;;  %s666_s13 = smov %s668_s15 }
 0x102   :  { %12 = sbr.rel (!%p10_p5) target bundleno = 2 (0x2), region = 68 }

// kernel: transformer_decoder_forward.23
= control target key start
LH: loop header
LB: loop body
LE: loop exit
PB: predicated region body
PF: predicated region fallthrough
CT: control target
= control target key end

     0   :  { %s1118_s12 = smov 0   ;;  %s1209_s0 = inlined_call_operand.vmem [shape: f32[2,8,256], index: 0, kind: input, shape index: {}, may-alias: {0,1}]   ;;  %s1210_s1 = inlined_call_operand.vmem [shape: f32[2,8,256], index: 1, kind: input, shape index: {}, may-alias: {0,1}]   ;;  %s1211_s2 = inlined_call_operand.vmem [shape: f32[2,8,128], index: 2, kind: input, shape index: {}]   ;;  %s1212_s3 = inlined_call_operand.vmem [shape: f32[2,8,128], index: 3, kind: output, shape index: {}]  }
   0x1 LB: > { %s972_s13 = sadd.s32 4294967295, %s1091_s12   ;;  %p976_p0 = scmp.ge.s32.totalorder %s1091_s12, 1  ;;  %s1091_s12 = sphi %s1118_s12, %s13_s12  }
   0x2   : > { %p157_p1 = scmp.lt.s32.totalorder %s1091_s12, 3 }
   0x4   : > { %p158_p2 = pnand %p976_p0, %p157_p1 }
   0x5   : > { %p190_p3 = scmp.lt.s32.totalorder (!%p158_p2), %s972_s13, 1  ;;  %v1093_v0 = vmov (!%p158_p2), 0.0   ;;  %vm1094_vm0 = vmmov (!%p158_p2), 0   ;;  %vm213_vm1 = vcmask (!%p158_p2), 261120   ;;  %vm290_vm2 = vcmask (!%p158_p2), 64512   ;;  %s1095_s21 = smov (!%p158_p2), 96  }
   0x6   : > { %161 = sbr.rel (%p158_p2) target bundleno = 1458 (0x5b2), region = 32  ;;  %1016 = vmatprep.subr.mxu0 (!%p158_p2), %v1093_v0  ;;  %1018 = vmatprep.mubr.msk.f32.mxu0 (!%p158_p2), %vm1094_vm0, %v1093_v0  ;;  %s1096_s22 = smov (!%p158_p2), 64   ;;  %vm884_vm3 = vcmask (!%p158_p2), 523264   ;;  %vm886_vm4 = vcmask (!%p158_p2), 785408  }
   0x7   : > { %1021 = vmatprep.subr.mxu1 (!%p158_p2), %v1093_v0  ;;  %1023 = vmatprep.mubr.msk.f32.mxu1 (!%p158_p2), %vm1094_vm0, %v1093_v0  ;;  %s1097_s23 = smov (!%p158_p2), 32  }
   0xd   : > { %s1214_s13 = smov (!%p190_p3, %s972_s13), 1 }
   0xe   : > { %s998_s14 = sshll.u32 %s1214_s13, 4  ;;  %s981_s24 = sshll.u32 %s1214_s13, 3 }
   0xf   : > { %s194_s17 = scalar_lea.vmem %s1209_s0, %s998_s14  ;;  %s930_s20 = scalar_lea.vmem %s1210_s1, %s998_s14 }
  0x10   : > { %v209_v1 = vld [vmem:[%s194_s17] sm:$0xff]  ;;  %v983_v2 = vld [vmem:[%s930_s20 + $0x8] sm:$0xff]  ;;  %s204_s27 = scalar_lea.vmem %s1211_s2, %s981_s24  ;;  %s208_s30 = scalar_lea.vmem %s1212_s3, %s981_s24 }
  0x11   : > { %v210_v3 = vmul.f32 0.17677669, %v209_v1  ;;  %1017 = vmatpush3.xpose.msk.msra.mxu0 %vm213_vm1, %v983_v2  ;;  %377 = vrot.lane.b32.xlu1 %v983_v2, %s1095_s21  ;;  %v212_v12 = vld [vmem:[%s204_s27] sm:$0xff] }
  0x12   : > { %1031 = vmatprep.subr.mxu0 %v1093_v0  ;;  %1022 = vmatpush3.msra.mxu1 %v212_v12 }
  0x13   : > { %1026 = vmatprep.subr.mxu1 %v1093_v0 }
  0x14   : > { %1019 = vmatmul.mubr.msk.f32.vlgmr.msra.gmra.mrb[0].mxu0 %vm213_vm1, %v210_v3 }
  0x15   : > { %1033 = vmatprep.mubr.msk.f32.mxu0 %vm1094_vm0, %v1093_v0  ;;  %375 = vrot.lane.b32.xlu1 %v210_v3, %s1095_s21 }
  0x19   : > { %541 = vrot.lane.b32.xlu1 %v210_v3, %s1096_s22 }
  0x1d   : > { %708 = vrot.lane.b32.xlu1 %v983_v2, %s1097_s23 }
  0x21   : > { %706 = vrot.lane.b32.xlu1 %v210_v3, %s1097_s23 }
  0x83   : > { %v378_v13 = vpop.permute.xlu1 %377 }
  0x87   : > { %v376_v15 = vpop.permute.xlu1 %375 }
  0x8b   : > { %v542_v17 = vpop.permute.xlu1 %541 }
  0x8f   : > { %v709_v20 = vpop.permute.xlu1 %708 }
  0x93   : > { %v707_v21 = vpop.permute.xlu1 %706 }
  0xe7   : > { %v286_v4 = vpop.f32.mrb[0].mxu0 }
  0xe8   : > { %v1020_v5 = vpop.f32.mrb[1].mxu0  ;;  %v291_v6 = vsel %vm290_vm2, %v286_v4, -inf }
  0xe9   : > { %292 = vmax.xlane.f32.xlu0 %v291_v6 }
 0x176   : > { %v293_v7 = vpop.xlane.xlu0 %292 }
 0x177   : > { %v294_v8 = vsub.f32 %v286_v4, %v293_v7 }
 0x179   : > { %v295_v9 = vmul.f32 1.442695, %v294_v8 }
 0x17b   : > { %1069 = vpow2.f32 %v295_v9 }
 0x185   : > { %v1070_v10 = vpop.eup %1069 }
 0x186   : > { %v297_v11 = vsel %vm290_vm2, %v1070_v10, 0.0 }
 0x187   : > { %298 = vadd.xlane.f32.xlu0 %v297_v11 }
 0x19d   : > { %543 = vrot.lane.b32.xlu0 %v983_v2, %s1096_s22 }
 0x214   : > { %v299_v14 = vpop.xlane.xlu0 %298 }
 0x215   : > { %1071 = vrcp.f32 %v299_v14 }
 0x218   : > { %v544_v19 = vpop.permute.xlu0 %543 }
 0x21f   : > { %v1072_v16 = vpop.eup %1071 }
 0x220   : > { %v301_v18 = vmul.f32 %v1072_v16, %v1070_v10 }
 0x222   : > { %1024 = vmatmul.mubr.msk.f32.vlgmr.msra.gmra.mrb[0].mxu1 %vm290_vm2, %v301_v18 }
 0x223   : > { %1027 = vmatpush3.xpose.msk.msra.mxu1 %vm213_vm1, %v378_v13  ;;  %1028 = vmatprep.mubr.msk.f32.mxu1 %vm1094_vm0, %v1093_v0 }
 0x224   : > { %1036 = vmatprep.subr.mxu1 %v1093_v0 }
 0x226   : > { %1029 = vmatmul.mubr.msk.f32.vlgmr.msra.gmra.mrb[2].mxu1 %vm213_vm1, %v376_v15 }
 0x227   : > { %1037 = vmatpush3.xpose.msk.msra.mxu1 %vm213_vm1, %v544_v19  ;;  %1038 = vmatprep.mubr.msk.f32.mxu1 %vm1094_vm0, %v1093_v0 }
 0x228   : > { %1046 = vmatprep.subr.mxu1 %v1093_v0 }
 0x22a   : > { %1039 = vmatmul.mubr.msk.f32.vlgmr.msra.gmra.mrb[4].mxu1 %vm213_vm1, %v542_v17 }
 0x22b   : > { %1047 = vmatpush3.xpose.msk.msra.mxu1 %vm213_vm1, %v709_v20  ;;  %1048 = vmatprep.mubr.msk.f32.mxu1 %vm1094_vm0, %v1093_v0 }
 0x22e   : > { %1049 = vmatmul.mubr.msk.f32.vlgmr.msra.gmra.mrb[6].mxu1 %vm213_vm1, %v707_v21 }
 0x2f5   : > { %v1176_v22 = vpop.f32.mrb[0].mxu1 }
 0x2f6   : > { %v1025_v23 = vpop.f32.mrb[1].mxu1 }
 0x2f9   : > { %v449_v24 = vpop.f32.mrb[2].mxu1 }
 0x2fa   : > { %v1030_v25 = vpop.f32.mrb[3].mxu1  ;;  %v453_v26 = vsel %vm290_vm2, %v449_v24, -inf }
 0x2fb   : > { %454 = vmax.xlane.f32.xlu1 %v453_v26 }
 0x2fd   : > { %v615_v27 = vpop.f32.mrb[4].mxu1 }
 0x2fe   : > { %v619_v28 = vsel %vm290_vm2, %v615_v27, -inf  ;;  %v1040_v29 = vpop.f32.mrb[5].mxu1 }
 0x2ff   : > { %620 = vmax.xlane.f32.xlu0 %v619_v28 }
 0x301   : > { %v780_v30 = vpop.f32.mrb[6].mxu1 }
 0x302   : > { %v784_v31 = vsel %vm290_vm2, %v780_v30, -inf  ;;  %v1050_v32 = vpop.f32.mrb[7].mxu1 }
 0x303   : > { %785 = vmax.xlane.f32.xlu1 %v784_v31 }
 0x388   : > { %v455_v33 = vpop.xlane.xlu1 %454 }
 0x389   : > { %v456_v34 = vsub.f32 %v449_v24, %v455_v33 }
 0x38b   : > { %v457_v35 = vmul.f32 1.442695, %v456_v34 }
 0x38c   : > { %v621_v36 = vpop.xlane.xlu0 %620 }
 0x38d   : > { %1073 = vpow2.f32 %v457_v35  ;;  %v622_v37 = vsub.f32 %v615_v27, %v621_v36 }
 0x38f   : > { %v623_v38 = vmul.f32 1.442695, %v622_v37 }
 0x390   : > { %v786_v43 = vpop.xlane.xlu1 %785 }
 0x391   : > { %1075 = vpow2.f32 %v623_v38  ;;  %v787_v44 = vsub.f32 %v780_v30, %v786_v43 }
 0x393   : > { %v788_v45 = vmul.f32 1.442695, %v787_v44 }
 0x395   : > { %1077 = vpow2.f32 %v788_v45 }
 0x397   : > { %v1074_v39 = vpop.eup %1073 }
 0x398   : > { %v459_v40 = vsel %vm290_vm2, %v1074_v39, 0.0 }
 0x399   : > { %460 = vadd.xlane.f32.xlu1 %v459_v40 }
 0x39b   : > { %v1076_v41 = vpop.eup %1075 }
 0x39c   : > { %v625_v42 = vsel %vm290_vm2, %v1076_v41, 0.0 }
 0x39d   : > { %626 = vadd.xlane.f32.xlu0 %v625_v42 }
 0x39f   : > { %v1078_v46 = vpop.eup %1077 }
 0x3a0   : > { %v790_v47 = vsel %vm290_vm2, %v1078_v46, 0.0 }
 0x3aa   : > { %630 = vrot.lane.b32.xlu1 %v212_v12, %s1096_s22 }
 0x3b3   : > { %465 = vrot.lane.b32.xlu0 %v212_v12, %s1095_s21 }
 0x3ce   : > { %791 = vadd.xlane.f32.xlu1 %v790_v47 }
 0x3df   : > { %795 = vrot.lane.b32.xlu1 %v212_v12, %s1097_s23 }
 0x426   : > { %v461_v48 = vpop.xlane.xlu1 %460 }
 0x427   : > { %1079 = vrcp.f32 %v461_v48 }
 0x42a   : > { %v627_v49 = vpop.xlane.xlu0 %626  ;;  %v631_v53 = vpop.permute.xlu1 %630 }
 0x42b   : > { %1081 = vrcp.f32 %v627_v49 }
 0x42e   : > { %v466_v50 = vpop.permute.xlu0 %465 }
 0x42f   : > { %1032 = vmatpush3.msra.mxu0 %v466_v50 }
 0x430   : > { %1041 = vmatprep.subr.mxu0 %v1093_v0 }
 0x431   : > { %v1080_v51 = vpop.eup %1079 }
 0x432   : > { %v463_v52 = vmul.f32 %v1080_v51, %v1074_v39 }
 0x434   : > { %1034 = vmatmul.mubr.msk.f32.vlgmr.msra.gmra.mrb[2].mxu0 %vm290_vm2, %v463_v52 }
 0x435   : > { %v1082_v54 = vpop.eup %1081  ;;  %1042 = vmatpush3.msra.mxu0 %v631_v53  ;;  %1043 = vmatprep.mubr.msk.f32.mxu0 %vm1094_vm0, %v1093_v0 }
 0x436   : > { %v629_v55 = vmul.f32 %v1082_v54, %v1076_v41  ;;  %1051 = vmatprep.subr.mxu0 %v1093_v0 }
 0x438   : > { %1044 = vmatmul.mubr.msk.f32.vlgmr.msra.gmra.mrb[4].mxu0 %vm290_vm2, %v629_v55 }
 0x439   : > { %1053 = vmatprep.mubr.msk.f32.mxu0 %vm1094_vm0, %v1093_v0 }
 0x45b   : > { %v792_v56 = vpop.xlane.xlu1 %791 }
 0x45c   : > { %1083 = vrcp.f32 %v792_v56 }
 0x45f   : > { %v796_v57 = vpop.permute.xlu1 %795 }
 0x460   : > { %1052 = vmatpush3.msra.mxu0 %v796_v57 }
 0x466   : > { %v1084_v58 = vpop.eup %1083 }
 0x467   : > { %v794_v59 = vmul.f32 %v1084_v58, %v1078_v46 }
 0x469   : > { %1054 = vmatmul.mubr.msk.f32.vlgmr.msra.gmra.mrb[6].mxu0 %vm290_vm2, %v794_v59 }
 0x507   : > { %v537_v60 = vpop.f32.mrb[2].mxu0 }
 0x508   : > { %872 = vrot.lane.b32.xlu0 %v537_v60, %s1097_s23  ;;  %v1035_v61 = vpop.f32.mrb[3].mxu0 }
 0x50b   : > { %v702_v62 = vpop.f32.mrb[4].mxu0 }
 0x50c   : > { %876 = vrot.lane.b32.xlu1 %v702_v62, %s1096_s22  ;;  %v1045_v63 = vpop.f32.mrb[5].mxu0 }
 0x53c   : > { %v867_v1 = vpop.f32.mrb[6].mxu0 }
 0x53d   : > { %880 = vrot.lane.b32.xlu0 %v867_v1, %s1095_s21  ;;  %v1055_v0 = vpop.f32.mrb[7].mxu0 }
 0x57a   : > { %v873_v2 = vpop.permute.xlu0 %872 }
 0x57b   : > { %v883_v4 = vsel %vm213_vm1, %v1176_v22, %v873_v2 }
 0x57e   : > { %v877_v3 = vpop.permute.xlu1 %876 }
 0x57f   : > { %v885_v5 = vsel %vm884_vm3, %v883_v4, %v877_v3 }
 0x5af   : > { %v881_v6 = vpop.permute.xlu0 %880 }
 0x5b0   : > { %v887_v7 = vsel %vm886_vm4, %v885_v5, %v881_v6 }
 0x5b1   : > { %888 = vst [vmem:[%s208_s30] sm:$0xff] %v887_v7 }
 0x5b2 PF: > { %s13_s12 = sadd.s32 1, %s1091_s12  }
 0x5b3   : > { %p10_p4 = scmp.ge.s32.totalorder %s13_s12, 4  }
 0x5b5   :  { %12 = sbr.rel (!%p10_p4) target bundleno = 1 (0x1), region = 68 }

// kernel: transformer_decoder_forward.24
= control target key start
LH: loop header
LB: loop body
LE: loop exit
PB: predicated region body
PF: predicated region fallthrough
CT: control target
= control target key end

     0   :  { %s602_s21 = smov 0   ;;  %s688_s0 = inlined_call_operand.vmem [shape: f32[16,128], index: 0, kind: input, shape index: {}]   ;;  %s689_s1 = inlined_call_operand.vmem [shape: f32[128,128], index: 1, kind: input, shape index: {}]   ;;  %s690_s2 = inlined_call_operand.vmem [shape: f32[1,128], index: 2, kind: input, shape index: {}]   ;;  %s691_s3 = inlined_call_operand.vmem [shape: f32[16,128], index: 3, kind: input, shape index: {}]   ;;  %s692_s4 = inlined_call_operand.vmem [shape: f32[1,128], index: 4, kind: input, shape index: {}]   ;;  %s693_s5 = inlined_call_operand.vmem [shape: f32[1,128], index: 5, kind: input, shape index: {}]   ;;  %s694_s6 = inlined_call_operand.vmem [shape: f32[16,128], index: 6, kind: output, shape index: {}]  }
   0x1 LB: > { %s454_s22 = sadd.s32 4294967295, %s562_s21   ;;  %p458_p0 = scmp.ge.s32.totalorder %s562_s21, 1  ;;  %s562_s21 = sphi %s602_s21, %s16_s21  }
   0x2   : > { %p220_p1 = scmp.lt.s32.totalorder %s562_s21, 3 }
   0x4   : > { %p221_p2 = pnand %p458_p0, %p220_p1 }
   0x5   : > { %v265_v0 = vld [vmem:[%s689_s1] sm:$0xff] (!%p221_p2)  ;;  %v266_v1 = vld [vmem:[%s689_s1 + $0x8] sm:$0xff] (!%p221_p2)  ;;  %v267_v2 = vld [vmem:[%s689_s1 + $0x10] sm:$0xff] (!%p221_p2)  ;;  %v564_v3 = vmov (!%p221_p2), 0.0|0.0   ;;  %vm565_vm0 = vmmov (!%p221_p2), 0   ;;  %v566_v6 = vmov (!%p221_p2), 0.0  }
   0x6   : > { %224 = sbr.rel (%p221_p2) target bundleno = 567 (0x237), region = 44  ;;  %519 = vmatprep.subr.bf16.mxu0 (!%p221_p2), %v564_v3  ;;  %v520_v4 = vpack.c.bf16 (!%p221_p2), %v266_v1, %v265_v0  ;;  %v268_v5 = vld [vmem:[%s689_s1 + $0x18] sm:$0xff] (!%p221_p2)  ;;  %516 = vmatprep.mubr.msk.f32.mxu0 (!%p221_p2), %vm565_vm0, %v566_v6  ;;  %v269_v8 = vld [vmem:[%s689_s1 + $0x20] sm:$0xff] (!%p221_p2)  ;;  %v270_v9 = vld [vmem:[%s689_s1 + $0x28] sm:$0xff] (!%p221_p2)  ;;  %p252_p3 = scmp.lt.s32.totalorder (!%p221_p2), %s454_s22, 1 }
   0x7   : > { %v523_v7 = vpack.c.bf16 (!%p221_p2), %v268_v5, %v267_v2  ;;  %v526_v10 = vpack.c.bf16 (!%p221_p2), %v270_v9, %v269_v8  ;;  %v271_v11 = vld [vmem:[%s689_s1 + $0x30] sm:$0xff] (!%p221_p2)  ;;  %v272_v12 = vld [vmem:[%s689_s1 + $0x38] sm:$0xff] (!%p221_p2)  ;;  %v273_v14 = vld [vmem:[%s689_s1 + $0x40] sm:$0xff] (!%p221_p2) }
   0x8   : > { %521 = vmatpush3.bf16.msra.mxu0 (!%p221_p2), %v520_v4  ;;  %v529_v13 = vpack.c.bf16 (!%p221_p2), %v272_v12, %v271_v11  ;;  %v274_v15 = vld [vmem:[%s689_s1 + $0x48] sm:$0xff] (!%p221_p2)  ;;  %v275_v17 = vld [vmem:[%s689_s1 + $0x50] sm:$0xff] (!%p221_p2)  ;;  %v276_v18 = vld [vmem:[%s689_s1 + $0x58] sm:$0xff] (!%p221_p2) }
   0x9   : > { %522 = vmatprep.subr.bf16.mxu0 (!%p221_p2), %v564_v3  ;;  %v532_v16 = vpack.c.bf16 (!%p221_p2), %v274_v15, %v273_v14  ;;  %v535_v19 = vpack.c.bf16 (!%p221_p2), %v276_v18, %v275_v17  ;;  %v277_v20 = vld [vmem:[%s689_s1 + $0x60] sm:$0xff] (!%p221_p2)  ;;  %v278_v21 = vld [vmem:[%s689_s1 + $0x68] sm:$0xff] (!%p221_p2)  ;;  %v279_v23 = vld [vmem:[%s689_s1 + $0x70] sm:$0xff] (!%p221_p2) }
   0xa   : > { %v538_v22 = vpack.c.bf16 (!%p221_p2), %v278_v21, %v277_v20  ;;  %v280_v24 = vld [vmem:[%s689_s1 + $0x78] sm:$0xff] (!%p221_p2)  ;;  %v462_v27 = vld [vmem:[%s690_s2] ss:$0 sm:$0xff] (!%p221_p2) }
   0xb   : > { %v541_v25 = vpack.c.bf16 (!%p221_p2), %v280_v24, %v279_v23  ;;  %v463_v41 = vld [vmem:[%s692_s4] ss:$0 sm:$0xff] (!%p221_p2) }
   0xc   : > { %524 = vmatpush3.bf16.msra.mxu0 (!%p221_p2), %v523_v7  ;;  %v464_v43 = vld [vmem:[%s693_s5] ss:$0 sm:$0xff] (!%p221_p2) }
   0xd   : > { %525 = vmatprep.subr.bf16.mxu0 %v564_v3  ;;  %s696_s22 = smov (!%p252_p3, %s454_s22), 1 }
   0xe   : > { %s662_s9 = sshll.u32 %s696_s22, 3 }
   0xf   : > { %s255_s12 = scalar_lea.vmem %s688_s0, %s662_s9  ;;  %s259_s15 = scalar_lea.vmem %s691_s3, %s662_s9 }
  0x10   : > { %527 = vmatpush3.bf16.msra.mxu0 %v526_v10  ;;  %v264_v26 = vld [vmem:[%s255_s12] sm:$0xff]  ;;  %s263_s25 = scalar_lea.vmem %s694_s6, %s662_s9 }
  0x11   : > { %528 = vmatprep.subr.bf16.mxu0 %v564_v3  ;;  %v358_v29 = vld [vmem:[%s259_s15] sm:$0xff] }
  0x14   : > { %530 = vmatpush3.bf16.msra.mxu0 %v529_v13 }
  0x15   : > { %531 = vmatprep.subr.bf16.mxu0 %v564_v3 }
  0x18   : > { %533 = vmatpush3.bf16.msra.mxu0 %v532_v16 }
  0x19   : > { %534 = vmatprep.subr.bf16.mxu0 %v564_v3 }
  0x1c   : > { %536 = vmatpush3.bf16.msra.mxu0 %v535_v19 }
  0x1d   : > { %537 = vmatprep.subr.bf16.mxu0 %v564_v3 }
  0x20   : > { %539 = vmatpush3.bf16.msra.mxu0 %v538_v22 }
  0x21   : > { %540 = vmatprep.subr.bf16.mxu0 %v564_v3 }
  0x24   : > { %542 = vmatpush3.bf16.msra.mxu0 %v541_v25 }
  0x27   : > { %517 = vmatmul.mubr.f32.vlgmr.msra.gmra.mrb[0].mxu0 %v264_v26 }
  0xfa   : > { %v354_v28 = vpop.f32.mrb[0].mxu0 }
  0xfb   : > { %v355_v30 = vadd.f32 %v462_v27, %v354_v28  ;;  %v518_v31 = vpop.f32.mrb[1].mxu0 }
  0xfd   : > { %v359_v32 = vadd.f32 %v358_v29, %v355_v30 }
  0xff   : > { %360 = vadd.xlane.f32.xlu0 %v359_v32 }
 0x18c   : > { %v361_v33 = vpop.xlane.xlu0 %360 }
 0x18d   : > { %v363_v34 = vmul.f32 0.0078125, %v361_v33 }
 0x18f   : > { %v364_v35 = vsub.f32 %v359_v32, %v363_v34 }
 0x191   : > { %v365_v36 = vmul.f32 %v364_v35, %v364_v35 }
 0x193   : > { %366 = vadd.xlane.f32.xlu0 %v365_v36 }
 0x220   : > { %v367_v37 = vpop.xlane.xlu0 %366 }
 0x221   : > { %v368_v38 = vmul.f32 0.0078125, %v367_v37 }
 0x223   : > { %v369_v39 = vadd.f32 1e-05, %v368_v38 }
 0x225   : > { %554 = vrsqrt.f32 %v369_v39 }
 0x22f   : > { %v555_v40 = vpop.eup %554 }
 0x230   : > { %v371_v42 = vmul.f32 %v555_v40, %v364_v35 }
 0x232   : > { %v379_v44 = vmul.f32 %v463_v41, %v371_v42 }
 0x234   : > { %v387_v45 = vadd.f32 %v464_v43, %v379_v44 }
 0x236   : > { %388 = vst [vmem:[%s263_s25] sm:$0xff] %v387_v45 }
 0x237 PF: > { %s16_s21 = sadd.s32 1, %s562_s21  }
 0x238   : > { %p13_p4 = scmp.ge.s32.totalorder %s16_s21, 4  }
 0x23a   :  { %15 = sbr.rel (!%p13_p4) target bundleno = 1 (0x1), region = 77 }

// kernel: transformer_decoder_forward.25
= control target key start
LH: loop header
LB: loop body
LE: loop exit
PB: predicated region body
PF: predicated region fallthrough
CT: control target
= control target key end

     0   :  { %s637_s15 = smov 0   ;;  %s639_s16 = smov 0   ;;  %s728_s0 = inlined_call_operand.vmem [shape: f32[16,128], index: 0, kind: input, shape index: {}]   ;;  %s729_s1 = inlined_call_operand.vmem [shape: f32[16,128], index: 1, kind: input, shape index: {}]   ;;  %s730_s2 = inlined_call_operand.vmem [shape: f32[128,128], index: 2, kind: input, shape index: {}]   ;;  %s731_s3 = inlined_call_operand.vmem [shape: f32[1,128], index: 3, kind: input, shape index: {}]   ;;  %s732_s4 = inlined_call_operand.vmem [shape: f32[16,128], index: 4, kind: output, shape index: {}]  }
   0x1   :  { %s641_s17 = smov 0  }
   0x2 LB: > { %s26_s18 = sadd.s32 1, %s603_s16  ;;  %p475_p0 = scmp.ge.s32.totalorder %s607_s17, 1  ;;  %s607_s17 = sphi %s641_s17, %s14_s17   ;;  %s603_s16 = sphi %s639_s16, %s734_s16   ;;  %s599_s15 = sphi %s637_s15, %s733_s15  }
   0x3   : > { %p28_p1 = scmp.ge.s32.totalorder %s26_s18, 2  ;;  %p201_p2 = scmp.lt.s32.totalorder %s607_s17, 3 }
   0x5   : > { %s736_s18 = smov (%p28_p1, %s26_s18), 0  ;;  %p202_p3 = pnand %p475_p0, %p201_p2 }
   0x6   : > { %v264_v0 = vld [vmem:[%s730_s2] sm:$0xff] (!%p202_p3)  ;;  %v265_v1 = vld [vmem:[%s730_s2 + $0x8] sm:$0xff] (!%p202_p3)  ;;  %v266_v2 = vld [vmem:[%s730_s2 + $0x10] sm:$0xff] (!%p202_p3)  ;;  %v609_v3 = vmov (!%p202_p3), 0.0|0.0   ;;  %vm610_vm0 = vmmov (!%p202_p3), 0   ;;  %v611_v6 = vmov (!%p202_p3), 0.0  }
   0x7   : > { %205 = sbr.rel (%p202_p3) target bundleno = 255 (0xff), region = 36  ;;  %534 = vmatprep.subr.bf16.mxu0 (!%p202_p3), %v609_v3  ;;  %v535_v4 = vpack.c.bf16 (!%p202_p3), %v265_v1, %v264_v0  ;;  %v267_v5 = vld [vmem:[%s730_s2 + $0x18] sm:$0xff] (!%p202_p3)  ;;  %531 = vmatprep.mubr.msk.f32.mxu0 (!%p202_p3), %vm610_vm0, %v611_v6  ;;  %v268_v8 = vld [vmem:[%s730_s2 + $0x20] sm:$0xff] (!%p202_p3)  ;;  %v269_v9 = vld [vmem:[%s730_s2 + $0x28] sm:$0xff] (!%p202_p3)  ;;  %p239_p4 = scmp.lt.s32.totalorder (!%p202_p3), %s599_s15, 1 }
   0x8   : > { %v538_v7 = vpack.c.bf16 (!%p202_p3), %v267_v5, %v266_v2  ;;  %v541_v10 = vpack.c.bf16 (!%p202_p3), %v269_v9, %v268_v8  ;;  %v270_v11 = vld [vmem:[%s730_s2 + $0x30] sm:$0xff] (!%p202_p3)  ;;  %v271_v12 = vld [vmem:[%s730_s2 + $0x38] sm:$0xff] (!%p202_p3)  ;;  %v272_v14 = vld [vmem:[%s730_s2 + $0x40] sm:$0xff] (!%p202_p3) }
   0x9   : > { %536 = vmatpush3.bf16.msra.mxu0 (!%p202_p3), %v535_v4  ;;  %v544_v13 = vpack.c.bf16 (!%p202_p3), %v271_v12, %v270_v11  ;;  %v273_v15 = vld [vmem:[%s730_s2 + $0x48] sm:$0xff] (!%p202_p3)  ;;  %v274_v17 = vld [vmem:[%s730_s2 + $0x50] sm:$0xff] (!%p202_p3)  ;;  %v275_v18 = vld [vmem:[%s730_s2 + $0x58] sm:$0xff] (!%p202_p3) }
   0xa   : > { %537 = vmatprep.subr.bf16.mxu0 (!%p202_p3), %v609_v3  ;;  %v547_v16 = vpack.c.bf16 (!%p202_p3), %v273_v15, %v272_v14  ;;  %v550_v19 = vpack.c.bf16 (!%p202_p3), %v275_v18, %v274_v17  ;;  %v276_v20 = vld [vmem:[%s730_s2 + $0x60] sm:$0xff] (!%p202_p3)  ;;  %v277_v21 = vld [vmem:[%s730_s2 + $0x68] sm:$0xff] (!%p202_p3)  ;;  %v278_v23 = vld [vmem:[%s730_s2 + $0x70] sm:$0xff] (!%p202_p3) }
   0xb   : > { %v553_v22 = vpack.c.bf16 (!%p202_p3), %v277_v21, %v276_v20  ;;  %v279_v24 = vld [vmem:[%s730_s2 + $0x78] sm:$0xff] (!%p202_p3)  ;;  %v479_v29 = vld [vmem:[%s731_s3] ss:$0 sm:$0xff] (!%p202_p3) }
   0xc   : > { %v556_v25 = vpack.c.bf16 (!%p202_p3), %v279_v24, %v278_v23 }
   0xd   : > { %539 = vmatpush3.bf16.msra.mxu0 (!%p202_p3), %v538_v7 }
   0xe   : > { %540 = vmatprep.subr.bf16.mxu0 %v609_v3  ;;  %s738_s15 = smov (!%p239_p4, %s599_s15), 1 }
   0xf   : > { %s476_s25 = sshll.u32 %s738_s15, 3 }
  0x10   : > { %s242_s6 = scalar_lea.vmem %s728_s0, %s476_s25  ;;  %s246_s9 = scalar_lea.vmem %s729_s1, %s476_s25 }
  0x11   : > { %542 = vmatpush3.bf16.msra.mxu0 %v541_v10  ;;  %v261_v26 = vld [vmem:[%s242_s6] sm:$0xff]  ;;  %s260_s13 = scalar_lea.vmem %s732_s4, %s476_s25 }
  0x12   : > { %543 = vmatprep.subr.bf16.mxu0 %v609_v3  ;;  %v262_v27 = vld [vmem:[%s246_s9] sm:$0xff] }
  0x13   : > { %v263_v28 = vadd.f32 %v262_v27, %v261_v26 }
  0x15   : > { %545 = vmatpush3.bf16.msra.mxu0 %v544_v13 }
  0x16   : > { %546 = vmatprep.subr.bf16.mxu0 %v609_v3 }
  0x19   : > { %548 = vmatpush3.bf16.msra.mxu0 %v547_v16 }
  0x1a   : > { %549 = vmatprep.subr.bf16.mxu0 %v609_v3 }
  0x1d   : > { %551 = vmatpush3.bf16.msra.mxu0 %v550_v19 }
  0x1e   : > { %552 = vmatprep.subr.bf16.mxu0 %v609_v3 }
  0x21   : > { %554 = vmatpush3.bf16.msra.mxu0 %v553_v22 }
  0x22   : > { %555 = vmatprep.subr.bf16.mxu0 %v609_v3 }
  0x25   : > { %557 = vmatpush3.bf16.msra.mxu0 %v556_v25 }
  0x28   : > { %532 = vmatmul.mubr.f32.vlgmr.msra.gmra.mrb[0].mxu0 %v263_v28 }
  0xfb   : > { %v353_v30 = vpop.f32.mrb[0].mxu0 }
  0xfc   : > { %v354_v31 = vadd.f32 %v479_v29, %v353_v30  ;;  %v533_v32 = vpop.f32.mrb[1].mxu0 }
  0xfe   : > { %357 = vst [vmem:[%s260_s13] sm:$0xff] %v354_v31 }
  0xff PF: > { %s14_s17 = sadd.s32 1, %s607_s17   ;;  %s733_s15 = smov %s603_s16 }
 0x100   : > { %p11_p5 = scmp.ge.s32.totalorder %s14_s17, 4   ;;  %s734_s16 = smov %s736_s18 }
 0x102   :  { %13 = sbr.rel (!%p11_p5) target bundleno = 2 (0x2), region = 75 }

// kernel: transformer_decoder_forward.27
= control target key start
LH: loop header
LB: loop body
LE: loop exit
PB: predicated region body
PF: predicated region fallthrough
CT: control target
= control target key end

     0   :  { %s596_s12 = smov 0   ;;  %s598_s13 = smov 0   ;;  %s687_s0 = inlined_call_operand.vmem [shape: f32[32,128], index: 0, kind: input, shape index: {}]   ;;  %s688_s1 = inlined_call_operand.vmem [shape: f32[128,128], index: 1, kind: input, shape index: {}]   ;;  %s689_s2 = inlined_call_operand.vmem [shape: f32[1,128], index: 2, kind: input, shape index: {}]   ;;  %s690_s3 = inlined_call_operand.vmem [shape: f32[32,128], index: 3, kind: output, shape index: {}]  }
   0x1   :  { %s600_s14 = smov 0  }
   0x2 LB: > { %s25_s15 = sadd.s32 1, %s570_s13  ;;  %p435_p0 = scmp.ge.s32.totalorder %s574_s14, 1  ;;  %s574_s14 = sphi %s600_s14, %s13_s14   ;;  %s570_s13 = sphi %s598_s13, %s692_s13   ;;  %s566_s12 = sphi %s596_s12, %s691_s12  }
   0x3   : > { %p27_p1 = scmp.ge.s32.totalorder %s25_s15, 2  ;;  %p169_p2 = scmp.lt.s32.totalorder %s574_s14, 3 }
   0x5   : > { %s694_s15 = smov (%p27_p1, %s25_s15), 0  ;;  %p170_p3 = pnand %p435_p0, %p169_p2 }
   0x6   : > { %v227_v0 = vld [vmem:[%s688_s1] sm:$0xff] (!%p170_p3)  ;;  %v228_v1 = vld [vmem:[%s688_s1 + $0x8] sm:$0xff] (!%p170_p3)  ;;  %v229_v2 = vld [vmem:[%s688_s1 + $0x10] sm:$0xff] (!%p170_p3)  ;;  %s436_s22 = sshll.u32 (!%p170_p3), %s566_s12, 1 }
   0x7   : > { %173 = sbr.rel (%p170_p3) target bundleno = 257 (0x101), region = 32  ;;  %v496_v3 = vpack.c.bf16 (!%p170_p3), %v228_v1, %v227_v0  ;;  %v230_v4 = vld [vmem:[%s688_s1 + $0x18] sm:$0xff] (!%p170_p3)  ;;  %p204_p4 = scmp.lt.s32.totalorder (!%p170_p3), %s436_s22, 3  ;;  %v231_v6 = vld [vmem:[%s688_s1 + $0x20] sm:$0xff] (!%p170_p3)  ;;  %v232_v7 = vld [vmem:[%s688_s1 + $0x28] sm:$0xff] (!%p170_p3) }
   0x8   : > { %v500_v5 = vpack.c.bf16 (!%p170_p3), %v230_v4, %v229_v2  ;;  %v504_v8 = vpack.c.bf16 (!%p170_p3), %v232_v7, %v231_v6  ;;  %v233_v9 = vld [vmem:[%s688_s1 + $0x30] sm:$0xff] (!%p170_p3)  ;;  %v234_v10 = vld [vmem:[%s688_s1 + $0x38] sm:$0xff] (!%p170_p3)  ;;  %v235_v13 = vld [vmem:[%s688_s1 + $0x40] sm:$0xff] (!%p170_p3) }
   0x9   : > { %497 = vmatprep.subr.bf16.mxu0 (!%p170_p3), %v496_v3  ;;  %v508_v12 = vpack.c.bf16 (!%p170_p3), %v234_v10, %v233_v9  ;;  %v236_v14 = vld [vmem:[%s688_s1 + $0x48] sm:$0xff] (!%p170_p3)  ;;  %v237_v16 = vld [vmem:[%s688_s1 + $0x50] sm:$0xff] (!%p170_p3)  ;;  %v238_v17 = vld [vmem:[%s688_s1 + $0x58] sm:$0xff] (!%p170_p3) }
   0xa   : > { %499 = vmatpush3.bf16.msra.mxu0 (!%p170_p3), %v496_v3  ;;  %v512_v15 = vpack.c.bf16 (!%p170_p3), %v236_v14, %v235_v13  ;;  %v516_v18 = vpack.c.bf16 (!%p170_p3), %v238_v17, %v237_v16  ;;  %v239_v19 = vld [vmem:[%s688_s1 + $0x60] sm:$0xff] (!%p170_p3)  ;;  %v240_v20 = vld [vmem:[%s688_s1 + $0x68] sm:$0xff] (!%p170_p3)  ;;  %v241_v22 = vld [vmem:[%s688_s1 + $0x70] sm:$0xff] (!%p170_p3) }
   0xb   : > { %501 = vmatprep.subr.bf16.mxu0 (!%p170_p3), %v500_v5  ;;  %v520_v21 = vpack.c.bf16 (!%p170_p3), %v240_v20, %v239_v19  ;;  %v242_v23 = vld [vmem:[%s688_s1 + $0x78] sm:$0xff] (!%p170_p3)  ;;  %v440_v26 = vld [vmem:[%s689_s2] ss:$0 sm:$0xff] (!%p170_p3) }
   0xc   : > { %v524_v24 = vpack.c.bf16 (!%p170_p3), %v242_v23, %v241_v22 }
   0xe   : > { %s696_s22 = smov (!%p204_p4, %s436_s22), 3  ;;  %503 = vmatpush3.bf16.msra.mxu0 %v500_v5 }
   0xf   : > { %s437_s29 = sshll.u32 %s696_s22, 3  ;;  %505 = vmatprep.subr.bf16.mxu0 %v504_v8 }
  0x10   : > { %s207_s9 = scalar_lea.vmem %s687_s0, %s437_s29  ;;  %s223_s8 = scalar_lea.vmem %s690_s3, %s437_s29 }
  0x11   : > { %v225_v11 = vld [vmem:[%s207_s9] sm:$0xff]  ;;  %v226_v25 = vld [vmem:[%s207_s9 + $0x8] sm:$0xff] }
  0x12   : > { %493 = vmatprep.mubr.f32.mxu0 %v225_v11  ;;  %507 = vmatpush3.bf16.msra.mxu0 %v504_v8 }
  0x13   : > { %509 = vmatprep.subr.bf16.mxu0 %v508_v12 }
  0x16   : > { %511 = vmatpush3.bf16.msra.mxu0 %v508_v12 }
  0x17   : > { %513 = vmatprep.subr.bf16.mxu0 %v512_v15 }
  0x1a   : > { %515 = vmatpush3.bf16.msra.mxu0 %v512_v15 }
  0x1b   : > { %517 = vmatprep.subr.bf16.mxu0 %v516_v18 }
  0x1e   : > { %519 = vmatpush3.bf16.msra.mxu0 %v516_v18 }
  0x1f   : > { %521 = vmatprep.subr.bf16.mxu0 %v520_v21 }
  0x22   : > { %523 = vmatpush3.bf16.msra.mxu0 %v520_v21 }
  0x23   : > { %525 = vmatprep.subr.bf16.mxu0 %v524_v24 }
  0x26   : > { %527 = vmatpush3.bf16.msra.mxu0 %v524_v24 }
  0x29   : > { %494 = vmatmul.mubr.f32.vlgmr.msra.gmra.mrb[0].mxu0 %v226_v25 }
  0xfc   : > { %v495_v27 = vpop.f32.mrb[0].mxu0 }
  0xfd   : > { %v316_v28 = vpop.f32.mrb[1].mxu0  ;;  %v322_v30 = vadd.f32 %v495_v27, %v440_v26 }
  0xfe   : > { %v317_v29 = vadd.f32 %v440_v26, %v316_v28 }
  0xff   : > { %326 = vst [vmem:[%s223_s8 + $0x8] sm:$0xff] %v322_v30 }
 0x100   : > { %325 = vst [vmem:[%s223_s8] sm:$0xff] %v317_v29 }
 0x101 PF: > { %s13_s14 = sadd.s32 1, %s574_s14   ;;  %s691_s12 = smov %s570_s13 }
 0x102   : > { %p10_p5 = scmp.ge.s32.totalorder %s13_s14, 4   ;;  %s692_s13 = smov %s694_s15 }
 0x104   :  { %12 = sbr.rel (!%p10_p5) target bundleno = 2 (0x2), region = 68 }

// kernel: transformer_decoder_forward.26
= control target key start
LH: loop header
LB: loop body
LE: loop exit
PB: predicated region body
PF: predicated region fallthrough
CT: control target
= control target key end

     0   :  { %s668_s15 = smov 0   ;;  %s670_s16 = smov 0   ;;  %s760_s0 = inlined_call_operand.vmem [shape: f32[32,128], index: 0, kind: input, shape index: {}]   ;;  %s761_s1 = inlined_call_operand.vmem [shape: f32[32,128], index: 1, kind: input, shape index: {}]   ;;  %s762_s2 = inlined_call_operand.vmem [shape: f32[128,128], index: 2, kind: input, shape index: {}]   ;;  %s763_s3 = inlined_call_operand.vmem [shape: f32[1,128], index: 3, kind: input, shape index: {}]   ;;  %s764_s4 = inlined_call_operand.vmem [shape: f32[32,128], index: 4, kind: output, shape index: {}]  }
   0x1   :  { %s672_s17 = smov 0  }
   0x2 LB: > { %s26_s18 = sadd.s32 1, %s637_s16  ;;  %p500_p0 = scmp.ge.s32.totalorder %s641_s17, 1  ;;  %s641_s17 = sphi %s672_s17, %s14_s17   ;;  %s637_s16 = sphi %s670_s16, %s766_s16   ;;  %s633_s15 = sphi %s668_s15, %s765_s15  }
   0x3   : > { %p28_p1 = scmp.ge.s32.totalorder %s26_s18, 2  ;;  %p205_p2 = scmp.lt.s32.totalorder %s641_s17, 3 }
   0x5   : > { %s768_s18 = smov (%p28_p1, %s26_s18), 0  ;;  %p206_p3 = pnand %p500_p0, %p205_p2 }
   0x6   : > { %v280_v0 = vld [vmem:[%s762_s2] sm:$0xff] (!%p206_p3)  ;;  %v281_v1 = vld [vmem:[%s762_s2 + $0x8] sm:$0xff] (!%p206_p3)  ;;  %v282_v2 = vld [vmem:[%s762_s2 + $0x10] sm:$0xff] (!%p206_p3)  ;;  %s501_s25 = sshll.u32 (!%p206_p3), %s633_s15, 1 }
   0x7   : > { %209 = sbr.rel (%p206_p3) target bundleno = 257 (0x101), region = 36  ;;  %v563_v3 = vpack.c.bf16 (!%p206_p3), %v281_v1, %v280_v0  ;;  %v283_v4 = vld [vmem:[%s762_s2 + $0x18] sm:$0xff] (!%p206_p3)  ;;  %p247_p4 = scmp.lt.s32.totalorder (!%p206_p3), %s501_s25, 3  ;;  %v284_v6 = vld [vmem:[%s762_s2 + $0x20] sm:$0xff] (!%p206_p3)  ;;  %v285_v7 = vld [vmem:[%s762_s2 + $0x28] sm:$0xff] (!%p206_p3) }
   0x8   : > { %v567_v5 = vpack.c.bf16 (!%p206_p3), %v283_v4, %v282_v2  ;;  %v571_v8 = vpack.c.bf16 (!%p206_p3), %v285_v7, %v284_v6  ;;  %v286_v9 = vld [vmem:[%s762_s2 + $0x30] sm:$0xff] (!%p206_p3)  ;;  %v287_v10 = vld [vmem:[%s762_s2 + $0x38] sm:$0xff] (!%p206_p3)  ;;  %v288_v15 = vld [vmem:[%s762_s2 + $0x40] sm:$0xff] (!%p206_p3) }
   0x9   : > { %564 = vmatprep.subr.bf16.mxu0 (!%p206_p3), %v563_v3  ;;  %v575_v14 = vpack.c.bf16 (!%p206_p3), %v287_v10, %v286_v9  ;;  %v289_v16 = vld [vmem:[%s762_s2 + $0x48] sm:$0xff] (!%p206_p3)  ;;  %v290_v18 = vld [vmem:[%s762_s2 + $0x50] sm:$0xff] (!%p206_p3)  ;;  %v291_v19 = vld [vmem:[%s762_s2 + $0x58] sm:$0xff] (!%p206_p3) }
   0xa   : > { %566 = vmatpush3.bf16.msra.mxu0 (!%p206_p3), %v563_v3  ;;  %v579_v17 = vpack.c.bf16 (!%p206_p3), %v289_v16, %v288_v15  ;;  %v583_v20 = vpack.c.bf16 (!%p206_p3), %v291_v19, %v290_v18  ;;  %v292_v21 = vld [vmem:[%s762_s2 + $0x60] sm:$0xff] (!%p206_p3)  ;;  %v293_v22 = vld [vmem:[%s762_s2 + $0x68] sm:$0xff] (!%p206_p3)  ;;  %v294_v24 = vld [vmem:[%s762_s2 + $0x70] sm:$0xff] (!%p206_p3) }
   0xb   : > { %568 = vmatprep.subr.bf16.mxu0 (!%p206_p3), %v567_v5  ;;  %v587_v23 = vpack.c.bf16 (!%p206_p3), %v293_v22, %v292_v21  ;;  %v295_v25 = vld [vmem:[%s762_s2 + $0x78] sm:$0xff] (!%p206_p3)  ;;  %v507_v30 = vld [vmem:[%s763_s3] ss:$0 sm:$0xff] (!%p206_p3) }
   0xc   : > { %v591_v26 = vpack.c.bf16 (!%p206_p3), %v295_v25, %v294_v24 }
   0xe   : > { %s770_s25 = smov (!%p247_p4, %s501_s25), 3  ;;  %570 = vmatpush3.bf16.msra.mxu0 %v567_v5 }
   0xf   : > { %s704_s6 = sshll.u32 %s770_s25, 3  ;;  %572 = vmatprep.subr.bf16.mxu0 %v571_v8 }
  0x10   : > { %s250_s13 = scalar_lea.vmem %s760_s0, %s704_s6  ;;  %s256_s19 = scalar_lea.vmem %s761_s1, %s704_s6 }
  0x11   : > { %v274_v11 = vld [vmem:[%s250_s13] sm:$0xff]  ;;  %v275_v27 = vld [vmem:[%s250_s13 + $0x8] sm:$0xff]  ;;  %s272_s20 = scalar_lea.vmem %s764_s4, %s704_s6 }
  0x12   : > { %v276_v12 = vld [vmem:[%s256_s19] sm:$0xff]  ;;  %574 = vmatpush3.bf16.msra.mxu0 %v571_v8  ;;  %v277_v28 = vld [vmem:[%s256_s19 + $0x8] sm:$0xff] }
  0x13   : > { %v278_v13 = vadd.f32 %v276_v12, %v274_v11  ;;  %576 = vmatprep.subr.bf16.mxu0 %v575_v14  ;;  %v279_v29 = vadd.f32 %v277_v28, %v275_v27 }
  0x15   : > { %560 = vmatprep.mubr.f32.mxu0 %v278_v13 }
  0x16   : > { %578 = vmatpush3.bf16.msra.mxu0 %v575_v14 }
  0x17   : > { %580 = vmatprep.subr.bf16.mxu0 %v579_v17 }
  0x1a   : > { %582 = vmatpush3.bf16.msra.mxu0 %v579_v17 }
  0x1b   : > { %584 = vmatprep.subr.bf16.mxu0 %v583_v20 }
  0x1e   : > { %586 = vmatpush3.bf16.msra.mxu0 %v583_v20 }
  0x1f   : > { %588 = vmatprep.subr.bf16.mxu0 %v587_v23 }
  0x22   : > { %590 = vmatpush3.bf16.msra.mxu0 %v587_v23 }
  0x23   : > { %592 = vmatprep.subr.bf16.mxu0 %v591_v26 }
  0x26   : > { %594 = vmatpush3.bf16.msra.mxu0 %v591_v26 }
  0x29   : > { %561 = vmatmul.mubr.f32.vlgmr.msra.gmra.mrb[0].mxu0 %v279_v29 }
  0xfc   : > { %v562_v31 = vpop.f32.mrb[0].mxu0 }
  0xfd   : > { %v369_v32 = vpop.f32.mrb[1].mxu0  ;;  %v375_v34 = vadd.f32 %v562_v31, %v507_v30 }
  0xfe   : > { %v370_v33 = vadd.f32 %v507_v30, %v369_v32 }
  0xff   : > { %379 = vst [vmem:[%s272_s20 + $0x8] sm:$0xff] %v375_v34 }
 0x100   : > { %378 = vst [vmem:[%s272_s20] sm:$0xff] %v370_v33 }
 0x101 PF: > { %s14_s17 = sadd.s32 1, %s641_s17   ;;  %s765_s15 = smov %s637_s16 }
 0x102   : > { %p11_p5 = scmp.ge.s32.totalorder %s14_s17, 4   ;;  %s766_s16 = smov %s768_s18 }
 0x104   :  { %13 = sbr.rel (!%p11_p5) target bundleno = 2 (0x2), region = 75 }

// kernel: transformer_decoder_forward.41
= control target key start
LH: loop header
LB: loop body
LE: loop exit
PB: predicated region body
PF: predicated region fallthrough
CT: control target
= control target key end

     0   :  { %s298_s12 = smov 0   ;;  %s321_s0 = inlined_call_operand.vmem [shape: f32[16,128], index: 0, kind: input, shape index: {}]   ;;  %s322_s1 = inlined_call_operand.vmem [shape: f32[1,128], index: 1, kind: input, shape index: {}]   ;;  %s323_s2 = inlined_call_operand.vmem [shape: f32[1,128], index: 2, kind: input, shape index: {}]   ;;  %s324_s3 = inlined_call_operand.vmem [shape: f32[16,128], index: 3, kind: output, shape index: {}]  }
   0x1 LB: > { %s249_s13 = sadd.s32 4294967295, %s276_s12   ;;  %p253_p0 = scmp.ge.s32.totalorder %s276_s12, 1  ;;  %s276_s12 = sphi %s298_s12, %s13_s12  }
   0x2   : > { %p136_p1 = scmp.lt.s32.totalorder %s276_s12, 3 }
   0x4   : > { %p137_p2 = pnand %p253_p0, %p136_p1 }
   0x5   : > { %p158_p3 = scmp.lt.s32.totalorder (!%p137_p2), %s249_s13, 1  ;;  %v256_v9 = vld [vmem:[%s322_s1] ss:$0 sm:$0xff] (!%p137_p2) }
   0x6   : > { %140 = sbr.rel (%p137_p2) target bundleno = 329 (0x149), region = 32  ;;  %v257_v11 = vld [vmem:[%s323_s2] ss:$0 sm:$0xff] (!%p137_p2) }
   0xd   : > { %s326_s13 = smov (!%p158_p3, %s249_s13), 1 }
   0xe   : > { %s254_s14 = sshll.u32 %s326_s13, 3 }
   0xf   : > { %s161_s17 = scalar_lea.vmem %s321_s0, %s254_s14  ;;  %s165_s24 = scalar_lea.vmem %s324_s3, %s254_s14 }
  0x10   : > { %v166_v0 = vld [vmem:[%s161_s17] sm:$0xff] }
  0x11   : > { %167 = vadd.xlane.f32.xlu0 %v166_v0 }
  0x9e   : > { %v168_v1 = vpop.xlane.xlu0 %167 }
  0x9f   : > { %v170_v2 = vmul.f32 0.0078125, %v168_v1 }
  0xa1   : > { %v171_v3 = vsub.f32 %v166_v0, %v170_v2 }
  0xa3   : > { %v172_v4 = vmul.f32 %v171_v3, %v171_v3 }
  0xa5   : > { %173 = vadd.xlane.f32.xlu0 %v172_v4 }
 0x132   : > { %v174_v5 = vpop.xlane.xlu0 %173 }
 0x133   : > { %v175_v6 = vmul.f32 0.0078125, %v174_v5 }
 0x135   : > { %v176_v7 = vadd.f32 1e-05, %v175_v6 }
 0x137   : > { %268 = vrsqrt.f32 %v176_v7 }
 0x141   : > { %v269_v8 = vpop.eup %268 }
 0x142   : > { %v178_v10 = vmul.f32 %v269_v8, %v171_v3 }
 0x144   : > { %v186_v12 = vmul.f32 %v256_v9, %v178_v10 }
 0x146   : > { %v194_v13 = vadd.f32 %v257_v11, %v186_v12 }
 0x148   : > { %195 = vst [vmem:[%s165_s24] sm:$0xff] %v194_v13 }
 0x149 PF: > { %s13_s12 = sadd.s32 1, %s276_s12  }
 0x14a   : > { %p10_p4 = scmp.ge.s32.totalorder %s13_s12, 4  }
 0x14c   :  { %12 = sbr.rel (!%p10_p4) target bundleno = 1 (0x1), region = 62 }

// kernel: transformer_decoder_forward.30
= control target key start
LH: loop header
LB: loop body
LE: loop exit
PB: predicated region body
PF: predicated region fallthrough
CT: control target
= control target key end

     0   :  { %s755_s24 = smov 0   ;;  %s993_s0 = inlined_call_operand.vmem [shape: f32[16,128], index: 0, kind: input, shape index: {}]   ;;  %s994_s1 = inlined_call_operand.vmem [shape: f32[128,256], index: 1, kind: input, shape index: {}]   ;;  %s995_s2 = inlined_call_operand.vmem [shape: f32[1,256], index: 2, kind: input, shape index: {}]   ;;  %s996_s3 = inlined_call_operand.vmem [shape: f32[256,128], index: 3, kind: input, shape index: {}]   ;;  %s997_s4 = inlined_call_operand.vmem [shape: f32[1,128], index: 4, kind: input, shape index: {}]   ;;  %s998_s5 = inlined_call_operand.vmem [shape: f32[1,128], index: 5, kind: input, shape index: {}]   ;;  %s999_s6 = inlined_call_operand.vmem [shape: f32[1,128], index: 6, kind: input, shape index: {}]   ;;  %s1000_s7 = inlined_call_operand.vmem [shape: f32[16,128], index: 7, kind: output, shape index: {}]  }
   0x1 LB: > { %s584_s25 = sadd.s32 4294967295, %s712_s24   ;;  %p588_p0 = scmp.ge.s32.totalorder %s712_s24, 1  ;;  %s712_s24 = sphi %s755_s24, %s17_s24  }
   0x2   : > { %p236_p1 = scmp.lt.s32.totalorder %s712_s24, 3 }
   0x4   : > { %p237_p2 = pnand %p588_p0, %p236_p1 }
   0x5   : > { %v276_v0 = vld [vmem:[%s994_s1 + $0x8] sm:$0xff] (!%p237_p2)  ;;  %v278_v1 = vld [vmem:[%s994_s1 + $0x18] sm:$0xff] (!%p237_p2)  ;;  %v275_v2 = vld [vmem:[%s994_s1] sm:$0xff] (!%p237_p2)  ;;  %v714_v7 = vmov (!%p237_p2), 0.0   ;;  %p885_p3 = scmp.lt.s32.totalorder (!%p237_p2), %s584_s25, 1 }
   0x6   : > { %240 = sbr.rel (%p237_p2) target bundleno = 789 (0x315), region = 48  ;;  %v631_v3 = vpack.c.bf16 (!%p237_p2), %v278_v1, %v276_v0  ;;  %v277_v4 = vld [vmem:[%s994_s1 + $0x10] sm:$0xff] (!%p237_p2)  ;;  %v280_v5 = vld [vmem:[%s994_s1 + $0x28] sm:$0xff] (!%p237_p2)  ;;  %v282_v6 = vld [vmem:[%s994_s1 + $0x38] sm:$0xff] (!%p237_p2)  ;;  %383 = vmatprep.mubr.f32.mxu0 (!%p237_p2), %v714_v7 }
   0x7   : > { %v633_v8 = vpack.c.bf16 (!%p237_p2), %v277_v4, %v275_v2  ;;  %v635_v9 = vpack.c.bf16 (!%p237_p2), %v282_v6, %v280_v5  ;;  %v279_v10 = vld [vmem:[%s994_s1 + $0x20] sm:$0xff] (!%p237_p2)  ;;  %v281_v11 = vld [vmem:[%s994_s1 + $0x30] sm:$0xff] (!%p237_p2)  ;;  %v284_v12 = vld [vmem:[%s994_s1 + $0x48] sm:$0xff] (!%p237_p2) }
   0x8   : > { %632 = vmatprep.subr.bf16.mxu0 (!%p237_p2), %v631_v3  ;;  %v286_v13 = vld [vmem:[%s994_s1 + $0x58] sm:$0xff] (!%p237_p2)  ;;  %v637_v14 = vpack.c.bf16 (!%p237_p2), %v281_v11, %v279_v10  ;;  %v283_v16 = vld [vmem:[%s994_s1 + $0x40] sm:$0xff] (!%p237_p2)  ;;  %v285_v17 = vld [vmem:[%s994_s1 + $0x50] sm:$0xff] (!%p237_p2) }
   0x9   : > { %634 = vmatpush1.bf16.msra.mxu0 (!%p237_p2), %v633_v8  ;;  %v639_v15 = vpack.c.bf16 (!%p237_p2), %v286_v13, %v284_v12  ;;  %v288_v18 = vld [vmem:[%s994_s1 + $0x68] sm:$0xff] (!%p237_p2)  ;;  %v290_v19 = vld [vmem:[%s994_s1 + $0x78] sm:$0xff] (!%p237_p2)  ;;  %v641_v20 = vpack.c.bf16 (!%p237_p2), %v285_v17, %v283_v16  ;;  %v287_v22 = vld [vmem:[%s994_s1 + $0x60] sm:$0xff] (!%p237_p2) }
   0xa   : > { %636 = vmatprep.subr.bf16.mxu0 (!%p237_p2), %v635_v9  ;;  %v643_v21 = vpack.c.bf16 (!%p237_p2), %v290_v19, %v288_v18  ;;  %v289_v23 = vld [vmem:[%s994_s1 + $0x70] sm:$0xff] (!%p237_p2)  ;;  %v292_v24 = vld [vmem:[%s994_s1 + $0x88] sm:$0xff] (!%p237_p2)  ;;  %v294_v25 = vld [vmem:[%s994_s1 + $0x98] sm:$0xff] (!%p237_p2) }
   0xb   : > { %v291_v26 = vld [vmem:[%s994_s1 + $0x80] sm:$0xff] (!%p237_p2)  ;;  %v293_v27 = vld [vmem:[%s994_s1 + $0x90] sm:$0xff] (!%p237_p2)  ;;  %v409_v29 = vld [vmem:[%s996_s3 + $0x88] sm:$0xff] (!%p237_p2)  ;;  %v645_v31 = vpack.c.bf16 (!%p237_p2), %v289_v23, %v287_v22  ;;  %v647_v36 = vpack.c.bf16 (!%p237_p2), %v294_v25, %v292_v24 }
   0xc   : > { %v408_v28 = vld [vmem:[%s996_s3 + $0x80] sm:$0xff] (!%p237_p2)  ;;  %v393_v33 = vld [vmem:[%s996_s3 + $0x8] sm:$0xff] (!%p237_p2)  ;;  %v410_v34 = vld [vmem:[%s996_s3 + $0x90] sm:$0xff] (!%p237_p2)  ;;  %v649_v46 = vpack.c.bf16 (!%p237_p2), %v293_v27, %v291_v26 }
   0xd   : > { %638 = vmatpush1.bf16.msra.mxu0 %v637_v14  ;;  %v392_v30 = vld [vmem:[%s996_s3] sm:$0xff]  ;;  %v663_v32 = vpack.c.bf16 %v409_v29, %v408_v28  ;;  %v411_v35 = vld [vmem:[%s996_s3 + $0x98] sm:$0xff]  ;;  %v394_v39 = vld [vmem:[%s996_s3 + $0x10] sm:$0xff]  ;;  %s1003_s25 = smov (!%p885_p3, %s584_s25), 1 }
   0xe   : > { %640 = vmatprep.subr.bf16.mxu0 %v639_v15  ;;  %v665_v37 = vpack.c.bf16 %v393_v33, %v392_v30  ;;  %v667_v38 = vpack.c.bf16 %v411_v35, %v410_v34  ;;  %v395_v40 = vld [vmem:[%s996_s3 + $0x18] sm:$0xff]  ;;  %v412_v41 = vld [vmem:[%s996_s3 + $0xa0] sm:$0xff]  ;;  %v296_v42 = vld [vmem:[%s994_s1 + $0xa8] sm:$0xff]  ;;  %s589_s30 = sshll.u32 %s1003_s25, 3  ;;  %v309_v34 = vlaneseq }
   0xf   : > { %v298_v43 = vld [vmem:[%s994_s1 + $0xb8] sm:$0xff]  ;;  %664 = vmatprep.subr.bf16.mxu1 %v663_v32  ;;  %v413_v44 = vld [vmem:[%s996_s3 + $0xa8] sm:$0xff]  ;;  %v669_v45 = vpack.c.bf16 %v395_v40, %v394_v39  ;;  %v295_v47 = vld [vmem:[%s994_s1 + $0xa0] sm:$0xff]  ;;  %s269_s14 = scalar_lea.vmem %s993_s0, %s589_s30  ;;  %s273_s22 = scalar_lea.vmem %s1000_s7, %s589_s30 }
  0x10   : > { %666 = vmatpush3.bf16.msra.mxu1 %v665_v37  ;;  %v671_v48 = vpack.c.bf16 %v413_v44, %v412_v41  ;;  %v396_v49 = vld [vmem:[%s996_s3 + $0x20] sm:$0xff]  ;;  %v397_v50 = vld [vmem:[%s996_s3 + $0x28] sm:$0xff]  ;;  %v651_v51 = vpack.c.bf16 %v298_v43, %v296_v42  ;;  %v297_v52 = vld [vmem:[%s994_s1 + $0xb0] sm:$0xff]  ;;  %v310_v35 = vshrl.u32 %v309_v34, 7 }
  0x11   : > { %642 = vmatpush1.bf16.msra.mxu0 %v641_v20  ;;  %668 = vmatprep.subr.bf16.mxu1 %v667_v38  ;;  %v414_v53 = vld [vmem:[%s996_s3 + $0xb0] sm:$0xff]  ;;  %v415_v54 = vld [vmem:[%s996_s3 + $0xb8] sm:$0xff]  ;;  %v300_v55 = vld [vmem:[%s994_s1 + $0xc8] sm:$0xff]  ;;  %v673_v57 = vpack.c.bf16 %v397_v50, %v396_v49  ;;  %v653_v58 = vpack.c.bf16 %v297_v52, %v295_v47 }
  0x12   : > { %644 = vmatprep.subr.bf16.mxu0 %v643_v21  ;;  %v302_v56 = vld [vmem:[%s994_s1 + $0xd8] sm:$0xff]  ;;  %v299_v59 = vld [vmem:[%s994_s1 + $0xc0] sm:$0xff]  ;;  %v675_v60 = vpack.c.bf16 %v415_v54, %v414_v53  ;;  %v398_v61 = vld [vmem:[%s996_s3 + $0x30] sm:$0xff]  ;;  %v315_v38 = vsub.s32 1, %v310_v35 }
  0x13   : > { %v399_v62 = vld [vmem:[%s996_s3 + $0x38] sm:$0xff]  ;;  %v655_v63 = vpack.c.bf16 %v302_v56, %v300_v55  ;;  %v301_v0 = vld [vmem:[%s994_s1 + $0xd0] sm:$0xff]  ;;  %v416_v1 = vld [vmem:[%s996_s3 + $0xc0] sm:$0xff] }
  0x14   : > { %670 = vmatpush3.bf16.msra.mxu1 %v669_v45  ;;  %v417_v2 = vld [vmem:[%s996_s3 + $0xc8] sm:$0xff]  ;;  %v306_v4 = vld [vmem:[%s994_s1 + $0xf8] sm:$0xff]  ;;  %v677_v5 = vpack.c.bf16 %v399_v62, %v398_v61  ;;  %v657_v6 = vpack.c.bf16 %v301_v0, %v299_v59  ;;  %v303_v7 = vld [vmem:[%s994_s1 + $0xe0] sm:$0xff] }
  0x15   : > { %646 = vmatpush1.bf16.msra.mxu0 %v645_v31  ;;  %672 = vmatprep.subr.bf16.mxu1 %v671_v48  ;;  %v304_v3 = vld [vmem:[%s994_s1 + $0xe8] sm:$0xff]  ;;  %v679_v8 = vpack.c.bf16 %v417_v2, %v416_v1  ;;  %v400_v9 = vld [vmem:[%s996_s3 + $0x40] sm:$0xff]  ;;  %v305_v12 = vld [vmem:[%s994_s1 + $0xf0] sm:$0xff] }
  0x16   : > { %648 = vmatprep.subr.bf16.mxu0 %v647_v36  ;;  %v401_v10 = vld [vmem:[%s996_s3 + $0x48] sm:$0xff]  ;;  %v659_v11 = vpack.c.bf16 %v306_v4, %v304_v3  ;;  %v418_v13 = vld [vmem:[%s996_s3 + $0xd0] sm:$0xff]  ;;  %v419_v14 = vld [vmem:[%s996_s3 + $0xd8] sm:$0xff]  ;;  %v661_v16 = vpack.c.bf16 %v305_v12, %v303_v7  ;;  %v311_v36 = vsub.s32 0, %v310_v35 }
  0x17   : > { %v681_v15 = vpack.c.bf16 %v401_v10, %v400_v9  ;;  %v683_v17 = vpack.c.bf16 %v419_v14, %v418_v13  ;;  %v402_v18 = vld [vmem:[%s996_s3 + $0x50] sm:$0xff]  ;;  %v403_v19 = vld [vmem:[%s996_s3 + $0x58] sm:$0xff]  ;;  %v420_v20 = vld [vmem:[%s996_s3 + $0xe0] sm:$0xff] }
  0x18   : > { %674 = vmatpush3.bf16.msra.mxu1 %v673_v57  ;;  %v421_v21 = vld [vmem:[%s996_s3 + $0xe8] sm:$0xff]  ;;  %v685_v22 = vpack.c.bf16 %v403_v19, %v402_v18  ;;  %v274_v23 = vld [vmem:[%s269_s14] sm:$0xff]  ;;  %v422_v28 = vld [vmem:[%s996_s3 + $0xf0] sm:$0xff] }
  0x19   : > { %650 = vmatpush1.bf16.msra.mxu0 %v649_v46  ;;  %676 = vmatprep.subr.bf16.mxu1 %v675_v60  ;;  %v687_v24 = vpack.c.bf16 %v421_v21, %v420_v20  ;;  %v404_v25 = vld [vmem:[%s996_s3 + $0x60] sm:$0xff]  ;;  %v405_v26 = vld [vmem:[%s996_s3 + $0x68] sm:$0xff]  ;;  %v423_v29 = vld [vmem:[%s996_s3 + $0xf8] sm:$0xff] }
  0x1a   : > { %652 = vmatprep.subr.bf16.mxu0 %v651_v51  ;;  %v689_v27 = vpack.c.bf16 %v405_v26, %v404_v25  ;;  %v691_v30 = vpack.c.bf16 %v423_v29, %v422_v28  ;;  %v406_v31 = vld [vmem:[%s996_s3 + $0x70] sm:$0xff]  ;;  %v407_v32 = vld [vmem:[%s996_s3 + $0x78] sm:$0xff]  ;;  %v307_v37 = vld [vmem:[%s995_s2] sm:$0x3] }
  0x1b   : > { %v693_v33 = vpack.c.bf16 %v407_v32, %v406_v31  ;;  %v312_v39 = vrot.slane %v307_v37, %v311_v36  ;;  %v316_v40 = vrot.slane %v307_v37, %v315_v38  ;;  %v591_v48 = vld [vmem:[%s997_s4] ss:$0 sm:$0xff] }
  0x1c   : > { %678 = vmatpush3.bf16.msra.mxu1 %v677_v5  ;;  %v592_v61 = vld [vmem:[%s998_s5] ss:$0 sm:$0xff] }
  0x1d   : > { %654 = vmatpush1.bf16.msra.mxu0 %v653_v58  ;;  %680 = vmatprep.subr.bf16.mxu1 %v679_v8 }
  0x1e   : > { %656 = vmatprep.subr.bf16.mxu0 %v655_v63  ;;  %v593_v63 = vld [vmem:[%s999_s6] ss:$0 sm:$0xff] }
  0x20   : > { %682 = vmatpush3.bf16.msra.mxu1 %v681_v15 }
  0x21   : > { %658 = vmatpush1.bf16.msra.mxu0 %v657_v6  ;;  %684 = vmatprep.subr.bf16.mxu1 %v683_v17 }
  0x22   : > { %660 = vmatprep.subr.bf16.mxu0 %v659_v11 }
  0x24   : > { %686 = vmatpush3.bf16.msra.mxu1 %v685_v22 }
  0x25   : > { %662 = vmatpush1.bf16.msra.mxu0 %v661_v16  ;;  %688 = vmatprep.subr.bf16.mxu1 %v687_v24 }
  0x28   : > { %384 = vmatmul.mubr.f32.vlgmr.msra.gmra.mrb[0].mxu0 %v274_v23  ;;  %690 = vmatpush3.bf16.msra.mxu1 %v689_v27 }
  0x29   : > { %692 = vmatprep.subr.bf16.mxu1 %v691_v30 }
  0x2c   : > { %694 = vmatpush3.bf16.msra.mxu1 %v693_v33 }
  0xfb   : > { %v385_v41 = vpop.f32.mrb[0].mxu0 }
  0xfc   : > { %v386_v42 = vadd.f32 %v385_v41, %v312_v39  ;;  %v387_v43 = vpop.f32.mrb[1].mxu0 }
  0xfd   : > { %v388_v44 = vadd.f32 %v387_v43, %v316_v40 }
  0xfe   : > { %v390_v46 = vmax.f32 %v386_v42, 0.0 }
  0xff   : > { %v391_v45 = vmax.f32 %v388_v44, 0.0 }
 0x101   : > { %495 = vmatprep.mubr.f32.mxu1 %v391_v45 }
 0x102   : > { %496 = vmatmul.mubr.f32.vlgmr.msra.gmra.mrb[0].mxu1 %v390_v46 }
 0x1d5   : > { %v628_v47 = vpop.f32.mrb[0].mxu1 }
 0x1d6   : > { %v629_v49 = vpop.f32.mrb[1].mxu1 }
 0x1d7   : > { %v630_v50 = vadd.f32 %v629_v49, %v628_v47 }
 0x1d9   : > { %v498_v51 = vadd.f32 %v630_v50, %v591_v48 }
 0x1db   : > { %v501_v52 = vadd.f32 %v498_v51, %v274_v23 }
 0x1dd   : > { %502 = vadd.xlane.f32.xlu0 %v501_v52 }
 0x26a   : > { %v503_v53 = vpop.xlane.xlu0 %502 }
 0x26b   : > { %v505_v54 = vmul.f32 0.0078125, %v503_v53 }
 0x26d   : > { %v506_v55 = vsub.f32 %v501_v52, %v505_v54 }
 0x26f   : > { %v507_v56 = vmul.f32 %v506_v55, %v506_v55 }
 0x271   : > { %508 = vadd.xlane.f32.xlu0 %v507_v56 }
 0x2fe   : > { %v509_v57 = vpop.xlane.xlu0 %508 }
 0x2ff   : > { %v510_v58 = vmul.f32 0.0078125, %v509_v57 }
 0x301   : > { %v511_v59 = vadd.f32 1e-05, %v510_v58 }
 0x303   : > { %704 = vrsqrt.f32 %v511_v59 }
 0x30d   : > { %v705_v60 = vpop.eup %704 }
 0x30e   : > { %v513_v62 = vmul.f32 %v705_v60, %v506_v55 }
 0x310   : > { %v521_v0 = vmul.f32 %v592_v61, %v513_v62 }
 0x312   : > { %v529_v1 = vadd.f32 %v593_v63, %v521_v0 }
 0x314   : > { %530 = vst [vmem:[%s273_s22] sm:$0xff] %v529_v1 }
 0x315 PF: > { %s17_s24 = sadd.s32 1, %s712_s24  }
 0x316   : > { %p14_p4 = scmp.ge.s32.totalorder %s17_s24, 4  }
 0x318   :  { %16 = sbr.rel (!%p14_p4) target bundleno = 1 (0x1), region = 78 }

// kernel: transformer_decoder_forward.28
= control target key start
LH: loop header
LB: loop body
LE: loop exit
PB: predicated region body
PF: predicated region fallthrough
CT: control target
= control target key end

     0   :  { %s1223_s12 = smov 0   ;;  %s1344_s0 = inlined_call_operand.vmem [shape: f32[2,8,128], index: 0, kind: input, shape index: {}]   ;;  %s1345_s1 = inlined_call_operand.vmem [shape: f32[2,16,128], index: 1, kind: input, shape index: {}]   ;;  %s1346_s2 = inlined_call_operand.vmem [shape: f32[2,16,128], index: 2, kind: input, shape index: {}]   ;;  %s1347_s3 = inlined_call_operand.vmem [shape: f32[2,8,128], index: 3, kind: output, shape index: {}]  }
   0x1 LB: > { %s990_s13 = sadd.s32 4294967295, %s1195_s12   ;;  %p994_p0 = scmp.ge.s32.totalorder %s1195_s12, 1  ;;  %s1195_s12 = sphi %s1223_s12, %s13_s12  }
   0x2   : > { %p156_p1 = scmp.lt.s32.totalorder %s1195_s12, 3 }
   0x4   : > { %p157_p2 = pnand %p994_p0, %p156_p1 }
   0x5   : > { %p188_p3 = scmp.lt.s32.totalorder (!%p157_p2), %s990_s13, 1  ;;  %v1197_v0 = vmov (!%p157_p2), 0.0|0.0   ;;  %vm1198_vm0 = vmmov (!%p157_p2), 0   ;;  %v1199_v1 = vmov (!%p157_p2), 0.0   ;;  %vm212_vm1 = vcmask (!%p157_p2), 261120   ;;  %s1200_s22 = smov (!%p157_p2), 96  }
   0x6   : > { %160 = sbr.rel (%p157_p2) target bundleno = 2483 (0x9b3), region = 32  ;;  %1101 = vmatprep.subr.bf16.mxu0 (!%p157_p2), %v1197_v0  ;;  %1049 = vmatprep.mubr.msk.f32.mxu0 (!%p157_p2), %vm1198_vm0, %v1199_v1  ;;  %vm1248_vm2 = vmpackc.low (!%p157_p2), %vm212_vm1, %vm212_vm1  ;;  %vm292_vm3 = vcmask (!%p157_p2), 130048   ;;  %s1201_s26 = smov (!%p157_p2), 64   ;;  %vm908_vm4 = vcmask (!%p157_p2), 523264   ;;  %vm910_vm5 = vcmask (!%p157_p2), 785408  }
   0x7   : > { %1105 = vmatprep.subr.bf16.mxu1 (!%p157_p2), %v1197_v0  ;;  %1056 = vmatprep.mubr.msk.f32.mxu1 (!%p157_p2), %vm1198_vm0, %v1199_v1  ;;  %s1202_s27 = smov (!%p157_p2), 32  }
   0xd   : > { %s1351_s13 = smov (!%p188_p3, %s990_s13), 1 }
   0xe   : > { %s1019_s14 = sshll.u32 %s1351_s13, 4  ;;  %s995_s15 = sshll.u32 %s1351_s13, 3 }
   0xf   : > { %s196_s18 = scalar_lea.vmem %s1345_s1, %s1019_s14  ;;  %s191_s21 = scalar_lea.vmem %s1344_s0, %s995_s15 }
  0x10   : > { %v208_v2 = vld [vmem:[%s196_s18] sm:$0xff]  ;;  %v209_v3 = vld [vmem:[%s196_s18 + $0x8] sm:$0xff]  ;;  %s201_s25 = scalar_lea.vmem %s1346_s2, %s1019_s14  ;;  %s205_s30 = scalar_lea.vmem %s1347_s3, %s995_s15 }
  0x11   : > { %v1102_v5 = vpack.c.bf16 %v209_v3, %v208_v2  ;;  %v206_v6 = vld [vmem:[%s191_s21] sm:$0xff]  ;;  %v1267_v11 = vpack.i.bf16 %v209_v3, %v208_v2  ;;  %v211_v18 = vld [vmem:[%s201_s25 + $0x8] sm:$0xff] }
  0x12   : > { %v1260_v7 = vmul.f32 0.17677669, %v206_v6  ;;  %v210_v17 = vld [vmem:[%s201_s25] sm:$0xff] }
  0x13   : > { %1104 = vmatpush3.bf16.xpose.msk.msra.mxu0 %vm1248_vm2, %v1102_v5  ;;  %1144 = vrot.lane.b32.xlu1 %v1267_v11, %s1200_s22  ;;  %v1106_v19 = vpack.c.bf16 %v211_v18, %v210_v17  ;;  %v1292_v33 = vpack.i.bf16 %v211_v18, %v210_v17 }
  0x14   : > { %1112 = vmatprep.subr.bf16.mxu0 %v1197_v0 }
  0x15   : > { %1107 = vmatpush3.bf16.msra.mxu1 %v1106_v19 }
  0x16   : > { %1108 = vmatprep.subr.bf16.mxu1 %v1197_v0 }
  0x17   : > { %377 = vrot.lane.b32.xlu1 %v1260_v7, %s1200_s22 }
  0x1a   : > { %1050 = vmatmul.mubr.msk.f32.vlgmr.msra.gmra.mrb[0].mxu0 %vm212_vm1, %v1260_v7 }
  0x1b   : > { %1070 = vmatprep.mubr.msk.f32.mxu0 %vm1198_vm0, %v1199_v1 }
  0x85   : > { %v1145_v21 = vpop.permute.xlu1 %1144 }
  0x86   : > { %v1147_v22 = vunpack.i.h.bf16 %v1145_v21  ;;  %v1146_v23 = vunpack.i.l.bf16 %v1145_v21 }
  0x88   : > { %v1109_v25 = vpack.c.bf16 %v1147_v22, %v1146_v23 }
  0x89   : > { %v378_v27 = vpop.permute.xlu1 %377 }
  0xed   : > { %v288_v8 = vpop.f32.mrb[0].mxu0 }
  0xee   : > { %v1051_v9 = vpop.f32.mrb[1].mxu0  ;;  %v293_v10 = vsel %vm292_vm3, %v288_v8, -inf }
  0xef   : > { %294 = vmax.xlane.f32.xlu0 %v293_v10 }
 0x17c   : > { %v295_v12 = vpop.xlane.xlu0 %294 }
 0x17d   : > { %v296_v13 = vsub.f32 %v288_v8, %v295_v12 }
 0x17f   : > { %v297_v14 = vmul.f32 1.442695, %v296_v13 }
 0x181   : > { %1173 = vpow2.f32 %v297_v14 }
 0x18b   : > { %v1174_v15 = vpop.eup %1173 }
 0x18c   : > { %v299_v16 = vsel %vm292_vm3, %v1174_v15, 0.0 }
 0x18d   : > { %300 = vadd.xlane.f32.xlu0 %v299_v16 }
 0x21a   : > { %v301_v20 = vpop.xlane.xlu0 %300 }
 0x21b   : > { %1175 = vrcp.f32 %v301_v20 }
 0x225   : > { %v1176_v24 = vpop.eup %1175 }
 0x226   : > { %v303_v26 = vmul.f32 %v1176_v24, %v1174_v15 }
 0x228   : > { %1057 = vmatmul.mubr.msk.f32.vlgmr.msra.gmra.mrb[0].mxu1 %vm292_vm3, %v303_v26 }
 0x229   : > { %1111 = vmatpush3.bf16.xpose.msk.msra.mxu1 %vm1248_vm2, %v1109_v25  ;;  %1063 = vmatprep.mubr.msk.f32.mxu1 %vm1198_vm0, %v1199_v1 }
 0x22a   : > { %1119 = vmatprep.subr.bf16.mxu1 %v1197_v0 }
 0x230   : > { %1064 = vmatmul.mubr.msk.f32.vlgmr.msra.gmra.mrb[2].mxu1 %vm212_vm1, %v378_v27 }
 0x231   : > { %1084 = vmatprep.mubr.msk.f32.mxu1 %vm1198_vm0, %v1199_v1 }
 0x2fb   : > { %v1289_v28 = vpop.f32.mrb[0].mxu1 }
 0x2fc   : > { %v1058_v29 = vpop.f32.mrb[1].mxu1 }
 0x303   : > { %v455_v30 = vpop.f32.mrb[2].mxu1 }
 0x304   : > { %v1065_v31 = vpop.f32.mrb[3].mxu1  ;;  %v459_v32 = vsel %vm292_vm3, %v455_v30, -inf }
 0x305   : > { %460 = vmax.xlane.f32.xlu0 %v459_v32 }
 0x31b   : > { %1149 = vrot.lane.b32.xlu0 %v1292_v33, %s1200_s22 }
 0x31f   : > { %1154 = vrot.lane.b32.xlu0 %v1267_v11, %s1201_s26 }
 0x323   : > { %551 = vrot.lane.b32.xlu0 %v1260_v7, %s1201_s26 }
 0x392   : > { %v461_v34 = vpop.xlane.xlu0 %460 }
 0x393   : > { %v462_v35 = vsub.f32 %v455_v30, %v461_v34 }
 0x395   : > { %v463_v36 = vmul.f32 1.442695, %v462_v35 }
 0x396   : > { %v1150_v39 = vpop.permute.xlu0 %1149 }
 0x397   : > { %1177 = vpow2.f32 %v463_v36  ;;  %v1152_v40 = vunpack.i.h.bf16 %v1150_v39  ;;  %v1151_v41 = vunpack.i.l.bf16 %v1150_v39 }
 0x399   : > { %v1113_v42 = vpack.c.bf16 %v1152_v40, %v1151_v41 }
 0x39a   : > { %v1155_v44 = vpop.permute.xlu0 %1154 }
 0x39b   : > { %1114 = vmatpush3.bf16.msra.mxu0 %v1113_v42  ;;  %v1157_v45 = vunpack.i.h.bf16 %v1155_v44  ;;  %v1156_v46 = vunpack.i.l.bf16 %v1155_v44 }
 0x39c   : > { %1115 = vmatprep.subr.bf16.mxu0 %v1197_v0 }
 0x39d   : > { %v1116_v48 = vpack.c.bf16 %v1157_v45, %v1156_v46 }
 0x39e   : > { %v552_v50 = vpop.permute.xlu0 %551 }
 0x3a1   : > { %v1178_v37 = vpop.eup %1177 }
 0x3a2   : > { %v465_v38 = vsel %vm292_vm3, %v1178_v37, 0.0 }
 0x3a3   : > { %466 = vadd.xlane.f32.xlu1 %v465_v38 }
 0x3b4   : > { %1159 = vrot.lane.b32.xlu1 %v1292_v33, %s1201_s26 }
 0x3b8   : > { %1164 = vrot.lane.b32.xlu1 %v1267_v11, %s1202_s27 }
 0x430   : > { %v467_v43 = vpop.xlane.xlu1 %466 }
 0x431   : > { %1179 = vrcp.f32 %v467_v43 }
 0x434   : > { %v1160_v56 = vpop.permute.xlu1 %1159 }
 0x435   : > { %v1162_v57 = vunpack.i.h.bf16 %v1160_v56  ;;  %v1161_v58 = vunpack.i.l.bf16 %v1160_v56 }
 0x437   : > { %v1120_v59 = vpack.c.bf16 %v1162_v57, %v1161_v58 }
 0x438   : > { %v1165_v3 = vpop.permute.xlu1 %1164 }
 0x439   : > { %1121 = vmatpush3.bf16.msra.mxu1 %v1120_v59  ;;  %v1167_v6 = vunpack.i.h.bf16 %v1165_v3  ;;  %v1166_v8 = vunpack.i.l.bf16 %v1165_v3 }
 0x43a   : > { %1122 = vmatprep.subr.bf16.mxu1 %v1197_v0 }
 0x43b   : > { %v1180_v47 = vpop.eup %1179  ;;  %v1123_v11 = vpack.c.bf16 %v1167_v6, %v1166_v8 }
 0x43c   : > { %v469_v49 = vmul.f32 %v1180_v47, %v1178_v37 }
 0x43e   : > { %1071 = vmatmul.mubr.msk.f32.vlgmr.msra.gmra.mrb[2].mxu0 %vm292_vm3, %v469_v49 }
 0x43f   : > { %1118 = vmatpush3.bf16.xpose.msk.msra.mxu0 %vm1248_vm2, %v1116_v48  ;;  %1077 = vmatprep.mubr.msk.f32.mxu0 %vm1198_vm0, %v1199_v1 }
 0x440   : > { %1126 = vmatprep.subr.bf16.mxu0 %v1197_v0 }
 0x446   : > { %1078 = vmatmul.mubr.msk.f32.vlgmr.msra.gmra.mrb[4].mxu0 %vm212_vm1, %v552_v50 }
 0x447   : > { %1098 = vmatprep.mubr.msk.f32.mxu0 %vm1198_vm0, %v1199_v1 }
 0x511   : > { %v547_v51 = vpop.f32.mrb[2].mxu0 }
 0x512   : > { %v1072_v52 = vpop.f32.mrb[3].mxu0 }
 0x519   : > { %v629_v53 = vpop.f32.mrb[4].mxu0 }
 0x51a   : > { %v1079_v54 = vpop.f32.mrb[5].mxu0  ;;  %v633_v55 = vsel %vm292_vm3, %v629_v53, -inf }
 0x51b   : > { %634 = vmax.xlane.f32.xlu0 %v633_v55 }
 0x5a8   : > { %v635_v60 = vpop.xlane.xlu0 %634 }
 0x5a9   : > { %v636_v61 = vsub.f32 %v629_v53, %v635_v60 }
 0x5ab   : > { %v637_v62 = vmul.f32 1.442695, %v636_v61 }
 0x5ad   : > { %1181 = vpow2.f32 %v637_v62 }
 0x5b7   : > { %v1182_v63 = vpop.eup %1181 }
 0x5b8   : > { %v639_v2 = vsel %vm292_vm3, %v1182_v63, 0.0 }
 0x5b9   : > { %640 = vadd.xlane.f32.xlu1 %v639_v2 }
 0x5ca   : > { %723 = vrot.lane.b32.xlu1 %v1260_v7, %s1202_s27 }
 0x646   : > { %v641_v5 = vpop.xlane.xlu1 %640 }
 0x647   : > { %1183 = vrcp.f32 %v641_v5 }
 0x64a   : > { %v724_v0 = vpop.permute.xlu1 %723 }
 0x651   : > { %v1184_v9 = vpop.eup %1183 }
 0x652   : > { %v643_v10 = vmul.f32 %v1184_v9, %v1182_v63 }
 0x654   : > { %1085 = vmatmul.mubr.msk.f32.vlgmr.msra.gmra.mrb[4].mxu1 %vm292_vm3, %v643_v10 }
 0x655   : > { %1125 = vmatpush3.bf16.xpose.msk.msra.mxu1 %vm1248_vm2, %v1123_v11  ;;  %1091 = vmatprep.mubr.msk.f32.mxu1 %vm1198_vm0, %v1199_v1 }
 0x65c   : > { %1092 = vmatmul.mubr.msk.f32.vlgmr.msra.gmra.mrb[6].mxu1 %vm212_vm1, %v724_v0 }
 0x727   : > { %v719_v7 = vpop.f32.mrb[4].mxu1 }
 0x728   : > { %v1086_v12 = vpop.f32.mrb[5].mxu1 }
 0x72f   : > { %v801_v13 = vpop.f32.mrb[6].mxu1 }
 0x730   : > { %v1093_v14 = vpop.f32.mrb[7].mxu1  ;;  %v805_v15 = vsel %vm292_vm3, %v801_v13, -inf }
 0x731   : > { %806 = vmax.xlane.f32.xlu0 %v805_v15 }
 0x747   : > { %1169 = vrot.lane.b32.xlu0 %v1292_v33, %s1202_s27 }
 0x74b   : > { %896 = vrot.lane.b32.xlu0 %v547_v51, %s1202_s27 }
 0x74f   : > { %900 = vrot.lane.b32.xlu0 %v719_v7, %s1201_s26 }
 0x7be   : > { %v807_v4 = vpop.xlane.xlu0 %806 }
 0x7bf   : > { %v808_v16 = vsub.f32 %v801_v13, %v807_v4 }
 0x7c1   : > { %v809_v1 = vmul.f32 1.442695, %v808_v16 }
 0x7c2   : > { %v1170_v17 = vpop.permute.xlu0 %1169 }
 0x7c3   : > { %1185 = vpow2.f32 %v809_v1  ;;  %v1172_v18 = vunpack.i.h.bf16 %v1170_v17  ;;  %v1171_v19 = vunpack.i.l.bf16 %v1170_v17 }
 0x7c5   : > { %v1127_v20 = vpack.c.bf16 %v1172_v18, %v1171_v19 }
 0x7c6   : > { %v897_v29 = vpop.permute.xlu0 %896 }
 0x7c7   : > { %1128 = vmatpush3.bf16.msra.mxu0 %v1127_v20  ;;  %v907_v31 = vsel %vm212_vm1, %v1289_v28, %v897_v29 }
 0x7ca   : > { %v901_v30 = vpop.permute.xlu0 %900 }
 0x7cb   : > { %v909_v32 = vsel %vm908_vm4, %v907_v31, %v901_v30 }
 0x7cd   : > { %v1186_v21 = vpop.eup %1185 }
 0x7ce   : > { %v811_v22 = vsel %vm292_vm3, %v1186_v21, 0.0 }
 0x7cf   : > { %812 = vadd.xlane.f32.xlu1 %v811_v22 }
 0x85c   : > { %v813_v23 = vpop.xlane.xlu1 %812 }
 0x85d   : > { %1187 = vrcp.f32 %v813_v23 }
 0x867   : > { %v1188_v24 = vpop.eup %1187 }
 0x868   : > { %v815_v25 = vmul.f32 %v1188_v24, %v1186_v21 }
 0x86a   : > { %1099 = vmatmul.mubr.msk.f32.vlgmr.msra.gmra.mrb[6].mxu0 %vm292_vm3, %v815_v25 }
 0x93d   : > { %v891_v26 = vpop.f32.mrb[6].mxu0 }
 0x93e   : > { %904 = vrot.lane.b32.xlu0 %v891_v26, %s1200_s22  ;;  %v1100_v27 = vpop.f32.mrb[7].mxu0 }
 0x9b0   : > { %v905_v33 = vpop.permute.xlu0 %904 }
 0x9b1   : > { %v911_v34 = vsel %vm910_vm5, %v909_v32, %v905_v33 }
 0x9b2   : > { %912 = vst [vmem:[%s205_s30] sm:$0xff] %v911_v34 }
 0x9b3 PF: > { %s13_s12 = sadd.s32 1, %s1195_s12  }
 0x9b4   : > { %p10_p4 = scmp.ge.s32.totalorder %s13_s12, 4  }
 0x9b6   :  { %12 = sbr.rel (!%p10_p4) target bundleno = 1 (0x1), region = 68 }

</bundles_post_ra>
